<compile_context>
chip_gen: v7x
topology: tpu7x:2x2x1
jax: 0.10.0
libtpu: 0.0.40
codegen_flags: <defaults>
</compile_context>

<pallas_src>
import functools

import jax
import jax.numpy as jnp
from jax.experimental import pallas as pl
from jax.experimental.pallas import tpu as pltpu


def _gumble_kernel(xl_ref, xh_ref, u_ref, pw1_ref, w2t_ref, slopes_ref,
                   conv_ref, res_ref, ml_ref, mh_ref, *, tau):
    """One grid step: TB low-branch samples + TB high-branch samples.

    xl_ref, xh_ref : (TB, C*W)   flattened (channel-major) input slabs
    u_ref          : (TB, 4)     uniform noise; cols [0:2]=low, [2:4]=high
    pw1_ref        : (C*W, C)    fused avg-pool + Conv2d(C, C, 1) matrix
    w2t_ref        : (C, 2)      Conv2d(C, 2, 1) weight, transposed
    slopes_ref     : (2,) SMEM   PReLU slopes (a1, a2)
    conv_ref, res_ref : (TB, 2*C*W)  low half in [:, :C*W], high half in [:, C*W:]
    ml_ref, mh_ref : (TB, 2)     gumbel masks for the low / high samples
    """
    xl = xl_ref[...]
    xh = xh_ref[...]
    pw1 = pw1_ref[...]
    w2t = w2t_ref[...]
    a1 = slopes_ref[0]
    a2 = slopes_ref[1]

    def channel_mask(x, u):
        # AdaptiveAvgPool2d(1) + Conv2d(C, C, 1, bias=False) fused: one matmul.
        h = jnp.dot(x, pw1, preferred_element_type=jnp.float32,
                    precision=jax.lax.Precision.HIGHEST)            # (TB, C)
        h = jnp.where(h >= 0, h, a1 * h)                            # PReLU
        # Conv2d(C, 2, 1, bias=False): K = C is tiny, default precision is
        # plenty accurate and lowers to a single MXU pass.
        logits = jnp.dot(h, w2t, preferred_element_type=jnp.float32)  # (TB, 2)
        logits = jnp.where(logits >= 0, logits, a2 * logits)        # PReLU
        # softmax over the 2-way class axis
        m = jnp.max(logits, axis=-1, keepdims=True)
        e = jnp.exp(logits - m)
        p = e / jnp.sum(e, axis=-1, keepdims=True)
        # gumbel softmax: the noise is added to the *probabilities*, not the
        # logits -- this matches the PyTorch module, do not "fix" it.
        g = -jnp.log(-jnp.log(u))
        z = (p + g) / tau
        zm = jnp.max(z, axis=-1, keepdims=True)
        ez = jnp.exp(z - zm)
        return ez / jnp.sum(ez, axis=-1, keepdims=True)              # (TB, 2)

    ml = channel_mask(xl, u_ref[:, 0:2])
    mh = channel_mask(xh, u_ref[:, 2:4])

    cw = xl.shape[1]
    # input_conv uses class 0 of the mask.
    conv_l = xl * ml[:, 0:1]
    conv_h = xh * mh[:, 0:1]
    conv_ref[:, :cw] = conv_l.astype(conv_ref.dtype)
    conv_ref[:, cw:] = conv_h.astype(conv_ref.dtype)
    # Residual branch uses class 1; softmax classes sum to 1 (up to fp32
    # rounding), so res = x - conv saves two big broadcast-multiplies.
    res_ref[:, :cw] = (xl - conv_l).astype(res_ref.dtype)
    res_ref[:, cw:] = (xh - conv_h).astype(res_ref.dtype)
    ml_ref[...] = ml
    mh_ref[...] = mh


def _pick_batch_tile(B, block_b):
    """Largest batch tile that (a) divides B, (b) is sublane-aligned (x8), and
    (c) leaves >= ~4 grid steps so the Pallas pipeline can overlap DMA with
    compute and shard steps across TensorCores.  Falls back to a single-step
    grid (TB = B) when no aligned divisor exists -- still correct."""
    target = min(block_b, max(8, B // 4))
    for tb in range(min(target, B), 7, -1):
        if B % tb == 0 and tb % 8 == 0:
            return tb
    return B


def gumble_block_2d_forward(x_low, x_high, w1, w2, a1, a2, u, *, tau=1.0,
                            block_b=256, out_dtype=None):
    """Training-path forward of gumble_block_2D (test_flag=False).

    x_low, x_high : (B, C, 1, W)
    w1 : (C, C)   Conv2d(C, C, 1, bias=False) weight (1x1 kernel squeezed)
    w2 : (2, C)   Conv2d(C, 2, 1, bias=False) weight (1x1 kernel squeezed)
    a1, a2 : scalars, PReLU slopes
    u : (2*B, 2)  uniform noise in (0, 1), interleaved (b, low), (b, high)
    out_dtype : dtype for input_conv / input_res (default: x_low.dtype).
                Pass jnp.bfloat16 to halve the dominant HBM write traffic if
                downstream consumers tolerate it.
    """
    B, C, H, W = x_low.shape
    assert H == 1, "module broadcasting requires H == 1"
    CW = C * W
    out_dtype = x_low.dtype if out_dtype is None else out_dtype
    TB = _pick_batch_tile(B, block_b)
    assert B % TB == 0
    grid = (B // TB,)

    # Metadata-only reshapes; no concatenated HBM copy of the inputs.
    xl2 = x_low.reshape(B, CW)
    xh2 = x_high.reshape(B, CW)
    u4 = u.reshape(B, 4)                     # row b = [u_low(b,:), u_high(b,:)]

    # Fuse AdaptiveAvgPool2d(1) (H == 1 -> mean over W per channel) with the
    # first 1x1 conv into a single (C*W, C) matrix.
    pool_mat = jnp.repeat(jnp.eye(C, dtype=jnp.float32), W, axis=0) / float(W)
    pw1 = jnp.dot(pool_mat, w1.T.astype(jnp.float32),
                  precision=jax.lax.Precision.HIGHEST)               # (CW, C)
    w2t = w2.T.astype(jnp.float32)                                   # (C, 2)
    slopes = jnp.stack([jnp.asarray(a1, jnp.float32),
                        jnp.asarray(a2, jnp.float32)])               # (2,) SMEM

    itemsize = jnp.dtype(out_dtype).itemsize
    cost = pl.CostEstimate(
        flops=4 * B * CW * C + 8 * B * C + 6 * B * CW,
        transcendentals=16 * B,
        bytes_accessed=(2 * B * CW * 4            # read x_low + x_high
                        + 2 * B * 2 * CW * itemsize  # write conv + res
                        + B * 4 * 4 + CW * C * 4 + 4 * B * 4),
    )

    conv2, res2, mask_l, mask_h = pl.pallas_call(
        functools.partial(_gumble_kernel, tau=float(tau)),
        out_shape=(
            jax.ShapeDtypeStruct((B, 2 * CW), out_dtype),
            jax.ShapeDtypeStruct((B, 2 * CW), out_dtype),
            jax.ShapeDtypeStruct((B, 2), jnp.float32),
            jax.ShapeDtypeStruct((B, 2), jnp.float32),
        ),
        grid=grid,
        in_specs=[
            pl.BlockSpec((TB, CW), lambda i: (i, 0)),           # x_low slab
            pl.BlockSpec((TB, CW), lambda i: (i, 0)),           # x_high slab
            pl.BlockSpec((TB, 4), lambda i: (i, 0)),            # noise
            pl.BlockSpec((CW, C), lambda i: (0, 0)),            # fused pool@w1^T
            pl.BlockSpec((C, 2), lambda i: (0, 0)),             # conv2 weight^T
            pl.BlockSpec(memory_space=pltpu.MemorySpace.SMEM),  # PReLU slopes
        ],
        out_specs=(
            pl.BlockSpec((TB, 2 * CW), lambda i: (i, 0)),
            pl.BlockSpec((TB, 2 * CW), lambda i: (i, 0)),
            pl.BlockSpec((TB, 2), lambda i: (i, 0)),
            pl.BlockSpec((TB, 2), lambda i: (i, 0)),
        ),
        compiler_params=pltpu.CompilerParams(
            dimension_semantics=("parallel",)),
        cost_estimate=cost,
    )(xl2, xh2, u4, pw1, w2t, slopes)

    # (B, 2*C*W) -> (B, 2, C, 1, W) is metadata-only (low half first, then high).
    input_conv = conv2.reshape(B, 2, C, 1, W)
    input_res = res2.reshape(B, 2, C, 1, W)
    # torch returns ch_mask_1[:, :, 0].reshape(-1, 1, 1, 1, 1) in interleaved
    # (b, low), (b, high) order.
    conv_mask = jnp.stack([mask_l[:, 0], mask_h[:, 0]], axis=1)      # (B, 2)
    ch_mask_conv = conv_mask.reshape(-1, 1, 1, 1, 1)
    return input_conv, input_res, ch_mask_conv


def reference_forward(x_low, x_high, w1, w2, a1, a2, u, *, tau=1.0):
    """Pure-JAX reference mirroring the PyTorch forward (test_flag=False)."""
    B, C, H, W = x_low.shape
    out = jnp.concatenate([x_low[:, None], x_high[:, None]], axis=1)  # (B,2,C,H,W)
    x = out.reshape(-1, C, 1, W)
    pooled = jnp.mean(x, axis=(2, 3))                                 # AdaptiveAvgPool2d(1)
    h = jnp.dot(pooled, w1.T, precision=jax.lax.Precision.HIGHEST)
    h = jnp.where(h >= 0, h, a1 * h)
    logits = jnp.dot(h, w2.T, precision=jax.lax.Precision.HIGHEST)
    logits = jnp.where(logits >= 0, logits, a2 * logits)
    p = jax.nn.softmax(logits, axis=1)
    g = -jnp.log(-jnp.log(u))
    mask = jax.nn.softmax((p + g) / tau, axis=1)
    mask5 = mask.reshape(B, 2, 2, 1, 1)
    input_conv = out * mask5[:, :, 0, :, :][..., None]
    input_res = out * mask5[:, :, 1, :, :][..., None]
    return input_conv, input_res, mask5[:, :, 0, :, :].reshape(-1, 1, 1, 1, 1)


if __name__ == "__main__":
    B, C, H, W = 32, 8, 1, 128       # inchannel = C = 8, outchannel = 2
    N = 2 * B                        # interleaved (low, high) samples

    key = jax.random.PRNGKey(0)
    k1, k2, k3, k4, k5 = jax.random.split(key, 5)
    x_low = jax.random.normal(k1, (B, C, H, W), jnp.float32)
    x_high = jax.random.normal(k2, (B, C, H, W), jnp.float32)
    w1 = jax.random.normal(k3, (C, C), jnp.float32) * 0.1   # Conv2d(C, C, 1, bias=False)
    w2 = jax.random.normal(k4, (2, C), jnp.float32) * 0.1   # Conv2d(C, 2, 1, bias=False)
    a1 = jnp.float32(0.25)                                   # PReLU default slope
    a2 = jnp.float32(0.25)
    # torch re-samples until there are no exact zeros; keep u well inside (0, 1)
    # so -log(-log(u)) is numerically well conditioned for the comparison.
    u = jax.random.uniform(k5, (N, 2), jnp.float32, minval=0.01, maxval=0.99)

    out_conv, out_res, mask_conv = gumble_block_2d_forward(
        x_low, x_high, w1, w2, a1, a2, u, tau=1.0)
    jax.block_until_ready((out_conv, out_res, mask_conv))

    ref_conv, ref_res, ref_mask = reference_forward(
        x_low, x_high, w1, w2, a1, a2, u, tau=1.0)

    assert out_conv.shape == (B, 2, C, 1, W)
    assert out_res.shape == (B, 2, C, 1, W)
    assert mask_conv.shape == (N, 1, 1, 1, 1)
    assert jnp.allclose(out_conv, ref_conv, rtol=1e-4, atol=1e-4)
    assert jnp.allclose(out_res, ref_res, rtol=1e-4, atol=1e-4)
    assert jnp.allclose(mask_conv, ref_mask, rtol=1e-4, atol=1e-4)
    print("KERNEL_OK")
</pallas_src>

<mosaic_0001>
module attributes {stable_mosaic.version = 11 : i64} {
  func.func @_gumble_kernel(%arg0: i32, %arg1: memref<8x1024xf32, #tpu.memory_space<vmem>>, %arg2: memref<8x1024xf32, #tpu.memory_space<vmem>>, %arg3: memref<8x4xf32, #tpu.memory_space<vmem>>, %arg4: memref<1024x8xf32, #tpu.memory_space<vmem>>, %arg5: memref<8x2xf32, #tpu.memory_space<vmem>>, %arg6: memref<2xf32, #tpu.memory_space<smem>>, %arg7: memref<8x2048xf32, #tpu.memory_space<vmem>>, %arg8: memref<8x2048xf32, #tpu.memory_space<vmem>>, %arg9: memref<8x2xf32, #tpu.memory_space<vmem>>, %arg10: memref<8x2xf32, #tpu.memory_space<vmem>>) attributes {dimension_semantics = [#tpu.dimension_semantics<parallel>], iteration_bounds = array<i64: 4>, scalar_prefetch = 0 : i64, scratch_operands = 0 : i64, tpu.core_type = #tpu.core_type<tc>, window_params = [{transform_indices = @transform_0, window_bounds = array<i64: 8, 1024>}, {transform_indices = @transform_1, window_bounds = array<i64: 8, 1024>}, {transform_indices = @transform_2, window_bounds = array<i64: 8, 4>}, {pipeline_mode = #tpu.pipeline_mode<synchronous>, transform_indices = @transform_3, window_bounds = array<i64: 1024, 8>}, {pipeline_mode = #tpu.pipeline_mode<synchronous>, transform_indices = @transform_4, window_bounds = array<i64: 8, 2>}, {transform_indices = @transform_5, window_bounds = array<i64: 2>}, {transform_indices = @transform_6, window_bounds = array<i64: 8, 2048>}, {transform_indices = @transform_7, window_bounds = array<i64: 8, 2048>}, {transform_indices = @transform_8, window_bounds = array<i64: 8, 2>}, {transform_indices = @transform_9, window_bounds = array<i64: 8, 2>}]} {
    %c0 = arith.constant 0 : index
    %c0_0 = arith.constant 0 : index
    %0 = vector.load %arg1[%c0, %c0_0] : memref<8x1024xf32, #tpu.memory_space<vmem>>, vector<8x1024xf32>
    %c0_1 = arith.constant 0 : index
    %c0_2 = arith.constant 0 : index
    %1 = vector.load %arg2[%c0_1, %c0_2] : memref<8x1024xf32, #tpu.memory_space<vmem>>, vector<8x1024xf32>
    %c0_3 = arith.constant 0 : index
    %c0_4 = arith.constant 0 : index
    %2 = vector.load %arg4[%c0_3, %c0_4] : memref<1024x8xf32, #tpu.memory_space<vmem>>, vector<1024x8xf32>
    %c0_5 = arith.constant 0 : index
    %c0_6 = arith.constant 0 : index
    %3 = vector.load %arg5[%c0_5, %c0_6] : memref<8x2xf32, #tpu.memory_space<vmem>>, vector<8x2xf32>
    %c0_7 = arith.constant 0 : index
    %4 = memref.load %arg6[%c0_7] : memref<2xf32, #tpu.memory_space<smem>>
    %c1 = arith.constant 1 : index
    %5 = memref.load %arg6[%c1] : memref<2xf32, #tpu.memory_space<smem>>
    %c0_8 = arith.constant 0 : index
    %c0_9 = arith.constant 0 : index
    %6 = vector.load %arg3[%c0_8, %c0_9] : memref<8x4xf32, #tpu.memory_space<vmem>>, vector<8x2xf32>
    %cst = arith.constant dense<0.000000e+00> : vector<8x8xf32>
    %7 = tpu.matmul %0, %2, %cst {dimension_numbers = #tpu.dot_dimension_numbers<[1], [0], [0], [1], [0, 0, 1, 1], [], []>, precision = #tpu.contract_precision<fp32>} : vector<8x1024xf32>, vector<1024x8xf32>, vector<8x8xf32> -> vector<8x8xf32>
    %cst_10 = arith.constant 0.000000e+00 : f32
    %8 = vector.broadcast %cst_10 : f32 to vector<8x8xf32>
    %9 = arith.cmpf oge, %7, %8 : vector<8x8xf32>
    %10 = vector.broadcast %4 : f32 to vector<8x8xf32>
    %11 = arith.mulf %10, %7 : vector<8x8xf32>
    %12 = arith.select %9, %7, %11 : vector<8x8xi1>, vector<8x8xf32>
    %cst_11 = arith.constant dense<0.000000e+00> : vector<8x2xf32>
    %13 = tpu.matmul %12, %3, %cst_11 {dimension_numbers = #tpu.dot_dimension_numbers<[1], [0], [0], [1], [0, 0, 1, 1], [], []>} : vector<8x8xf32>, vector<8x2xf32>, vector<8x2xf32> -> vector<8x2xf32>
    %cst_12 = arith.constant 0.000000e+00 : f32
    %14 = vector.broadcast %cst_12 : f32 to vector<8x2xf32>
    %15 = arith.cmpf oge, %13, %14 : vector<8x2xf32>
    %16 = vector.broadcast %5 : f32 to vector<8x2xf32>
    %17 = arith.mulf %16, %13 : vector<8x2xf32>
    %18 = arith.select %15, %13, %17 : vector<8x2xi1>, vector<8x2xf32>
    %cst_13 = arith.constant dense<0xFF800000> : vector<8xf32>
    %19 = vector.multi_reduction <maximumf>, %18, %cst_13 [1] : vector<8x2xf32> to vector<8xf32>
    %20 = vector.shape_cast %19 : vector<8xf32> to vector<8x1xf32>
    %21 = vector.broadcast %20 : vector<8x1xf32> to vector<8x2xf32>
    %22 = arith.subf %18, %21 : vector<8x2xf32>
    %23 = math.exp %22 : vector<8x2xf32>
    %cst_14 = arith.constant dense<0.000000e+00> : vector<8xf32>
    %24 = vector.multi_reduction <add>, %23, %cst_14 [1] : vector<8x2xf32> to vector<8xf32>
    %25 = vector.shape_cast %24 : vector<8xf32> to vector<8x1xf32>
    %26 = vector.broadcast %25 : vector<8x1xf32> to vector<8x2xf32>
    %27 = arith.divf %23, %26 : vector<8x2xf32>
    %28 = math.log %6 : vector<8x2xf32>
    %cst_15 = arith.constant 0.000000e+00 : f32
    %29 = vector.broadcast %cst_15 : f32 to vector<8x2xf32>
    %30 = arith.subf %29, %28 : vector<8x2xf32>
    %31 = math.log %30 : vector<8x2xf32>
    %cst_16 = arith.constant 0.000000e+00 : f32
    %32 = vector.broadcast %cst_16 : f32 to vector<8x2xf32>
    %33 = arith.subf %32, %31 : vector<8x2xf32>
    %34 = arith.addf %27, %33 : vector<8x2xf32>
    %cst_17 = arith.constant 1.000000e+00 : f32
    %35 = vector.broadcast %cst_17 : f32 to vector<8x2xf32>
    %36 = arith.divf %34, %35 : vector<8x2xf32>
    %cst_18 = arith.constant dense<0xFF800000> : vector<8xf32>
    %37 = vector.multi_reduction <maximumf>, %36, %cst_18 [1] : vector<8x2xf32> to vector<8xf32>
    %38 = vector.shape_cast %37 : vector<8xf32> to vector<8x1xf32>
    %39 = vector.broadcast %38 : vector<8x1xf32> to vector<8x2xf32>
    %40 = arith.subf %36, %39 : vector<8x2xf32>
    %41 = math.exp %40 : vector<8x2xf32>
    %cst_19 = arith.constant dense<0.000000e+00> : vector<8xf32>
    %42 = vector.multi_reduction <add>, %41, %cst_19 [1] : vector<8x2xf32> to vector<8xf32>
    %43 = vector.shape_cast %42 : vector<8xf32> to vector<8x1xf32>
    %44 = vector.broadcast %43 : vector<8x1xf32> to vector<8x2xf32>
    %45 = arith.divf %41, %44 : vector<8x2xf32>
    %c0_20 = arith.constant 0 : index
    %c2 = arith.constant 2 : index
    %46 = vector.load %arg3[%c0_20, %c2] : memref<8x4xf32, #tpu.memory_space<vmem>>, vector<8x2xf32>
    %cst_21 = arith.constant dense<0.000000e+00> : vector<8x8xf32>
    %47 = tpu.matmul %1, %2, %cst_21 {dimension_numbers = #tpu.dot_dimension_numbers<[1], [0], [0], [1], [0, 0, 1, 1], [], []>, precision = #tpu.contract_precision<fp32>} : vector<8x1024xf32>, vector<1024x8xf32>, vector<8x8xf32> -> vector<8x8xf32>
    %cst_22 = arith.constant 0.000000e+00 : f32
    %48 = vector.broadcast %cst_22 : f32 to vector<8x8xf32>
    %49 = arith.cmpf oge, %47, %48 : vector<8x8xf32>
    %50 = vector.broadcast %4 : f32 to vector<8x8xf32>
    %51 = arith.mulf %50, %47 : vector<8x8xf32>
    %52 = arith.select %49, %47, %51 : vector<8x8xi1>, vector<8x8xf32>
    %cst_23 = arith.constant dense<0.000000e+00> : vector<8x2xf32>
    %53 = tpu.matmul %52, %3, %cst_23 {dimension_numbers = #tpu.dot_dimension_numbers<[1], [0], [0], [1], [0, 0, 1, 1], [], []>} : vector<8x8xf32>, vector<8x2xf32>, vector<8x2xf32> -> vector<8x2xf32>
    %cst_24 = arith.constant 0.000000e+00 : f32
    %54 = vector.broadcast %cst_24 : f32 to vector<8x2xf32>
    %55 = arith.cmpf oge, %53, %54 : vector<8x2xf32>
    %56 = vector.broadcast %5 : f32 to vector<8x2xf32>
    %57 = arith.mulf %56, %53 : vector<8x2xf32>
    %58 = arith.select %55, %53, %57 : vector<8x2xi1>, vector<8x2xf32>
    %cst_25 = arith.constant dense<0xFF800000> : vector<8xf32>
    %59 = vector.multi_reduction <maximumf>, %58, %cst_25 [1] : vector<8x2xf32> to vector<8xf32>
    %60 = vector.shape_cast %59 : vector<8xf32> to vector<8x1xf32>
    %61 = vector.broadcast %60 : vector<8x1xf32> to vector<8x2xf32>
    %62 = arith.subf %58, %61 : vector<8x2xf32>
    %63 = math.exp %62 : vector<8x2xf32>
    %cst_26 = arith.constant dense<0.000000e+00> : vector<8xf32>
    %64 = vector.multi_reduction <add>, %63, %cst_26 [1] : vector<8x2xf32> to vector<8xf32>
    %65 = vector.shape_cast %64 : vector<8xf32> to vector<8x1xf32>
    %66 = vector.broadcast %65 : vector<8x1xf32> to vector<8x2xf32>
    %67 = arith.divf %63, %66 : vector<8x2xf32>
    %68 = math.log %46 : vector<8x2xf32>
    %cst_27 = arith.constant 0.000000e+00 : f32
    %69 = vector.broadcast %cst_27 : f32 to vector<8x2xf32>
    %70 = arith.subf %69, %68 : vector<8x2xf32>
    %71 = math.log %70 : vector<8x2xf32>
    %cst_28 = arith.constant 0.000000e+00 : f32
    %72 = vector.broadcast %cst_28 : f32 to vector<8x2xf32>
    %73 = arith.subf %72, %71 : vector<8x2xf32>
    %74 = arith.addf %67, %73 : vector<8x2xf32>
    %cst_29 = arith.constant 1.000000e+00 : f32
    %75 = vector.broadcast %cst_29 : f32 to vector<8x2xf32>
    %76 = arith.divf %74, %75 : vector<8x2xf32>
    %cst_30 = arith.constant dense<0xFF800000> : vector<8xf32>
    %77 = vector.multi_reduction <maximumf>, %76, %cst_30 [1] : vector<8x2xf32> to vector<8xf32>
    %78 = vector.shape_cast %77 : vector<8xf32> to vector<8x1xf32>
    %79 = vector.broadcast %78 : vector<8x1xf32> to vector<8x2xf32>
    %80 = arith.subf %76, %79 : vector<8x2xf32>
    %81 = math.exp %80 : vector<8x2xf32>
    %cst_31 = arith.constant dense<0.000000e+00> : vector<8xf32>
    %82 = vector.multi_reduction <add>, %81, %cst_31 [1] : vector<8x2xf32> to vector<8xf32>
    %83 = vector.shape_cast %82 : vector<8xf32> to vector<8x1xf32>
    %84 = vector.broadcast %83 : vector<8x1xf32> to vector<8x2xf32>
    %85 = arith.divf %81, %84 : vector<8x2xf32>
    %86 = vector.extract_strided_slice %45 {offsets = [0, 0], sizes = [8, 1], strides = [1, 1]} : vector<8x2xf32> to vector<8x1xf32>
    %87 = vector.broadcast %86 : vector<8x1xf32> to vector<8x1024xf32>
    %88 = arith.mulf %0, %87 : vector<8x1024xf32>
    %89 = vector.extract_strided_slice %85 {offsets = [0, 0], sizes = [8, 1], strides = [1, 1]} : vector<8x2xf32> to vector<8x1xf32>
    %90 = vector.broadcast %89 : vector<8x1xf32> to vector<8x1024xf32>
    %91 = arith.mulf %1, %90 : vector<8x1024xf32>
    %c0_32 = arith.constant 0 : index
    %c0_33 = arith.constant 0 : index
    %92 = vector.load %arg7[%c0_32, %c0_33] : memref<8x2048xf32, #tpu.memory_space<vmem>>, vector<8x1024xf32>
    tpu.vector_store %arg7[%c0_32, %c0_33], %88 {strides = array<i32>} : memref<8x2048xf32, #tpu.memory_space<vmem>>, vector<8x1024xf32>,
    %c0_34 = arith.constant 0 : index
    %c1024 = arith.constant 1024 : index
    %93 = vector.load %arg7[%c0_34, %c1024] : memref<8x2048xf32, #tpu.memory_space<vmem>>, vector<8x1024xf32>
    tpu.vector_store %arg7[%c0_34, %c1024], %91 {strides = array<i32>} : memref<8x2048xf32, #tpu.memory_space<vmem>>, vector<8x1024xf32>,
    %94 = arith.subf %0, %88 : vector<8x1024xf32>
    %c0_35 = arith.constant 0 : index
    %c0_36 = arith.constant 0 : index
    %95 = vector.load %arg8[%c0_35, %c0_36] : memref<8x2048xf32, #tpu.memory_space<vmem>>, vector<8x1024xf32>
    tpu.vector_store %arg8[%c0_35, %c0_36], %94 {strides = array<i32>} : memref<8x2048xf32, #tpu.memory_space<vmem>>, vector<8x1024xf32>,
    %96 = arith.subf %1, %91 : vector<8x1024xf32>
    %c0_37 = arith.constant 0 : index
    %c1024_38 = arith.constant 1024 : index
    %97 = vector.load %arg8[%c0_37, %c1024_38] : memref<8x2048xf32, #tpu.memory_space<vmem>>, vector<8x1024xf32>
    tpu.vector_store %arg8[%c0_37, %c1024_38], %96 {strides = array<i32>} : memref<8x2048xf32, #tpu.memory_space<vmem>>, vector<8x1024xf32>,
    %c0_39 = arith.constant 0 : index
    %c0_40 = arith.constant 0 : index
    %98 = vector.load %arg9[%c0_39, %c0_40] : memref<8x2xf32, #tpu.memory_space<vmem>>, vector<8x2xf32>
    tpu.vector_store %arg9[%c0_39, %c0_40], %45 {strides = array<i32>} : memref<8x2xf32, #tpu.memory_space<vmem>>, vector<8x2xf32>,
    %c0_41 = arith.constant 0 : index
    %c0_42 = arith.constant 0 : index
    %99 = vector.load %arg10[%c0_41, %c0_42] : memref<8x2xf32, #tpu.memory_space<vmem>>, vector<8x2xf32>
    tpu.vector_store %arg10[%c0_41, %c0_42], %85 {strides = array<i32>} : memref<8x2xf32, #tpu.memory_space<vmem>>, vector<8x2xf32>,
    return
  }
  func.func @transform_0(%arg0: i32) -> (i32, i32) {
    %c0_i32 = arith.constant 0 : i32
    %c0_i32_0 = arith.constant 0 : i32
    return %arg0, %c0_i32 : i32, i32
  }
  func.func @transform_1(%arg0: i32) -> (i32, i32) {
    %c0_i32 = arith.constant 0 : i32
    %c0_i32_0 = arith.constant 0 : i32
    return %arg0, %c0_i32 : i32, i32
  }
  func.func @transform_2(%arg0: i32) -> (i32, i32) {
    %c0_i32 = arith.constant 0 : i32
    %c0_i32_0 = arith.constant 0 : i32
    return %arg0, %c0_i32 : i32, i32
  }
  func.func @transform_3(%arg0: i32) -> (i32, i32) {
    %c0_i32 = arith.constant 0 : i32
    %c0_i32_0 = arith.constant 0 : i32
    %c0_i32_1 = arith.constant 0 : i32
    return %c0_i32, %c0_i32_0 : i32, i32
  }
  func.func @transform_4(%arg0: i32) -> (i32, i32) {
    %c0_i32 = arith.constant 0 : i32
    %c0_i32_0 = arith.constant 0 : i32
    %c0_i32_1 = arith.constant 0 : i32
    return %c0_i32, %c0_i32_0 : i32, i32
  }
  func.func @transform_5(%arg0: i32) -> i32 {
    %c0_i32 = arith.constant 0 : i32
    %c0_i32_0 = arith.constant 0 : i32
    return %c0_i32 : i32
  }
  func.func @transform_6(%arg0: i32) -> (i32, i32) {
    %c0_i32 = arith.constant 0 : i32
    %c0_i32_0 = arith.constant 0 : i32
    return %arg0, %c0_i32 : i32, i32
  }
  func.func @transform_7(%arg0: i32) -> (i32, i32) {
    %c0_i32 = arith.constant 0 : i32
    %c0_i32_0 = arith.constant 0 : i32
    return %arg0, %c0_i32 : i32, i32
  }
  func.func @transform_8(%arg0: i32) -> (i32, i32) {
    %c0_i32 = arith.constant 0 : i32
    %c0_i32_0 = arith.constant 0 : i32
    return %arg0, %c0_i32 : i32, i32
  }
  func.func @transform_9(%arg0: i32) -> (i32, i32) {
    %c0_i32 = arith.constant 0 : i32
    %c0_i32_0 = arith.constant 0 : i32
    return %arg0, %c0_i32 : i32, i32
  }
}

</mosaic_0001>

<bundles_post_ra>
// kernel: tpu_custom_call.1
= control target key start
LH: loop header
LB: loop body
LE: loop exit
PB: predicated region body
PF: predicated region fallthrough
CT: control target
= control target key end

     0   :  { %s15362_s0 = inlined_call_operand.vmem [shape: f32[32,1024], index: 0, kind: input, shape index: {}]   ;;  %s15363_s1 = inlined_call_operand.vmem [shape: f32[32,1024], index: 1, kind: input, shape index: {}]   ;;  %s15364_s2 = inlined_call_operand.vmem [shape: f32[32,4], index: 2, kind: input, shape index: {}]   ;;  %s15365_s3 = inlined_call_operand.vmem [shape: f32[1024,8], index: 3, kind: input, shape index: {}]   ;;  %s15366_s4 = inlined_call_operand.vmem [shape: f32[8,2], index: 4, kind: input, shape index: {}]   ;;  %s15367_s5 = inlined_call_operand.vmem [shape: f32[2], index: 5, kind: input, shape index: {}]   ;;  %s15368_s6 = inlined_call_operand.hbm [shape: f32[32,2048], index: 6, kind: output, shape index: {0}]   ;;  %s15369_s7 = inlined_call_operand.hbm [shape: f32[32,2048], index: 7, kind: output, shape index: {1}]   ;;  %s15370_s8 = inlined_call_operand.vmem [shape: f32[32,2], index: 8, kind: output, shape index: {2}]   ;;  %s15371_s9 = inlined_call_operand.vmem [shape: f32[32,2], index: 9, kind: output, shape index: {3}]  }
   0x1   :  { %15789 = sst [smem:[#allocation255_spill]] %s15362_s0 }
   0x2   :  { %15790 = sst [smem:[#allocation256_spill]] %s15363_s1 }
   0x3   :  { %15 = vsyncpa [#allocation4], 0 }
   0x4   :  { %16 = vsyncpa [#allocation3], 0 }
   0x5   :  { %18 = vsyncpa [#allocation3 + $0x1], 0 }
   0x6   :  { %19 = vsyncpa [#allocation7], 0 }
   0x7   :  { %21 = vsyncpa [#allocation7 + $0x1], 0  ;;  %s11501_s30 = smov 0   ;;  %s11503_s10 = smov 0  }
   0x8   :  { %s11505_s11 = smov 0   ;;  %s11507_s12 = smov 0  }
   0x9 LB: > { %s11522_s13 = sadd.s32 4294967295, %s11442_s12   ;;  %s7974_s14 = sadd.s32 4294967294, %s11442_s12   ;;  %s11442_s12 = sphi %s11507_s12, %s16616_s12   ;;  %s11438_s11 = sphi %s11505_s11, %s16615_s11   ;;  %s11434_s10 = sphi %s11503_s10, %s16614_s10   ;;  %s11430_s30 = sphi %s11501_s30, %s16613_s30  }
   0xa   : > { %s11526_s15 = sadd.s32 1, %s11442_s12   ;;  %s175_s16 = sadd.s32 1, %s11438_s11 }
   0xb   : > { %s172_s17 = ssub.s32 %s11442_s12, %s11526_s15  ;;  %p185_p0 = scmp.ne.s32.totalorder %s11438_s11, %s11434_s10 }
   0xc   : > { %p173_p1 = scmp.eq.s32.totalorder %s172_s17, 0  ;;  %p186_p2 = scmp.eq.s32.totalorder %s11522_s13, 3 }
   0xd   : > { %p191_p3 = scmp.ne.s32.totalorder %s11434_s10, %s11430_s30  ;;  %p192_p4 = scmp.eq.s32.totalorder %s7974_s14, 3 }
   0xe   : > { %s11537_s18 = scalar_select %p173_p1, %s11438_s11, %s175_s16  }
   0xf   : > { %p11539_p5 = por %p186_p2, %p185_p0  ;;  %p11543_p6 = por %p192_p4, %p191_p3 }
  0x10   : > { %p7975_p7 = scmp.ge.s32.totalorder %s11442_s12, 1  ;;  %p277_p8 = scmp.lt.s32.totalorder %s11442_s12, 5 }
  0x11   : > { %p11253_p9 = scmp.eq.s32.totalorder %s11522_s13, 0  ;;  %s296_s24 = sshll.u32 %s15367_s5, 4  ;;  %s297_s24 = int_to_ptr.vmem [resolvable:$true] %s296_s24 }
  0x12   : > { %p11550_p10 = pnand %p7975_p7, %p277_p8  ;;  %s11329_s25 = scalar_lea.vmem %s297_s24, 16 }
  0x13   : > { %p11330_p13 = scmp.ne.s32.totalorder %s297_s24, %s11329_s25  ;;  %p11337_p3 = scmp.lt.s32.totalorder %s297_s24, %s297_s24 }
  0x14   : > { %p11242_p11 = pneg %p11550_p10  ;;  %p11338_p4 = scmp.lt.s32.totalorder %s11329_s25, %s11329_s25 }
  0x16   : > { %p11243_p12 = pnand %p11253_p9, %p11242_p11  ;;  %p11339_p7 = por %p11338_p4, %p11337_p3 }
  0x18   : > { %p11331_p0 = pneg %p11243_p12 }
  0x1a   : > { %p11332_p1 = pnand %p11331_p0, %p11330_p13 }
  0x1c   : > { %p11333_p2 = pneg %p11332_p1 }
  0x1e   : > { %p11340_p8 = pnand %p11339_p7, %p11333_p2 }
  0x20   : > { %11343 = shalt.err (!%p11340_p8)
}
  0x21   : > { %s11444_s26 = smov [#allocation2]   ;;  %332 = sbr.rel (%p11550_p10) target bundleno = 2301 (0x8fd), region = 44 }
  0x22   : > { %11245 = dma.vmem_to_smem (!%p11243_p12), %s297_s24, 16, %s11444_s26, [#allocation4]  }
  0x28   : > { %11417 = dma.done.wait (%p11253_p9), [#allocation4], 16  }
  0x29   : > { %11419 = vsyncadd (%p11253_p9), [#allocation4], 4294967280 }
  0x2a   : > { %338 = sfence }
  0x2b   : > { %v445_v0 = vld [vmem:[%s15365_s3 + $0x80] sm:$0xff]  ;;  %v446_v1 = vld [vmem:[%s15365_s3 + $0x88] sm:$0xff]  ;;  %v447_v7 = vld [vmem:[%s15365_s3 + $0x90] sm:$0xff]  ;;  %p391_p9 = scmp.lt.s32.totalorder %s11522_s13, 3  ;;  %s15816_s0 = sld [smem:[#allocation255_spill]]  ;;  %vm11446_vm0 = vmmov 0  }
  0x2c   : > { %v429_v2 = vld [vmem:[%s15365_s3] sm:$0xff]  ;;  %v610_v3 = vand.u32 4294901760, %v445_v0  ;;  %v613_v4 = vand.u32 4294901760, %v446_v1  ;;  %v430_v5 = vld [vmem:[%s15365_s3 + $0x8] sm:$0xff]  ;;  %v448_v8 = vld [vmem:[%s15365_s3 + $0x98] sm:$0xff]  ;;  %v616_v10 = vand.u32 4294901760, %v447_v7 }
  0x2d   : > { %v562_v6 = vand.u32 4294901760, %v429_v2  ;;  %v565_v9 = vand.u32 4294901760, %v430_v5  ;;  %v619_v11 = vand.u32 4294901760, %v448_v8  ;;  %v431_v12 = vld [vmem:[%s15365_s3 + $0x10] sm:$0xff]  ;;  %v432_v13 = vld [vmem:[%s15365_s3 + $0x18] sm:$0xff]  ;;  %v11594_v14 = vld [vmem:[%s15365_s3 + $0xa0] sm:$0xff] }
  0x2e   : > { %v11596_v15 = vpack.c.bf16 %v613_v4, %v610_v3  ;;  %v568_v16 = vand.u32 4294901760, %v431_v12  ;;  %v571_v17 = vand.u32 4294901760, %v432_v13  ;;  %v11601_v18 = vld [vmem:[%s15365_s3 + $0xa8] sm:$0xff]  ;;  %v622_v19 = vand.u32 4294901760, %v11594_v14  ;;  %v11607_v20 = vld [vmem:[%s15365_s3 + $0x20] sm:$0xff]  ;;  %v11624_v26 = vld [vmem:[%s15365_s3 + $0xb0] sm:$0xff] }
  0x2f   : > { %v11612_v21 = vld [vmem:[%s15365_s3 + $0x28] sm:$0xff]  ;;  %v11614_v22 = vpack.c.bf16 %v565_v9, %v562_v6  ;;  %v11616_v23 = vpack.c.bf16 %v619_v11, %v616_v10  ;;  %v625_v24 = vand.u32 4294901760, %v11601_v18  ;;  %v11619_v25 = vsub.f32 %v445_v0, %v610_v3  ;;  %v11629_v27 = vld [vmem:[%s15365_s3 + $0xb8] sm:$0xff]  ;;  %v11653_v36 = vld [vmem:[%s15365_s3 + $0x30] sm:$0xff]  ;;  %s11900_s21 = scalar_select %p391_p9, %s11522_s13, 3 }
  0x30   : > { %15794 = vst [vmem:[#allocation11_spill] sm:$0xff] %v11596_v15  ;;  %9699 = vmatprep.subr.bf16.mxu0 %v11596_v15  ;;  %v11632_v28 = vpack.c.bf16 %v571_v17, %v568_v16  ;;  %v11634_v29 = vsub.f32 %v446_v1, %v613_v4  ;;  %v574_v30 = vand.u32 4294901760, %v11607_v20  ;;  %v577_v31 = vand.u32 4294901760, %v11612_v21  ;;  %v11675_v45 = vld [vmem:[%s15365_s3 + $0x38] sm:$0xff]  ;;  %v11705_v58 = vld [vmem:[%s15365_s3 + $0xc0] sm:$0xff]  ;;  %v11715_v63 = vld [vmem:[%s15365_s3 + $0xc8] sm:$0xff] }
  0x31   : > { %15795 = vst [vmem:[#allocation12_spill] sm:$0xff] %v11614_v22  ;;  %15796 = vst [vmem:[#allocation13_spill] sm:$0xff] %v11616_v23  ;;  %9701 = vmatpush3.bf16.msra.mxu0 %v11614_v22  ;;  %v11643_v32 = vpack.c.bf16 %v625_v24, %v622_v19  ;;  %v15385_v33 = vand.u32 4294901760, %v11619_v25  ;;  %v11646_v34 = vsub.f32 %v429_v2, %v562_v6  ;;  %v628_v39 = vand.u32 4294901760, %v11624_v26  ;;  %v11732_v4 = vld [vmem:[%s15365_s3 + $0x40] sm:$0xff]  ;;  %s8000_s28 = sshll.u32 %s11900_s21, 6 }
  0x32   : > { %15797 = vst [vmem:[#allocation14_spill] sm:$0xff] %v11632_v28  ;;  %v11648_v35 = vsub.f32 %v430_v5, %v565_v9  ;;  %9703 = vmatprep.subr.bf16.mxu0 %v11616_v23  ;;  %v15384_v37 = vand.u32 4294901760, %v11634_v29  ;;  %v11661_v38 = vpack.c.bf16 %v577_v31, %v574_v30  ;;  %v631_v40 = vand.u32 4294901760, %v11629_v27  ;;  %v11737_v5 = vld [vmem:[%s15365_s3 + $0x48] sm:$0xff]  ;;  %s11999_s24 = scalar_lea.vmem %s15816_s0, %s8000_s28  ;;  %s16362_s1 = sld [smem:[#allocation256_spill]] }
  0x33   : > { %15798 = vst [vmem:[#allocation15_spill] sm:$0xff] %v11643_v32  ;;  %v789_v41 = vsub.f32 %v11619_v25, %v15385_v33  ;;  %v15381_v42 = vand.u32 4294901760, %v11646_v34  ;;  %v11670_v44 = vsub.f32 %v447_v7, %v616_v10  ;;  %v11686_v48 = vsub.f32 %v448_v8, %v619_v11  ;;  %s14740_s22 = sld [smem:[#allocation2]]  ;;  %s15037_s23 = sld [smem:[#allocation2 + $0x1]] }
  0x34   : > { %15799 = vst [vmem:[#allocation16_spill] sm:$0xff] %v11661_v38  ;;  %v15380_v43 = vand.u32 4294901760, %v11648_v35  ;;  %v796_v46 = vsub.f32 %v11634_v29, %v15384_v37  ;;  %v11684_v47 = vpack.c.bf16 %v631_v40, %v628_v39  ;;  %v580_v49 = vand.u32 4294901760, %v11653_v36  ;;  %s15193_s25 = sshll.u32 %s11900_s21, 3  ;;  %s11447_s21 = smov 126  }
  0x35   : > { %9705 = vmatpush3.bf16.msra.mxu0 %v11632_v28  ;;  %v790_v50 = vand.u32 4294901760, %v789_v41  ;;  %v677_v51 = vsub.f32 %v11646_v34, %v15381_v42  ;;  %v15379_v53 = vand.u32 4294901760, %v11670_v44  ;;  %v15378_v55 = vand.u32 4294901760, %v11686_v48  ;;  %s404_s29 = scalar_lea.vmem %s15364_s2, %s15193_s25  ;;  %s408_s17 = scalar_lea.vmem %s15370_s8, %s15193_s25 }
  0x36   : > { %15800 = vst [vmem:[#allocation17_spill] sm:$0xff] %v11684_v47  ;;  %v684_v52 = vsub.f32 %v11648_v35, %v15380_v43  ;;  %9707 = vmatprep.subr.bf16.mxu0 %v11643_v32  ;;  %v797_v54 = vand.u32 4294901760, %v796_v46  ;;  %v583_v56 = vand.u32 4294901760, %v11675_v45  ;;  %v11700_v57 = vsub.f32 %v431_v12, %v568_v16  ;;  %s8002_s14 = sshll.u32 %s11522_s13, 11 }
  0x37   : > { %v678_v59 = vand.u32 4294901760, %v677_v51  ;;  %v803_v61 = vsub.f32 %v11670_v44, %v15379_v53  ;;  %v11710_v62 = vsub.f32 %v432_v13, %v571_v17  ;;  %v810_v1 = vsub.f32 %v11686_v48, %v15378_v55  ;;  %s15270_s27 = scalar_lea.hbm %s15368_s6, %s8002_s14 }
  0x38   : > { %v685_v60 = vand.u32 4294901760, %v684_v52  ;;  %v11717_v0 = vpack.c.bf16 %v797_v54, %v790_v50  ;;  %v11726_v2 = vpack.c.bf16 %v583_v56, %v580_v49  ;;  %v15375_v3 = vand.u32 4294901760, %v11700_v57  ;;  %s14627_s16 = scalar_lea.vmem %s16362_s1, %s8000_s28 }
  0x39   : > { %9709 = vmatpush3.bf16.msra.mxu0 %v11661_v38  ;;  %v804_v7 = vand.u32 4294901760, %v803_v61  ;;  %v15374_v8 = vand.u32 4294901760, %v11710_v62  ;;  %v634_v9 = vand.u32 4294901760, %v11705_v58  ;;  %v811_v10 = vand.u32 4294901760, %v810_v1 }
  0x3a   : > { %15801 = vst [vmem:[#allocation18_spill] sm:$0xff] %v11717_v0  ;;  %15802 = vst [vmem:[#allocation19_spill] sm:$0xff] %v11726_v2  ;;  %v11740_v6 = vpack.c.bf16 %v685_v60, %v678_v59  ;;  %9731 = vmatprep.subr.bf16.mxu1 %v11717_v0  ;;  %9711 = vmatprep.subr.bf16.mxu0 %v11684_v47  ;;  %v691_v11 = vsub.f32 %v11700_v57, %v15375_v3  ;;  %v637_v12 = vand.u32 4294901760, %v11715_v63  ;;  %vm4013_vm2 = vcmask 64512  }
  0x3b   : > { %v11753_v13 = vsub.f32 %v11594_v14, %v622_v19  ;;  %v698_v16 = vsub.f32 %v11710_v62, %v15374_v8  ;;  %v11762_v17 = vsub.f32 %v11601_v18, %v625_v24  ;;  %v586_v41 = vand.u32 4294901760, %v11732_v4  ;;  %v11769_v14 = vld [vmem:[%s15365_s3 + $0xd0] sm:$0xff]  ;;  %v11774_v19 = vld [vmem:[%s15365_s3 + $0xd8] sm:$0xff] }
  0x3c   : > { %15803 = vst [vmem:[#allocation20_spill] sm:$0xff] %v11740_v6  ;;  %9733 = vmatpush3.bf16.msra.mxu1 %v11740_v6  ;;  %v589_v46 = vand.u32 4294901760, %v11737_v5  ;;  %v11776_v50 = vpack.c.bf16 %v811_v10, %v804_v7  ;;  %v692_v51 = vand.u32 4294901760, %v691_v11  ;;  %v11782_v18 = vpack.c.bf16 %v637_v12, %v634_v9 }
  0x3d   : > { %v15372_v24 = vand.u32 4294901760, %v11753_v13  ;;  %9713 = vmatpush3.bf16.msra.mxu0 %v11726_v2  ;;  %v699_v52 = vand.u32 4294901760, %v698_v16  ;;  %v15373_v54 = vand.u32 4294901760, %v11762_v17  ;;  %v11796_v60 = vsub.f32 %v11607_v20, %v574_v30  ;;  %v11813_v20 = vld [vmem:[%s15365_s3 + $0x50] sm:$0xff] }
  0x3e   : > { %15804 = vst [vmem:[#allocation21_spill] sm:$0xff] %v11776_v50  ;;  %15805 = vst [vmem:[#allocation22_spill] sm:$0xff] %v11782_v18  ;;  %v11791_v59 = vpack.c.bf16 %v589_v46, %v586_v41  ;;  %9735 = vmatprep.subr.bf16.mxu1 %v11776_v50  ;;  %9715 = vmatprep.subr.bf16.mxu0 %v11782_v18  ;;  %v11806_v1 = vsub.f32 %v11612_v21, %v577_v31  ;;  %v640_v7 = vand.u32 4294901760, %v11769_v14  ;;  %v11829_v31 = vld [vmem:[%s15365_s3 + $0x58] sm:$0xff]  ;;  %vm4091_vm4 = vcmask 15360  }
  0x3f   : > { %v817_v61 = vsub.f32 %v11753_v13, %v15372_v24  ;;  %v15392_v10 = vand.u32 4294901760, %v11774_v19  ;;  %v11815_v30 = vpack.c.bf16 %v699_v52, %v692_v51  ;;  %v824_v11 = vsub.f32 %v11762_v17, %v15373_v54 }
  0x40   : > { %15806 = vst [vmem:[#allocation23_spill] sm:$0xff] %v11791_v59  ;;  %v15376_v16 = vand.u32 4294901760, %v11796_v60  ;;  %v11824_v21 = vsub.f32 %v11624_v26, %v628_v39  ;;  %v15377_v51 = vand.u32 4294901760, %v11806_v1  ;;  %v11841_v54 = vsub.f32 %v11629_v27, %v631_v40 }
  0x41   : > { %15807 = vst [vmem:[#allocation24_spill] sm:$0xff] %v11815_v30  ;;  %v818_v24 = vand.u32 4294901760, %v817_v61  ;;  %v11836_v52 = vpack.c.bf16 %v15392_v10, %v640_v7  ;;  %9737 = vmatpush3.bf16.msra.mxu1 %v11815_v30  ;;  %v825_v26 = vand.u32 4294901760, %v824_v11  ;;  %9717 = vmatpush3.bf16.msra.mxu0 %v11791_v59  ;;  %v15387_v8 = vand.u32 4294901760, %v11813_v20 }
  0x42   : > { %v705_v39 = vsub.f32 %v11796_v60, %v15376_v16  ;;  %v15383_v61 = vand.u32 4294901760, %v11824_v21  ;;  %v712_v3 = vsub.f32 %v11806_v1, %v15377_v51  ;;  %v15382_v27 = vand.u32 4294901760, %v11841_v54  ;;  %v11865_v16 = vld [vmem:[%s15365_s3 + $0xe0] sm:$0xff]  ;;  %v11870_v51 = vld [vmem:[%s15365_s3 + $0xe8] sm:$0xff] }
  0x43   : > { %15808 = vst [vmem:[#allocation25_spill] sm:$0xff] %v11836_v52  ;;  %9719 = vmatprep.subr.bf16.mxu0 %v11836_v52  ;;  %v15386_v40 = vand.u32 4294901760, %v11829_v31  ;;  %v11860_v11 = vsub.f32 %v11653_v36, %v580_v49  ;;  %v11872_v55 = vpack.c.bf16 %v825_v26, %v818_v24  ;;  %v11880_v36 = vsub.f32 %v11675_v45, %v583_v56 }
  0x44   : > { %v706_v53 = vand.u32 4294901760, %v705_v39  ;;  %v831_v43 = vsub.f32 %v11824_v21, %v15383_v61  ;;  %v713_v49 = vand.u32 4294901760, %v712_v3  ;;  %v838_v42 = vsub.f32 %v11841_v54, %v15382_v27  ;;  %v11895_v39 = vld [vmem:[%s15365_s3 + $0x60] sm:$0xff]  ;;  %v11909_v61 = vld [vmem:[%s15365_s3 + $0x68] sm:$0xff] }
  0x45   : > { %15809 = vst [vmem:[#allocation26_spill] sm:$0xff] %v11872_v55  ;;  %v11889_v24 = vpack.c.bf16 %v15386_v40, %v15387_v8  ;;  %v15389_v26 = vand.u32 4294901760, %v11860_v11  ;;  %9739 = vmatprep.subr.bf16.mxu1 %v11872_v55  ;;  %v15388_v56 = vand.u32 4294901760, %v11880_v36  ;;  %v15391_v3 = vand.u32 4294901760, %v11865_v16 }
  0x46   : > { %v832_v45 = vand.u32 4294901760, %v831_v43  ;;  %v15390_v27 = vand.u32 4294901760, %v11870_v51  ;;  %v11911_v37 = vpack.c.bf16 %v713_v49, %v706_v53  ;;  %v839_v33 = vand.u32 4294901760, %v838_v42 }
  0x47   : > { %15810 = vst [vmem:[#allocation27_spill] sm:$0xff] %v11889_v24  ;;  %9721 = vmatpush3.bf16.msra.mxu0 %v11889_v24  ;;  %v719_v43 = vsub.f32 %v11860_v11, %v15389_v26  ;;  %v11920_v40 = vsub.f32 %v11705_v58, %v634_v9  ;;  %v726_v8 = vsub.f32 %v11880_v36, %v15388_v56  ;;  %v15395_v49 = vand.u32 4294901760, %v11895_v39  ;;  %v11940_v58 = vld [vmem:[%s15365_s3 + $0xf0] sm:$0xff]  ;;  %v11945_v9 = vld [vmem:[%s15365_s3 + $0xf8] sm:$0xff] }
  0x48   : > { %15811 = vst [vmem:[#allocation28_spill] sm:$0xff] %v11911_v37  ;;  %v11929_v42 = vpack.c.bf16 %v15390_v27, %v15391_v3  ;;  %v11934_v53 = vsub.f32 %v11715_v63, %v637_v12  ;;  %9741 = vmatpush3.bf16.msra.mxu1 %v11911_v37  ;;  %v11948_v56 = vpack.c.bf16 %v839_v33, %v832_v45  ;;  %v15394_v12 = vand.u32 4294901760, %v11909_v61 }
  0x49   : > { %v720_v26 = vand.u32 4294901760, %v719_v43  ;;  %v15393_v63 = vand.u32 4294901760, %v11920_v40  ;;  %v727_v27 = vand.u32 4294901760, %v726_v8  ;;  %v11958_v10 = vsub.f32 %v11732_v4, %v586_v41 }
  0x4a   : > { %15812 = vst [vmem:[#allocation29_spill] sm:$0xff] %v11929_v42  ;;  %15813 = vst [vmem:[#allocation30_spill] sm:$0xff] %v11948_v56  ;;  %9723 = vmatprep.subr.bf16.mxu0 %v11929_v42  ;;  %v15396_v3 = vand.u32 4294901760, %v11934_v53  ;;  %v11963_v33 = vsub.f32 %v11737_v5, %v589_v46  ;;  %9743 = vmatprep.subr.bf16.mxu1 %v11948_v56  ;;  %v11973_v45 = vpack.c.bf16 %v15394_v12, %v15395_v49  ;;  %v11980_v5 = vld [vmem:[%s15365_s3 + $0x70] sm:$0xff]  ;;  %v11992_v49 = vld [vmem:[%s15365_s3 + $0x78] sm:$0xff] }
  0x4b   : > { %v845_v8 = vsub.f32 %v11920_v40, %v15393_v63  ;;  %v15400_v4 = vand.u32 4294901760, %v11940_v58  ;;  %v15399_v41 = vand.u32 4294901760, %v11945_v9  ;;  %v11982_v46 = vpack.c.bf16 %v727_v27, %v720_v26 }
  0x4c   : > { %15814 = vst [vmem:[#allocation31_spill] sm:$0xff] %v11973_v45  ;;  %v852_v43 = vsub.f32 %v11934_v53, %v15396_v3  ;;  %9725 = vmatpush3.bf16.msra.mxu0 %v11973_v45  ;;  %v12011_v3 = vsub.f32 %v11769_v14, %v640_v7  ;;  %v15818_v12 = vand.u32 4294901760, %v11774_v19  ;;  %v15819_v56 = vand.u32 4294901760, %v11958_v10 }
  0x4d   : > { %15815 = vst [vmem:[#allocation32_spill] sm:$0xff] %v11982_v46  ;;  %v846_v27 = vand.u32 4294901760, %v845_v8  ;;  %v12006_v26 = vpack.c.bf16 %v15399_v41, %v15400_v4  ;;  %9745 = vmatpush3.bf16.msra.mxu1 %v11982_v46  ;;  %v15820_v41 = vand.u32 4294901760, %v11963_v33  ;;  %v607_v7 = vand.u32 4294901760, %v11992_v49 }
  0x4e   : > { %v12016_v63 = vsub.f32 %v11774_v19, %v15818_v12  ;;  %v853_v8 = vand.u32 4294901760, %v852_v43  ;;  %v733_v37 = vsub.f32 %v11958_v10, %v15819_v56  ;;  %v15407_v14 = vand.u32 4294901760, %v12011_v3  ;;  %v414_v56 = vld [vmem:[%s11999_s24 + $0x8] sm:$0xff] }
  0x4f   : > { %15817 = vst [vmem:[#allocation33_spill] sm:$0xff] %v12006_v26  ;;  %v740_v4 = vsub.f32 %v11963_v33, %v15820_v41  ;;  %9727 = vmatprep.subr.bf16.mxu0 %v12006_v26  ;;  %v15821_v12 = vand.u32 4294901760, %v11813_v20  ;;  %v15823_v55 = vand.u32 4294901760, %v11829_v31 }
  0x50   : > { %v12036_v46 = vpack.c.bf16 %v853_v8, %v846_v27  ;;  %v734_v41 = vand.u32 4294901760, %v733_v37  ;;  %v859_v19 = vsub.f32 %v12011_v3, %v15407_v14  ;;  %v15824_v6 = vand.u32 4294901760, %v12016_v63 }
  0x51   : > { %v12033_v43 = vsub.f32 %v11813_v20, %v15821_v12  ;;  %v741_v30 = vand.u32 4294901760, %v740_v4  ;;  %v12041_v50 = vsub.f32 %v11829_v31, %v15823_v55  ;;  %v15825_v20 = vand.u32 4294901760, %v11980_v5 }
  0x52   : > { %15822 = vst [vmem:[#allocation34_spill] sm:$0xff] %v12036_v46  ;;  %v866_v0 = vsub.f32 %v12016_v63, %v15824_v6  ;;  %9747 = vmatprep.subr.bf16.mxu1 %v12036_v46  ;;  %v12058_v31 = vand.u32 4294901760, %v414_v56  ;;  %v15829_v27 = vand.u32 4294901760, %v11865_v16  ;;  %v413_v6 = vld [vmem:[%s11999_s24] sm:$0xff]  ;;  %v860_v14 = vand.u32 4294901760, %v859_v19 }
  0x53   : > { %v12051_v12 = vpack.c.bf16 %v607_v7, %v15825_v20  ;;  %v15410_v37 = vand.u32 4294901760, %v12033_v43  ;;  %v12055_v4 = vpack.c.bf16 %v741_v30, %v734_v41  ;;  %v15413_v55 = vand.u32 4294901760, %v12041_v50 }
  0x54   : > { %15828 = vst [vmem:[#allocation37_spill] sm:$0xff] %v12058_v31  ;;  %v12063_v8 = vsub.f32 %v11865_v16, %v15829_v27  ;;  %v867_v26 = vand.u32 4294901760, %v866_v0  ;;  %v15830_v30 = vand.u32 4294901760, %v11870_v51  ;;  %v12080_v19 = vsub.f32 %v414_v56, %v12058_v31  ;;  %898 = vmatprep.mubr.f32.mxu1 %v12058_v31 }
  0x55   : > { %15826 = vst [vmem:[#allocation35_spill] sm:$0xff] %v12051_v12  ;;  %15827 = vst [vmem:[#allocation36_spill] sm:$0xff] %v12055_v4  ;;  %9729 = vmatpush3.bf16.msra.mxu0 %v12051_v12  ;;  %v747_v20 = vsub.f32 %v12033_v43, %v15410_v37  ;;  %9749 = vmatpush3.bf16.msra.mxu1 %v12055_v4  ;;  %v754_v16 = vsub.f32 %v12041_v50, %v15413_v55  ;;  %v12091_v4 = vand.u32 4294901760, %v413_v6 }
  0x56   : > { %v12073_v41 = vsub.f32 %v11870_v51, %v15830_v30  ;;  %v15418_v0 = vand.u32 4294901760, %v12063_v8  ;;  %v12085_v27 = vpack.c.bf16 %v11634_v29, %v11619_v25  ;;  %v12088_v37 = vpack.c.bf16 %v867_v26, %v860_v14 }
  0x57   : > { %v748_v51 = vand.u32 4294901760, %v747_v20  ;;  %v755_v46 = vand.u32 4294901760, %v754_v16  ;;  %v15427_v55 = vand.u32 4294901760, %v12080_v19  ;;  %v15833_v12 = vand.u32 4294901760, %v11895_v39 }
  0x58   : > { %15831 = vst [vmem:[#allocation38_spill] sm:$0xff] %v12085_v27  ;;  %15832 = vst [vmem:[#allocation39_spill] sm:$0xff] %v12088_v37  ;;  %v15421_v30 = vand.u32 4294901760, %v12073_v41  ;;  %v873_v56 = vsub.f32 %v12063_v8, %v15418_v0  ;;  %9763 = vmatprep.subr.bf16.mxu0 %v12085_v27  ;;  %9751 = vmatprep.subr.bf16.mxu1 %v12088_v37  ;;  %v12108_v14 = vsub.f32 %v413_v6, %v12091_v4 }
  0x59   : > { %v12101_v45 = vsub.f32 %v11895_v39, %v15833_v12  ;;  %v15834_v20 = vand.u32 4294901760, %v11909_v61  ;;  %v12115_v0 = vpack.c.bf16 %v755_v46, %v748_v51  ;;  %v660_v39 = vsub.f32 %v12080_v19, %v15427_v55 }
  0x5a   : > { %v880_v26 = vsub.f32 %v12073_v41, %v15421_v30  ;;  %v874_v12 = vand.u32 4294901760, %v873_v56  ;;  %v15434_v30 = vand.u32 4294901760, %v12108_v14  ;;  %v15836_v31 = vand.u32 4294901760, %v11940_v58 }
  0x5b   : > { %v12113_v16 = vsub.f32 %v11909_v61, %v15834_v20  ;;  %15835 = vst [vmem:[#allocation40_spill] sm:$0xff] %v12115_v0  ;;  %v15426_v37 = vand.u32 4294901760, %v12101_v45  ;;  %9753 = vmatpush3.bf16.msra.mxu1 %v12115_v0  ;;  %v661_v61 = vand.u32 4294901760, %v660_v39  ;;  %v12134_v51 = vpack.c.bf16 %v11648_v35, %v11646_v34 }
  0x5c   : > { %v881_v27 = vand.u32 4294901760, %v880_v26  ;;  %v12126_v42 = vsub.f32 %v11940_v58, %v15836_v31  ;;  %v15838_v56 = vand.u32 4294901760, %v11945_v9  ;;  %v666_v58 = vsub.f32 %v12108_v14, %v15434_v30 }
  0x5d   : > { %v15429_v6 = vand.u32 4294901760, %v12113_v16  ;;  %v761_v46 = vsub.f32 %v12101_v45, %v15426_v37  ;;  %15837 = vst [vmem:[#allocation41_spill] sm:$0xff] %v12134_v51  ;;  %662 = vmatprep.mubr.f32.mxu0 %v661_v61  ;;  %v15840_v0 = vand.u32 4294901760, %v11980_v5  ;;  %v12165_v61 = vpack.c.bf16 %v11686_v48, %v11670_v44 }
  0x5e   : > { %v12139_v26 = vsub.f32 %v11945_v9, %v15838_v56  ;;  %v12141_v20 = vpack.c.bf16 %v881_v27, %v874_v12  ;;  %v15430_v39 = vand.u32 4294901760, %v12126_v42  ;;  %v12157_v27 = vsub.f32 %v11992_v49, %v607_v7 }
  0x5f   : > { %v768_v31 = vsub.f32 %v12113_v16, %v15429_v6  ;;  %v762_v37 = vand.u32 4294901760, %v761_v46  ;;  %v12154_v9 = vsub.f32 %v11980_v5, %v15840_v0  ;;  %v667_v12 = vand.u32 4294901760, %v666_v58  ;;  %15841 = vst [vmem:[#allocation43_spill] sm:$0xff] %v12165_v61 }
  0x60   : > { %15839 = vst [vmem:[#allocation42_spill] sm:$0xff] %v12141_v20  ;;  %v15431_v55 = vand.u32 4294901760, %v12139_v26  ;;  %9755 = vmatprep.subr.bf16.mxu1 %v12141_v20  ;;  %v887_v6 = vsub.f32 %v12126_v42, %v15430_v39  ;;  %v15432_v49 = vand.u32 4294901760, %v12157_v27  ;;  %v15849_v30 = vand.u32 4294901760, %v11619_v25 }
  0x61   : > { %v769_v56 = vand.u32 4294901760, %v768_v31  ;;  %v15433_v0 = vand.u32 4294901760, %v12154_v9  ;;  %668 = vmatmul.mubr.f32.vlgmr.msra.gmra.mrb[0].mxu0 %v667_v12  ;;  %v15858_v25 = vand.u32 4294901760, %v11700_v57 }
  0x62   : > { %v894_v5 = vsub.f32 %v12139_v26, %v15431_v55  ;;  %v888_v46 = vand.u32 4294901760, %v887_v6  ;;  %9765 = vmatpush3.bf16.msra.mxu0 %v12134_v51  ;;  %v782_v39 = vsub.f32 %v12157_v27, %v15432_v49  ;;  %v12183_v55 = vpack.c.bf16 %v11710_v62, %v11700_v57  ;;  %1035 = vmatprep.mubr.f32.mxu0 %v12080_v19 }
  0x63   : > { %v12172_v7 = vpack.c.bf16 %v769_v56, %v762_v37  ;;  %v775_v31 = vsub.f32 %v12154_v9, %v15433_v0  ;;  %9767 = vmatprep.subr.bf16.mxu0 %v12165_v61  ;;  %v12190_v37 = vpack.c.bf16 %v11762_v17, %v11753_v13  ;;  %v12200_v49 = vpack.c.bf16 %v11841_v54, %v11824_v21 }
  0x64   : > { %v895_v58 = vand.u32 4294901760, %v894_v5  ;;  %15843 = vst [vmem:[#allocation45_spill] sm:$0xff] %v12183_v55  ;;  %v783_v56 = vand.u32 4294901760, %v782_v39  ;;  %v12196_v5 = vpack.c.bf16 %v11806_v1, %v11796_v60  ;;  %v15852_v39 = vand.u32 4294901760, %v11646_v34 }
  0x65   : > { %15842 = vst [vmem:[#allocation44_spill] sm:$0xff] %v12172_v7  ;;  %9757 = vmatpush3.bf16.msra.mxu1 %v12172_v7  ;;  %15844 = vst [vmem:[#allocation46_spill] sm:$0xff] %v12190_v37  ;;  %v776_v12 = vand.u32 4294901760, %v775_v31  ;;  %v15853_v31 = vand.u32 4294901760, %v11648_v35  ;;  %v15861_v34 = vand.u32 4294901760, %v11753_v13  ;;  %v15862_v35 = vand.u32 4294901760, %v11762_v17 }
  0x66   : > { %v12192_v6 = vpack.c.bf16 %v895_v58, %v888_v46  ;;  %15846 = vst [vmem:[#allocation48_spill] sm:$0xff] %v12196_v5  ;;  %15847 = vst [vmem:[#allocation49_spill] sm:$0xff] %v12200_v49  ;;  %9769 = vmatpush3.bf16.msra.mxu0 %v12183_v55  ;;  %v15850_v46 = vand.u32 4294901760, %v11634_v29  ;;  %v15859_v29 = vand.u32 4294901760, %v11710_v62  ;;  %v15868_v57 = vand.u32 4294901760, %v11841_v54 }
  0x67   : > { %v12203_v0 = vpack.c.bf16 %v783_v56, %v776_v12  ;;  %v12216_v7 = vpack.c.bf16 %v15853_v31, %v15852_v39  ;;  %9771 = vmatprep.subr.bf16.mxu0 %v12190_v37  ;;  %v15856_v12 = vand.u32 4294901760, %v11686_v48  ;;  %v15864_v39 = vand.u32 4294901760, %v11796_v60 }
  0x68   : > { %15845 = vst [vmem:[#allocation47_spill] sm:$0xff] %v12192_v6  ;;  %9759 = vmatprep.subr.bf16.mxu1 %v12192_v6  ;;  %v12210_v58 = vpack.c.bf16 %v15850_v46, %v15849_v30  ;;  %v15855_v6 = vand.u32 4294901760, %v11670_v44  ;;  %v12229_v30 = vpack.c.bf16 %v15859_v29, %v15858_v25  ;;  %v12235_v46 = vpack.c.bf16 %v15862_v35, %v15861_v34 }
  0x69   : > { %15848 = vst [vmem:[#allocation50_spill] sm:$0xff] %v12203_v0  ;;  %15854 = vst [vmem:[#allocation52_spill] sm:$0xff] %v12216_v7  ;;  %v15865_v44 = vand.u32 4294901760, %v11806_v1  ;;  %9761 = vmatpush3.bf16.msra.mxu1 %v12203_v0  ;;  %v15867_v48 = vand.u32 4294901760, %v11824_v21  ;;  %v15870_v13 = vand.u32 4294901760, %v11860_v11  ;;  %v15871_v17 = vand.u32 4294901760, %v11880_v36 }
  0x6a   : > { %15851 = vst [vmem:[#allocation51_spill] sm:$0xff] %v12210_v58  ;;  %v12223_v56 = vpack.c.bf16 %v15856_v12, %v15855_v6  ;;  %15860 = vst [vmem:[#allocation54_spill] sm:$0xff] %v12229_v30  ;;  %v15873_v60 = vand.u32 4294901760, %v11920_v40  ;;  %v15874_v1 = vand.u32 4294901760, %v11934_v53  ;;  %v15876_v25 = vand.u32 4294901760, %v11958_v10  ;;  %9795 = vmatprep.subr.bf16.mxu1 %v11596_v15  ;;  %9773 = vmatpush3.bf16.msra.mxu0 %v12196_v5  ;;  %v480_v0 = vld [vmem:[%s15365_s3 + $0x198] sm:$0xff] }
  0x6b   : > { %15863 = vst [vmem:[#allocation55_spill] sm:$0xff] %v12235_v46  ;;  %v12241_v31 = vpack.c.bf16 %v15865_v44, %v15864_v39  ;;  %v12248_v62 = vpack.c.bf16 %v15868_v57, %v15867_v48  ;;  %v12254_v6 = vpack.c.bf16 %v15871_v17, %v15870_v13  ;;  %v15877_v21 = vand.u32 4294901760, %v11963_v33  ;;  %9775 = vmatprep.subr.bf16.mxu0 %v12200_v49  ;;  %v15889_v39 = vld [vmem:[#allocation29_spill] sm:$0xff]  ;;  %v12338_v48 = vld [vmem:[%s15365_s3 + $0x180] sm:$0xff]  ;;  %v12344_v57 = vld [vmem:[%s15365_s3 + $0x188] sm:$0xff] }
  0x6c   : > { %15857 = vst [vmem:[#allocation53_spill] sm:$0xff] %v12223_v56  ;;  %v12260_v12 = vpack.c.bf16 %v15874_v1, %v15873_v60  ;;  %v12272_v54 = vpack.c.bf16 %v11880_v36, %v11860_v11  ;;  %900 = vmatmul.mubr.f32.vlgmr.msra.gmra.mrb[0].mxu1 %v12091_v4  ;;  %v12278_v34 = vpack.c.bf16 %v11934_v53, %v11920_v40  ;;  %v15881_v35 = vand.u32 4294901760, %v12080_v19  ;;  %v15890_v44 = vld [vmem:[#allocation37_spill] sm:$0xff]  ;;  %v15891_v13 = vld [vmem:[#allocation31_spill] sm:$0xff] }
  0x6d   : > { %15866 = vst [vmem:[#allocation56_spill] sm:$0xff] %v12241_v31  ;;  %15869 = vst [vmem:[#allocation57_spill] sm:$0xff] %v12248_v62  ;;  %v12266_v29 = vpack.c.bf16 %v15877_v21, %v15876_v25  ;;  %9797 = vmatpush3.bf16.msra.mxu1 %v11614_v22  ;;  %v12287_v11 = vpack.c.bf16 %v11963_v33, %v11958_v10  ;;  %v12292_v36 = vpack.c.bf16 %v12016_v63, %v12011_v3  ;;  %v12350_v17 = vld [vmem:[%s15365_s3 + $0x100] sm:$0xff]  ;;  %v15892_v60 = vld [vmem:[#allocation33_spill] sm:$0xff] }
  0x6e   : > { %15872 = vst [vmem:[#allocation58_spill] sm:$0xff] %v12254_v6  ;;  %15875 = vst [vmem:[#allocation59_spill] sm:$0xff] %v12260_v12  ;;  %1142 = vmatprep.mubr.f32.mxu1 %v15881_v35  ;;  %9799 = vmatprep.subr.bf16.mxu1 %v11616_v23  ;;  %v12299_v40 = vpack.c.bf16 %v12041_v50, %v12033_v43  ;;  %v12304_v10 = vpack.c.bf16 %v12073_v41, %v12063_v8  ;;  %v1472_v1 = vand.u32 4294901760, %v12338_v48  ;;  %v462_v25 = vld [vmem:[%s15365_s3 + $0x108] sm:$0xff]  ;;  %v12360_v21 = vld [vmem:[%s15365_s3 + $0x190] sm:$0xff] }
  0x6f   : > { %15878 = vst [vmem:[#allocation60_spill] sm:$0xff] %v12266_v29  ;;  %15879 = vst [vmem:[#allocation61_spill] sm:$0xff] %v12272_v54  ;;  %9777 = vmatpush3.bf16.msra.mxu0 %v12272_v54  ;;  %v12311_v53 = vpack.c.bf16 %v12113_v16, %v12101_v45  ;;  %v12316_v33 = vpack.c.bf16 %v12139_v26, %v12126_v42  ;;  %v12323_v19 = vpack.c.bf16 %v12157_v27, %v12154_v9 }
  0x70   : > { %15880 = vst [vmem:[#allocation62_spill] sm:$0xff] %v12278_v34  ;;  %15882 = vst [vmem:[#allocation63_spill] sm:$0xff] %v12287_v11  ;;  %9779 = vmatprep.subr.bf16.mxu0 %v12278_v34  ;;  %v1475_v35 = vand.u32 4294901760, %v12344_v57  ;;  %v1424_v20 = vand.u32 4294901760, %v12350_v17 }
  0x71   : > { %15883 = vst [vmem:[#allocation64_spill] sm:$0xff] %v12292_v36  ;;  %9801 = vmatpush3.bf16.msra.mxu1 %v11632_v28  ;;  %15884 = vst [vmem:[#allocation65_spill] sm:$0xff] %v12299_v40 }
  0x72   : > { %9803 = vmatprep.subr.bf16.mxu1 %v11643_v32  ;;  %15885 = vst [vmem:[#allocation66_spill] sm:$0xff] %v12304_v10  ;;  %15886 = vst [vmem:[#allocation67_spill] sm:$0xff] %v12311_v53 }
  0x73   : > { %9781 = vmatpush3.bf16.msra.mxu0 %v12287_v11  ;;  %15887 = vst [vmem:[#allocation68_spill] sm:$0xff] %v12316_v33  ;;  %15888 = vst [vmem:[#allocation69_spill] sm:$0xff] %v12323_v19 }
  0x74   : > { %9783 = vmatprep.subr.bf16.mxu0 %v12292_v36  ;;  %v15898_v36 = vand.u32 4294901760, %v12033_v43  ;;  %v481_v43 = vld [vmem:[%s15365_s3 + $0x1a0] sm:$0xff] }
  0x75   : > { %9805 = vmatpush3.bf16.msra.mxu1 %v11661_v38 }
  0x76   : > { %9807 = vmatprep.subr.bf16.mxu1 %v11684_v47 }
  0x77   : > { %9785 = vmatpush3.bf16.msra.mxu0 %v12299_v40 }
  0x78   : > { %9787 = vmatprep.subr.bf16.mxu0 %v12304_v10  ;;  %v15896_v10 = vand.u32 4294901760, %v12016_v63  ;;  %v15902_v63 = vand.u32 4294901760, %v12073_v41 }
  0x79   : > { %9809 = vmatpush3.bf16.msra.mxu1 %v11726_v2 }
  0x7a   : > { %9811 = vmatprep.subr.bf16.mxu1 %v11782_v18 }
  0x7b   : > { %9789 = vmatpush3.bf16.msra.mxu0 %v12311_v53  ;;  %v15895_v53 = vand.u32 4294901760, %v12011_v3  ;;  %v15901_v3 = vand.u32 4294901760, %v12063_v8 }
  0x7c   : > { %9791 = vmatprep.subr.bf16.mxu0 %v12316_v33  ;;  %v12377_v33 = vsub.f32 %v12344_v57, %v1475_v35  ;;  %v463_v57 = vld [vmem:[%s15365_s3 + $0x110] sm:$0xff] }
  0x7d   : > { %9813 = vmatpush3.bf16.msra.mxu1 %v11791_v59  ;;  %v12386_v40 = vpack.c.bf16 %v15896_v10, %v15895_v53  ;;  %v12406_v10 = vpack.c.bf16 %v15902_v63, %v15901_v3  ;;  %v15904_v53 = vand.u32 4294901760, %v12101_v45  ;;  %v15908_v3 = vand.u32 4294901760, %v12139_v26  ;;  %v466_v45 = vld [vmem:[%s15365_s3 + $0x128] sm:$0xff] }
  0x7e   : > { %9815 = vmatprep.subr.bf16.mxu1 %v11836_v52 }
  0x7f   : > { %9793 = vmatpush3.bf16.msra.mxu0 %v12323_v19  ;;  %v1481_v19 = vand.u32 4294901760, %v480_v0  ;;  %15897 = vst [vmem:[#allocation37_spill] sm:$0xff] %v12386_v40  ;;  %15903 = vst [vmem:[#allocation71_spill] sm:$0xff] %v12406_v10 }
  0x80   : > { %9827 = vmatprep.subr.bf16.mxu0 %v12210_v58  ;;  %v1478_v58 = vand.u32 4294901760, %v12360_v21 }
  0x81   : > { %9817 = vmatpush3.bf16.msra.mxu1 %v11889_v24 }
  0x82   : > { %1038 = vmatmul.mubr.f32.vlgmr.msra.gmra.mrb[2].mxu0 %v12108_v14  ;;  %9819 = vmatprep.subr.bf16.mxu1 %v15889_v39  ;;  %v12423_v41 = vsub.f32 %v12360_v21, %v1478_v58  ;;  %v465_v21 = vld [vmem:[%s15365_s3 + $0x120] sm:$0xff] }
  0x83   : > { %9829 = vmatpush3.bf16.msra.mxu0 %v12216_v7  ;;  %1312 = vmatprep.mubr.f32.mxu0 %v15890_v44  ;;  %v1427_v7 = vand.u32 4294901760, %v462_v25 }
  0x84   : > { %9831 = vmatprep.subr.bf16.mxu0 %v12223_v56  ;;  %v15893_v56 = vld [vmem:[#allocation35_spill] sm:$0xff] }
  0x85   : > { %9821 = vmatpush3.bf16.msra.mxu1 %v15891_v13  ;;  %v12420_v8 = vsub.f32 %v462_v25, %v1427_v7  ;;  %v1484_v25 = vand.u32 4294901760, %v481_v43  ;;  %v12477_v37 = vpack.c.bf16 %v1427_v7, %v1424_v20  ;;  %v467_v7 = vld [vmem:[%s15365_s3 + $0x130] sm:$0xff] }
  0x86   : > { %9823 = vmatprep.subr.bf16.mxu1 %v15892_v60 }
  0x87   : > { %9833 = vmatpush3.bf16.msra.mxu0 %v12229_v30  ;;  %v12373_v30 = vsub.f32 %v12338_v48, %v1472_v1  ;;  %v15899_v48 = vand.u32 4294901760, %v12041_v50  ;;  %v464_v50 = vld [vmem:[%s15365_s3 + $0x118] sm:$0xff]  ;;  %15916 = vst [vmem:[#allocation77_spill] sm:$0xff] %v12477_v37 }
  0x88   : > { %9835 = vmatprep.subr.bf16.mxu0 %v12235_v46  ;;  %v15894_v46 = vand.u32 4294901760, %v12108_v14  ;;  %v12398_v14 = vsub.f32 %v12350_v17, %v1424_v20 }
  0x89   : > { %9825 = vmatpush3.bf16.msra.mxu1 %v15893_v56  ;;  %v12392_v11 = vpack.c.bf16 %v15899_v48, %v15898_v36  ;;  %v12418_v36 = vld [vmem:[%s15365_s3 + $0x1a8] sm:$0xff]  ;;  %v15907_v48 = vand.u32 4294901760, %v12126_v42  ;;  %v15910_v42 = vand.u32 4294901760, %v12154_v9  ;;  %v1433_v9 = vand.u32 4294901760, %v464_v50 }
  0x8a   : > { %9859 = vmatprep.subr.bf16.mxu1 %v11596_v15  ;;  %v15914_v34 = vand.u32 4294901760, %v12373_v30 }
  0x8b   : > { %9837 = vmatpush3.bf16.msra.mxu0 %v12241_v31  ;;  %15900 = vst [vmem:[#allocation70_spill] sm:$0xff] %v12392_v11  ;;  %v12436_v63 = vpack.c.bf16 %v15908_v3, %v15907_v48  ;;  %v483_v48 = vld [vmem:[%s15365_s3 + $0x1b0] sm:$0xff] }
  0x8c   : > { %1146 = vmatmul.mubr.f32.vlgmr.msra.gmra.mrb[2].mxu1 %v15894_v46  ;;  %9839 = vmatprep.subr.bf16.mxu0 %v12248_v62  ;;  %v416_v46 = vld [vmem:[%s11999_s24 + $0x18] sm:$0xff]  ;;  %v12445_v62 = vsub.f32 %v480_v0, %v1481_v19  ;;  %v1490_v54 = vand.u32 4294901760, %v483_v48 }
  0x8d   : > { %9861 = vmatpush3.bf16.msra.mxu1 %v11614_v22  ;;  %1416 = vmatprep.mubr.f32.mxu1 %v15890_v44  ;;  %v15905_v44 = vand.u32 4294901760, %v12113_v16  ;;  %15909 = vst [vmem:[#allocation73_spill] sm:$0xff] %v12436_v63  ;;  %v15911_v16 = vand.u32 4294901760, %v12157_v27  ;;  %v484_v0 = vld [vmem:[%s15365_s3 + $0x1b8] sm:$0xff]  ;;  %v12461_v3 = vand.u32 4294901760, %v416_v46  ;;  %v1487_v27 = vand.u32 4294901760, %v12418_v36 }
  0x8e   : > { %9863 = vmatprep.subr.bf16.mxu1 %v11616_v23  ;;  %v1493_v49 = vand.u32 4294901760, %v484_v0  ;;  %v12521_v23 = vsub.f32 %v481_v43, %v1484_v25 }
  0x8f   : > { %v12430_v17 = vpack.c.bf16 %v15905_v44, %v15904_v53  ;;  %9841 = vmatpush3.bf16.msra.mxu0 %v12254_v6  ;;  %v12452_v26 = vpack.c.bf16 %v15911_v16, %v15910_v42  ;;  %v1430_v53 = vand.u32 4294901760, %v463_v57  ;;  %15913 = vst [vmem:[#allocation75_spill] sm:$0xff] %v12461_v3  ;;  %v1436_v16 = vand.u32 4294901760, %v465_v21 }
  0x90   : > { %9843 = vmatprep.subr.bf16.mxu0 %v12260_v12  ;;  %v1439_v44 = vand.u32 4294901760, %v466_v45  ;;  %v1651_v12 = vsub.f32 %v12373_v30, %v15914_v34  ;;  %v12475_v42 = vpack.c.bf16 %v1475_v35, %v1472_v1  ;;  %v15917_v6 = vand.u32 4294901760, %v12377_v33 }
  0x91   : > { %15906 = vst [vmem:[#allocation72_spill] sm:$0xff] %v12430_v17  ;;  %15912 = vst [vmem:[#allocation74_spill] sm:$0xff] %v12452_v26  ;;  %9865 = vmatpush3.bf16.msra.mxu1 %v11632_v28  ;;  %v12483_v55 = vsub.f32 %v416_v46, %v12461_v3  ;;  %v12486_v34 = vpack.c.bf16 %v1481_v19, %v1478_v58  ;;  %v12488_v61 = vpack.c.bf16 %v1433_v9, %v1430_v53 }
  0x92   : > { %9867 = vmatprep.subr.bf16.mxu1 %v11643_v32  ;;  %15915 = vst [vmem:[#allocation76_spill] sm:$0xff] %v12475_v42  ;;  %v1658_v31 = vsub.f32 %v12377_v33, %v15917_v6  ;;  %v12490_v5 = vpack.c.bf16 %v1487_v27, %v1484_v25  ;;  %v15921_v1 = vand.u32 4294901760, %v12398_v14  ;;  %v12499_v6 = vpack.c.bf16 %v1439_v44, %v1436_v16 }
  0x93   : > { %9845 = vmatpush3.bf16.msra.mxu0 %v12266_v29  ;;  %15918 = vst [vmem:[#allocation78_spill] sm:$0xff] %v12486_v34  ;;  %15919 = vst [vmem:[#allocation79_spill] sm:$0xff] %v12488_v61  ;;  %v15923_v35 = vand.u32 4294901760, %v12420_v8  ;;  %v15924_v19 = vand.u32 4294901760, %v12423_v41  ;;  %v1652_v29 = vand.u32 4294901760, %v1651_v12  ;;  %v12513_v51 = vpack.c.bf16 %v1493_v49, %v1490_v54 }
  0x94   : > { %9847 = vmatprep.subr.bf16.mxu0 %v12386_v40  ;;  %15920 = vst [vmem:[#allocation80_spill] sm:$0xff] %v12490_v5  ;;  %v1539_v20 = vsub.f32 %v12398_v14, %v15921_v1  ;;  %15922 = vst [vmem:[#allocation81_spill] sm:$0xff] %v12499_v6  ;;  %v468_v1 = vld [vmem:[%s15365_s3 + $0x138] sm:$0xff]  ;;  %v12510_v40 = vsub.f32 %v463_v57, %v1430_v53  ;;  %v1442_v28 = vand.u32 4294901760, %v467_v7 }
  0x95   : > { %9869 = vmatpush3.bf16.msra.mxu1 %v11661_v38  ;;  %v1546_v58 = vsub.f32 %v12420_v8, %v15923_v35  ;;  %v1665_v46 = vsub.f32 %v12423_v41, %v15924_v19  ;;  %15925 = vst [vmem:[#allocation82_spill] sm:$0xff] %v12513_v51  ;;  %v15926_v38 = vand.u32 4294901760, %v12445_v62  ;;  %v12518_v35 = vsub.f32 %v464_v50, %v1433_v9 }
  0x96   : > { %9871 = vmatprep.subr.bf16.mxu1 %v11684_v47  ;;  %v1659_v19 = vand.u32 4294901760, %v1658_v31  ;;  %v1540_v53 = vand.u32 4294901760, %v1539_v20  ;;  %v1445_v12 = vand.u32 4294901760, %v468_v1  ;;  %v485_v47 = vld [vmem:[%s15365_s3 + $0x1c0] sm:$0xff]  ;;  %v12534_v31 = vsub.f32 %v12418_v36, %v1487_v27 }
  0x97   : > { %v1672_v32 = vsub.f32 %v12445_v62, %v15926_v38  ;;  %9849 = vmatpush3.bf16.msra.mxu0 %v12392_v11  ;;  %v12531_v38 = vld [vmem:[%s15365_s3 + $0x1c8] sm:$0xff]  ;;  %v12536_v50 = vsub.f32 %v465_v21, %v1436_v16  ;;  %v1547_v43 = vand.u32 4294901760, %v1546_v58  ;;  %v1666_v25 = vand.u32 4294901760, %v1665_v46 }
  0x98   : > { %9851 = vmatprep.subr.bf16.mxu0 %v12406_v10  ;;  %v15479_v9 = vand.u32 4294901760, %v12510_v40  ;;  %v12540_v20 = vsub.f32 %v466_v45, %v1439_v44  ;;  %v15480_v10 = vand.u32 4294901760, %v12518_v35  ;;  %v12544_v11 = vsub.f32 %v483_v48, %v1490_v54  ;;  %v487_v54 = vld [vmem:[%s15365_s3 + $0x1d0] sm:$0xff] }
  0x99   : > { %9873 = vmatpush3.bf16.msra.mxu1 %v11726_v2  ;;  %v1673_v57 = vand.u32 4294901760, %v1672_v32  ;;  %v12546_v22 = vsub.f32 %v484_v0, %v1493_v49  ;;  %v1496_v36 = vand.u32 4294901760, %v485_v47  ;;  %v1499_v21 = vand.u32 4294901760, %v12531_v38  ;;  %v12570_v0 = vld [vmem:[%s15365_s3 + $0x140] sm:$0xff] }
  0x9a   : > { %9875 = vmatprep.subr.bf16.mxu1 %v11782_v18  ;;  %v15928_v16 = vand.u32 4294901760, %v12483_v55  ;;  %v12555_v32 = vpack.c.bf16 %v1659_v19, %v1652_v29  ;;  %v12557_v44 = vpack.c.bf16 %v1445_v12, %v1442_v28  ;;  %v12565_v48 = vsub.f32 %v12510_v40, %v15479_v9  ;;  %v12575_v29 = vld [vmem:[%s15365_s3 + $0x148] sm:$0xff]  ;;  %v12641_v18 = vld [vmem:[%s15365_s3 + $0x1e0] sm:$0xff] }
  0x9b   : > { %15927 = vst [vmem:[#allocation83_spill] sm:$0xff] %v12546_v22  ;;  %9853 = vmatpush3.bf16.msra.mxu0 %v12430_v17  ;;  %v15484_v58 = vand.u32 4294901760, %v12540_v20  ;;  %v12578_v46 = vsub.f32 %v467_v7, %v1442_v28  ;;  %v12580_v19 = vsub.f32 %v468_v1, %v1445_v12  ;;  %v1560_v9 = vsub.f32 %v12518_v35, %v15480_v10 }
  0x9c   : > { %v1522_v45 = vsub.f32 %v12483_v55, %v15928_v16  ;;  %9855 = vmatprep.subr.bf16.mxu0 %v12436_v63  ;;  %15929 = vst [vmem:[#allocation84_spill] sm:$0xff] %v12555_v32  ;;  %15930 = vst [vmem:[#allocation85_spill] sm:$0xff] %v12557_v44  ;;  %v12583_v16 = vpack.c.bf16 %v1547_v43, %v1540_v53  ;;  %v12591_v27 = vpack.c.bf16 %v1673_v57, %v1666_v25 }
  0x9d   : > { %9877 = vmatpush3.bf16.msra.mxu1 %v11791_v59  ;;  %v12593_v28 = vpack.c.bf16 %v1499_v21, %v1496_v36  ;;  %v15934_v7 = vand.u32 4294901760, %v12521_v23  ;;  %v15935_v12 = vand.u32 4294901760, %v12534_v31  ;;  %v1448_v10 = vand.u32 4294901760, %v12570_v0 }
  0x9e   : > { %9879 = vmatprep.subr.bf16.mxu1 %v11836_v52  ;;  %15931 = vst [vmem:[#allocation86_spill] sm:$0xff] %v12583_v16  ;;  %15932 = vst [vmem:[#allocation87_spill] sm:$0xff] %v12591_v27  ;;  %v1523_v53 = vand.u32 4294901760, %v1522_v45  ;;  %v1451_v49 = vand.u32 4294901760, %v12575_v29  ;;  %v15936_v57 = vand.u32 4294901760, %v12536_v50  ;;  %v488_v45 = vld [vmem:[%s15365_s3 + $0x1d8] sm:$0xff]  ;;  %v12643_v63 = vsub.f32 %v485_v47, %v1496_v36 }
  0x9f   : > { %9857 = vmatpush3.bf16.msra.mxu0 %v12452_v26  ;;  %15933 = vst [vmem:[#allocation88_spill] sm:$0xff] %v12593_v28  ;;  %v1679_v1 = vsub.f32 %v12521_v23, %v15934_v7  ;;  %v1686_v43 = vsub.f32 %v12534_v31, %v15935_v12  ;;  %v1554_v7 = vand.u32 4294901760, %v12565_v48  ;;  %v1574_v12 = vsub.f32 %v12540_v20, %v15484_v58  ;;  %v12626_v26 = vld [vmem:[%s15365_s3 + $0x158] sm:$0xff] }
  0xa0   : > { %9891 = vmatprep.subr.bf16.mxu0 %v12475_v42  ;;  %v1567_v25 = vsub.f32 %v12536_v50, %v15936_v57  ;;  %v12621_v57 = vld [vmem:[%s15365_s3 + $0x150] sm:$0xff]  ;;  %v1561_v48 = vand.u32 4294901760, %v1560_v9  ;;  %v15937_v58 = vand.u32 4294901760, %v12544_v11  ;;  %v15938_v52 = vand.u32 4294901760, %v12546_v22 }
  0xa1   : > { %9881 = vmatpush3.bf16.msra.mxu1 %v11889_v24  ;;  %v1680_v17 = vand.u32 4294901760, %v1679_v1  ;;  %v1505_v9 = vand.u32 4294901760, %v488_v45  ;;  %v12652_v2 = vsub.f32 %v12531_v38, %v1499_v21  ;;  %v1454_v47 = vand.u32 4294901760, %v12621_v57 }
  0xa2   : > { %1314 = vmatmul.mubr.f32.vlgmr.msra.gmra.mrb[4].mxu0 %v12091_v4  ;;  %9883 = vmatprep.subr.bf16.mxu1 %v15889_v39  ;;  %v1693_v24 = vsub.f32 %v12544_v11, %v15937_v58  ;;  %v1700_v59 = vsub.f32 %v12546_v22, %v15938_v52  ;;  %v1502_v39 = vand.u32 4294901760, %v487_v54  ;;  %v12649_v58 = vld [vmem:[%s15365_s3 + $0x1e8] sm:$0xff]  ;;  %v1687_v52 = vand.u32 4294901760, %v1686_v43 }
  0xa3   : > { %9893 = vmatpush3.bf16.msra.mxu0 %v12477_v37  ;;  %1524 = vmatprep.mubr.f32.mxu0 %v1523_v53  ;;  %v1568_v15 = vand.u32 4294901760, %v1567_v25  ;;  %v1457_v36 = vand.u32 4294901760, %v12626_v26  ;;  %v1575_v1 = vand.u32 4294901760, %v1574_v12  ;;  %v15939_v37 = vand.u32 4294901760, %v12578_v46 }
  0xa4   : > { %9895 = vmatprep.subr.bf16.mxu0 %v12486_v34  ;;  %v15940_v22 = vand.u32 4294901760, %v12580_v19  ;;  %v1508_v21 = vand.u32 4294901760, %v12641_v18  ;;  %v1694_v53 = vand.u32 4294901760, %v1693_v24  ;;  %v1701_v43 = vand.u32 4294901760, %v1700_v59 }
  0xa5   : > { %9885 = vmatpush3.bf16.msra.mxu1 %v15891_v13  ;;  %v1581_v42 = vsub.f32 %v12578_v46, %v15939_v37  ;;  %v1511_v25 = vand.u32 4294901760, %v12649_v58  ;;  %v12671_v37 = vsub.f32 %v12570_v0, %v1448_v10  ;;  %v12676_v13 = vsub.f32 %v487_v54, %v1502_v39  ;;  %v415_v54 = vld [vmem:[%s11999_s24 + $0x10] sm:$0xff] }
  0xa6   : > { %v1588_v38 = vsub.f32 %v12580_v19, %v15940_v22  ;;  %9887 = vmatprep.subr.bf16.mxu1 %v15892_v60  ;;  %v12674_v22 = vsub.f32 %v12575_v29, %v1451_v49  ;;  %v12679_v59 = vpack.c.bf16 %v1561_v48, %v1554_v7  ;;  %v12681_v24 = vpack.c.bf16 %v1451_v49, %v1448_v10 }
  0xa7   : > { %9897 = vmatpush3.bf16.msra.mxu0 %v12488_v61  ;;  %v12683_v34 = vpack.c.bf16 %v1505_v9, %v1502_v39  ;;  %v12685_v60 = vsub.f32 %v488_v45, %v1505_v9  ;;  %v12688_v12 = vpack.c.bf16 %v1687_v52, %v1680_v17  ;;  %v12690_v0 = vpack.c.bf16 %v1457_v36, %v1454_v47  ;;  %v12706_v17 = vld [vmem:[%s15365_s3 + $0x160] sm:$0xff] }
  0xa8   : > { %9899 = vmatprep.subr.bf16.mxu0 %v12490_v5  ;;  %15941 = vst [vmem:[#allocation89_spill] sm:$0xff] %v12679_v59  ;;  %15942 = vst [vmem:[#allocation90_spill] sm:$0xff] %v12681_v24  ;;  %v1582_v29 = vand.u32 4294901760, %v1581_v42  ;;  %v1589_v61 = vand.u32 4294901760, %v1588_v38  ;;  %v12694_v5 = vpack.c.bf16 %v1575_v1, %v1568_v15  ;;  %v12696_v7 = vpack.c.bf16 %v1701_v43, %v1694_v53  ;;  %v12711_v42 = vld [vmem:[%s15365_s3 + $0x168] sm:$0xff]  ;;  %v12716_v15 = vld [vmem:[%s15365_s3 + $0x1f0] sm:$0xff] }
  0xa9   : > { %15943 = vst [vmem:[#allocation91_spill] sm:$0xff] %v12683_v34  ;;  %9889 = vmatpush3.bf16.msra.mxu1 %v15893_v56  ;;  %15944 = vst [vmem:[#allocation92_spill] sm:$0xff] %v12688_v12  ;;  %v12698_v10 = vpack.c.bf16 %v1511_v25, %v1508_v21  ;;  %v15949_v39 = vand.u32 4294901760, %v12643_v63  ;;  %v15950_v45 = vand.u32 4294901760, %v12652_v2  ;;  %v12727_v1 = vld [vmem:[%s15365_s3 + $0x1f8] sm:$0xff]  ;;  %v12734_v43 = vsub.f32 %v12621_v57, %v1454_v47  ;;  %v12753_v47 = vld [vmem:[%s15365_s3 + $0x170] sm:$0xff] }
  0xaa   : > { %15945 = vst [vmem:[#allocation93_spill] sm:$0xff] %v12690_v0  ;;  %9923 = vmatprep.subr.bf16.mxu1 %v12555_v32  ;;  %15946 = vst [vmem:[#allocation94_spill] sm:$0xff] %v12694_v5  ;;  %v12742_v52 = vpack.c.bf16 %v1589_v61, %v1582_v29  ;;  %v1460_v38 = vand.u32 4294901760, %v12706_v17  ;;  %v1514_v9 = vand.u32 4294901760, %v12716_v15  ;;  %v12758_v61 = vld [vmem:[%s15365_s3 + $0x178] sm:$0xff]  ;;  %v12764_v29 = vsub.f32 %v12649_v58, %v1511_v25 }
  0xab   : > { %15947 = vst [vmem:[#allocation95_spill] sm:$0xff] %v12696_v7  ;;  %15948 = vst [vmem:[#allocation96_spill] sm:$0xff] %v12698_v10  ;;  %v1707_v49 = vsub.f32 %v12643_v63, %v15949_v39  ;;  %9901 = vmatpush3.bf16.msra.mxu0 %v12499_v6  ;;  %v1714_v48 = vsub.f32 %v12652_v2, %v15950_v45  ;;  %v12737_v39 = vsub.f32 %v12626_v26, %v1457_v36 }
  0xac   : > { %1418 = vmatmul.mubr.f32.vlgmr.msra.gmra.mrb[4].mxu1 %v12091_v4  ;;  %9903 = vmatprep.subr.bf16.mxu0 %v12513_v51  ;;  %v12739_v45 = vand.u32 4294901760, %v415_v54  ;;  %15951 = vst [vmem:[#allocation97_spill] sm:$0xff] %v12742_v52  ;;  %v1463_v4 = vand.u32 4294901760, %v12711_v42  ;;  %v1517_v26 = vand.u32 4294901760, %v12727_v1  ;;  %v12761_v36 = vsub.f32 %v12641_v18, %v1508_v21 }
  0xad   : > { %9925 = vmatpush3.bf16.msra.mxu1 %v12583_v16  ;;  %1760 = vmatprep.mubr.f32.mxu1 %v12461_v3  ;;  %v1708_v57 = vand.u32 4294901760, %v1707_v49  ;;  %v1715_v49 = vand.u32 4294901760, %v1714_v48  ;;  %v15952_v53 = vand.u32 4294901760, %v12671_v37  ;;  %v15953_v16 = vand.u32 4294901760, %v12674_v22 }
  0xae   : > { %9927 = vmatprep.subr.bf16.mxu1 %v12591_v27  ;;  %v15954_v56 = vand.u32 4294901760, %v12676_v13  ;;  %v15955_v18 = vand.u32 4294901760, %v12685_v60  ;;  %v12783_v48 = vsub.f32 %v415_v54, %v12739_v45  ;;  %v12798_v54 = vsub.f32 %v12716_v15, %v1514_v9 }
  0xaf   : > { %9905 = vmatpush3.bf16.msra.mxu0 %v12557_v44  ;;  %v1595_v27 = vsub.f32 %v12671_v37, %v15952_v53  ;;  %v1602_v32 = vsub.f32 %v12674_v22, %v15953_v16  ;;  %v1466_v16 = vand.u32 4294901760, %v12753_v47  ;;  %v1469_v53 = vand.u32 4294901760, %v12758_v61 }
  0xb0   : > { %v1721_v3 = vsub.f32 %v12676_v13, %v15954_v56  ;;  %9907 = vmatprep.subr.bf16.mxu0 %v12593_v28  ;;  %v1728_v58 = vsub.f32 %v12685_v60, %v15955_v18  ;;  %v12789_v56 = vsub.f32 %v12706_v17, %v1460_v38  ;;  %v12792_v28 = vsub.f32 %v12711_v42, %v1463_v4 }
  0xb1   : > { %9929 = vmatpush3.bf16.msra.mxu1 %v12679_v59  ;;  %v12801_v21 = vsub.f32 %v12727_v1, %v1517_v26  ;;  %v12804_v59 = vpack.c.bf16 %v1715_v49, %v1708_v57  ;;  %v1596_v17 = vand.u32 4294901760, %v1595_v27  ;;  %v1603_v44 = vand.u32 4294901760, %v1602_v32 }
  0xb2   : > { %9931 = vmatprep.subr.bf16.mxu1 %v12688_v12  ;;  %v1722_v42 = vand.u32 4294901760, %v1721_v3  ;;  %v1729_v12 = vand.u32 4294901760, %v1728_v58  ;;  %v15957_v18 = vand.u32 4294901760, %v12734_v43  ;;  %v15958_v15 = vand.u32 4294901760, %v12737_v39 }
  0xb3   : > { %9909 = vmatpush3.bf16.msra.mxu0 %v12681_v24  ;;  %15956 = vst [vmem:[#allocation98_spill] sm:$0xff] %v12804_v59  ;;  %v12818_v3 = vsub.f32 %v12753_v47, %v1466_v16  ;;  %v12821_v32 = vsub.f32 %v12758_v61, %v1469_v53  ;;  %v15959_v49 = vand.u32 4294901760, %v12761_v36  ;;  %v12833_v47 = vpack.c.bf16 %v1463_v4, %v1460_v38 }
  0xb4   : > { %9911 = vmatprep.subr.bf16.mxu0 %v12683_v34  ;;  %v1609_v25 = vsub.f32 %v12734_v43, %v15957_v18  ;;  %v1616_v51 = vsub.f32 %v12737_v39, %v15958_v15  ;;  %v15960_v18 = vand.u32 4294901760, %v12764_v29  ;;  %v12835_v61 = vpack.c.bf16 %v1603_v44, %v1596_v17 }
  0xb5   : > { %9933 = vmatpush3.bf16.msra.mxu1 %v12694_v5  ;;  %v1735_v58 = vsub.f32 %v12761_v36, %v15959_v49  ;;  %15961 = vst [vmem:[#allocation99_spill] sm:$0xff] %v12833_v47  ;;  %v12837_v1 = vpack.c.bf16 %v1517_v26, %v1514_v9  ;;  %v15966_v27 = vand.u32 4294901760, %v12789_v56  ;;  %v15967_v44 = vand.u32 4294901760, %v12792_v28 }
  0xb6   : > { %9935 = vmatprep.subr.bf16.mxu1 %v12696_v7  ;;  %v1742_v15 = vsub.f32 %v12764_v29, %v15960_v18  ;;  %15962 = vst [vmem:[#allocation100_spill] sm:$0xff] %v12835_v61  ;;  %v12840_v7 = vpack.c.bf16 %v1729_v12, %v1722_v42  ;;  %v1610_v49 = vand.u32 4294901760, %v1609_v25  ;;  %v1617_v5 = vand.u32 4294901760, %v1616_v51 }
  0xb7   : > { %9913 = vmatpush3.bf16.msra.mxu0 %v12690_v0  ;;  %15963 = vst [vmem:[#allocation101_spill] sm:$0xff] %v12837_v1  ;;  %v15965_v18 = vand.u32 4294901760, %v12783_v48  ;;  %v1623_v38 = vsub.f32 %v12789_v56, %v15966_v27  ;;  %v1630_v9 = vsub.f32 %v12792_v28, %v15967_v44  ;;  %v15530_v4 = vand.u32 4294901760, %v12818_v3 }
  0xb8   : > { %9915 = vmatprep.subr.bf16.mxu0 %v12698_v10  ;;  %15964 = vst [vmem:[#allocation102_spill] sm:$0xff] %v12840_v7  ;;  %v15529_v12 = vand.u32 4294901760, %v12821_v32  ;;  %v1736_v51 = vand.u32 4294901760, %v1735_v58  ;;  %v1743_v26 = vand.u32 4294901760, %v1742_v15  ;;  %v15968_v25 = vand.u32 4294901760, %v12798_v54 }
  0xb9   : > { %v1528_v57 = vsub.f32 %v12783_v48, %v15965_v18  ;;  %9937 = vmatpush3.bf16.msra.mxu1 %v12742_v52  ;;  %v15969_v42 = vand.u32 4294901760, %v12801_v21  ;;  %v12862_v18 = vpack.c.bf16 %v1469_v53, %v1466_v16  ;;  %v12865_v44 = vpack.c.bf16 %v1617_v5, %v1610_v49  ;;  %v15999_v52 = vld [vmem:[#allocation85_spill] sm:$0xff] }
  0xba   : > { %9939 = vmatprep.subr.bf16.mxu1 %v12804_v59  ;;  %v1749_v17 = vsub.f32 %v12798_v54, %v15968_v25  ;;  %v12869_v58 = vpack.c.bf16 %v12377_v33, %v12373_v30  ;;  %v1624_v15 = vand.u32 4294901760, %v1623_v38  ;;  %v1631_v25 = vand.u32 4294901760, %v1630_v9 }
  0xbb   : > { %v1756_v27 = vsub.f32 %v12801_v21, %v15969_v42  ;;  %9917 = vmatpush3.bf16.msra.mxu0 %v12833_v47  ;;  %15970 = vst [vmem:[#allocation103_spill] sm:$0xff] %v12862_v18  ;;  %15971 = vst [vmem:[#allocation104_spill] sm:$0xff] %v12865_v44  ;;  %v1637_v42 = vsub.f32 %v12818_v3, %v15530_v4  ;;  %v1644_v16 = vsub.f32 %v12821_v32, %v15529_v12  ;;  %v15989_v4 = vld [vmem:[#allocation78_spill] sm:$0xff] }
  0xbc   : > { %9919 = vmatprep.subr.bf16.mxu0 %v12837_v1  ;;  %15972 = vst [vmem:[#allocation105_spill] sm:$0xff] %v12869_v58  ;;  %v1529_v5 = vand.u32 4294901760, %v1528_v57  ;;  %v12879_v53 = vpack.c.bf16 %v1743_v26, %v1736_v51  ;;  %v1750_v49 = vand.u32 4294901760, %v1749_v17  ;;  %v12884_v38 = vpack.c.bf16 %v12420_v8, %v12398_v14 }
  0xbd   : > { %9941 = vmatpush3.bf16.msra.mxu1 %v12835_v61  ;;  %v1757_v59 = vand.u32 4294901760, %v1756_v27  ;;  %v12889_v9 = vpack.c.bf16 %v12445_v62, %v12423_v41  ;;  %v12892_v12 = vpack.c.bf16 %v1631_v25, %v1624_v15  ;;  %v1638_v57 = vand.u32 4294901760, %v1637_v42  ;;  %v15982_v25 = vld [vmem:[#allocation83_spill] sm:$0xff] }
  0xbe   : > { %9943 = vmatprep.subr.bf16.mxu1 %v12840_v7  ;;  %15973 = vst [vmem:[#allocation106_spill] sm:$0xff] %v12879_v53  ;;  %15974 = vst [vmem:[#allocation107_spill] sm:$0xff] %v12884_v38  ;;  %v1645_v51 = vand.u32 4294901760, %v1644_v16  ;;  %v12900_v17 = vpack.c.bf16 %v12518_v35, %v12510_v40  ;;  %v12906_v27 = vpack.c.bf16 %v12534_v31, %v12521_v23  ;;  %v15984_v16 = vld [vmem:[#allocation76_spill] sm:$0xff] }
  0xbf   : > { %9921 = vmatpush3.bf16.msra.mxu0 %v12862_v18  ;;  %15975 = vst [vmem:[#allocation108_spill] sm:$0xff] %v12889_v9  ;;  %15976 = vst [vmem:[#allocation109_spill] sm:$0xff] %v12892_v12  ;;  %v12895_v26 = vpack.c.bf16 %v1757_v59, %v1750_v49  ;;  %v12915_v59 = vpack.c.bf16 %v12540_v20, %v12536_v50  ;;  %v12920_v42 = vpack.c.bf16 %v15982_v25, %v12544_v11 }
  0xc0   : > { %9955 = vmatprep.subr.bf16.mxu0 %v12869_v58  ;;  %15978 = vst [vmem:[#allocation111_spill] sm:$0xff] %v12900_v17  ;;  %15979 = vst [vmem:[#allocation112_spill] sm:$0xff] %v12906_v27  ;;  %v12909_v15 = vpack.c.bf16 %v1645_v51, %v1638_v57  ;;  %v12933_v49 = vpack.c.bf16 %v12652_v2, %v12643_v63  ;;  %v15987_v57 = vld [vmem:[#allocation77_spill] sm:$0xff]  ;;  %v15988_v51 = vand.u32 4294901760, %v12483_v55 }
  0xc1   : > { %9945 = vmatpush3.bf16.msra.mxu1 %v12865_v44  ;;  %15977 = vst [vmem:[#allocation110_spill] sm:$0xff] %v12895_v26  ;;  %15981 = vst [vmem:[#allocation114_spill] sm:$0xff] %v12915_v59  ;;  %v15996_v44 = vld [vmem:[#allocation82_spill] sm:$0xff]  ;;  %v12966_v7 = vpack.c.bf16 %v12792_v28, %v12789_v56  ;;  %v12971_v61 = vpack.c.bf16 %v12801_v21, %v12798_v54 }
  0xc2   : > { %1530 = vmatmul.mubr.f32.vlgmr.msra.gmra.mrb[6].mxu0 %v1529_v5  ;;  %9947 = vmatprep.subr.bf16.mxu1 %v12879_v53  ;;  %15980 = vst [vmem:[#allocation113_spill] sm:$0xff] %v12909_v15  ;;  %15983 = vst [vmem:[#allocation83_spill] sm:$0xff] %v12920_v42  ;;  %v12927_v5 = vpack.c.bf16 %v12580_v19, %v12578_v46  ;;  %v15993_v53 = vld [vmem:[#allocation80_spill] sm:$0xff] }
  0xc3   : > { %9957 = vmatpush3.bf16.msra.mxu0 %v12884_v38  ;;  %1897 = vmatprep.mubr.f32.mxu0 %v12483_v55  ;;  %15986 = vst [vmem:[#allocation116_spill] sm:$0xff] %v12933_v49  ;;  %v12954_v55 = vpack.c.bf16 %v12737_v39, %v12734_v43  ;;  %15997 = vst [vmem:[#allocation121_spill] sm:$0xff] %v12966_v7 }
  0xc4   : > { %9959 = vmatprep.subr.bf16.mxu0 %v12889_v9  ;;  %15985 = vst [vmem:[#allocation115_spill] sm:$0xff] %v12927_v5  ;;  %15998 = vst [vmem:[#allocation122_spill] sm:$0xff] %v12971_v61 }
  0xc5   : > { %9949 = vmatpush3.bf16.msra.mxu1 %v12892_v12  ;;  %v15992_v12 = vld [vmem:[#allocation79_spill] sm:$0xff]  ;;  %15994 = vst [vmem:[#allocation119_spill] sm:$0xff] %v12954_v55 }
  0xc6   : > { %9951 = vmatprep.subr.bf16.mxu1 %v12895_v26  ;;  %v12947_v26 = vpack.c.bf16 %v12685_v60, %v12676_v13 }
  0xc7   : > { %9961 = vmatpush3.bf16.msra.mxu0 %v12900_v17 }
  0xc8   : > { %9963 = vmatprep.subr.bf16.mxu0 %v12906_v27  ;;  %15991 = vst [vmem:[#allocation118_spill] sm:$0xff] %v12947_v26 }
  0xc9   : > { %9953 = vmatpush3.bf16.msra.mxu1 %v12909_v15  ;;  %v12942_v15 = vpack.c.bf16 %v12674_v22, %v12671_v37 }
  0xca   : > { %9987 = vmatprep.subr.bf16.mxu1 %v15984_v16 }
  0xcb   : > { %9965 = vmatpush3.bf16.msra.mxu0 %v12915_v59  ;;  %15990 = vst [vmem:[#allocation117_spill] sm:$0xff] %v12942_v15 }
  0xcc   : > { %1762 = vmatmul.mubr.f32.vlgmr.msra.gmra.mrb[6].mxu1 %v12739_v45  ;;  %9967 = vmatprep.subr.bf16.mxu0 %v12920_v42 }
  0xcd   : > { %9989 = vmatpush3.bf16.msra.mxu1 %v15987_v57  ;;  %2004 = vmatprep.mubr.f32.mxu1 %v15988_v51  ;;  %v12959_v51 = vpack.c.bf16 %v12764_v29, %v12761_v36 }
  0xce   : > { %9991 = vmatprep.subr.bf16.mxu1 %v15989_v4 }
  0xcf   : > { %9969 = vmatpush3.bf16.msra.mxu0 %v12927_v5  ;;  %15995 = vst [vmem:[#allocation120_spill] sm:$0xff] %v12959_v51  ;;  %v16006_v5 = vand.u32 4294901760, %v12420_v8  ;;  %v13014_v8 = vld [vmem:[%s15365_s3 + $0x288] sm:$0xff] }
  0xd0   : > { %9971 = vmatprep.subr.bf16.mxu0 %v12933_v49  ;;  %v16056_v9 = vand.u32 4294901760, %v13014_v8 }
  0xd1   : > { %9993 = vmatpush3.bf16.msra.mxu1 %v15992_v12 }
  0xd2   : > { %9995 = vmatprep.subr.bf16.mxu1 %v15993_v53 }
  0xd3   : > { %9973 = vmatpush3.bf16.msra.mxu0 %v12942_v15  ;;  %v12978_v15 = vpack.c.bf16 %v12821_v32, %v12818_v3 }
  0xd4   : > { %9975 = vmatprep.subr.bf16.mxu0 %v12947_v26  ;;  %v16000_v26 = vld [vmem:[#allocation88_spill] sm:$0xff] }
  0xd5   : > { %9997 = vmatpush3.bf16.msra.mxu1 %v12499_v6  ;;  %16001 = vst [vmem:[#allocation123_spill] sm:$0xff] %v12978_v15 }
  0xd6   : > { %9999 = vmatprep.subr.bf16.mxu1 %v15996_v44 }
  0xd7   : > { %9977 = vmatpush3.bf16.msra.mxu0 %v12954_v55  ;;  %v16002_v55 = vand.u32 4294901760, %v12373_v30  ;;  %v16008_v30 = vand.u32 4294901760, %v12423_v41  ;;  %v16012_v41 = vand.u32 4294901760, %v12518_v35  ;;  %v13038_v35 = vld [vmem:[%s15365_s3 + $0x200] sm:$0xff] }
  0xd8   : > { %9979 = vmatprep.subr.bf16.mxu0 %v12959_v51  ;;  %v16003_v51 = vand.u32 4294901760, %v12377_v33  ;;  %v16009_v33 = vand.u32 4294901760, %v12445_v62  ;;  %v16011_v62 = vand.u32 4294901760, %v12510_v40 }
  0xd9   : > { %10001 = vmatpush3.bf16.msra.mxu1 %v15999_v52 }
  0xda   : > { %10003 = vmatprep.subr.bf16.mxu1 %v16000_v26  ;;  %v12985_v49 = vpack.c.bf16 %v16003_v51, %v16002_v55  ;;  %v13001_v55 = vpack.c.bf16 %v16009_v33, %v16008_v30  ;;  %v16015_v51 = vand.u32 4294901760, %v12521_v23  ;;  %v16016_v30 = vand.u32 4294901760, %v12534_v31 }
  0xdb   : > { %9981 = vmatpush3.bf16.msra.mxu0 %v12966_v7  ;;  %v16005_v7 = vand.u32 4294901760, %v12398_v14  ;;  %v13009_v14 = vld [vmem:[%s15365_s3 + $0x280] sm:$0xff]  ;;  %v16018_v23 = vand.u32 4294901760, %v12536_v50  ;;  %v16019_v31 = vand.u32 4294901760, %v12540_v20  ;;  %v16022_v50 = vand.u32 4294901760, %v15982_v25  ;;  %v13067_v20 = vld [vmem:[%s15365_s3 + $0x298] sm:$0xff] }
  0xdc   : > { %9983 = vmatprep.subr.bf16.mxu0 %v12971_v61  ;;  %16004 = vst [vmem:[#allocation124_spill] sm:$0xff] %v12985_v49  ;;  %16010 = vst [vmem:[#allocation126_spill] sm:$0xff] %v13001_v55  ;;  %v13029_v33 = vpack.c.bf16 %v16016_v30, %v16015_v51  ;;  %v13055_v51 = vld [vmem:[%s15365_s3 + $0x290] sm:$0xff]  ;;  %v16021_v30 = vand.u32 4294901760, %v12544_v11  ;;  %v16024_v11 = vand.u32 4294901760, %v13014_v8  ;;  %v16031_v61 = vand.u32 4294901760, %v12783_v48 }
  0xdd   : > { %10005 = vmatpush3.bf16.msra.mxu1 %v12681_v24  ;;  %v12994_v42 = vpack.c.bf16 %v16006_v5, %v16005_v7  ;;  %v13021_v7 = vpack.c.bf16 %v16012_v41, %v16011_v62  ;;  %v16014_v5 = vld [vmem:[#allocation75_spill] sm:$0xff]  ;;  %v13045_v62 = vpack.c.bf16 %v16019_v31, %v16018_v23  ;;  %v13050_v41 = vld [vmem:[%s15365_s3 + $0x208] sm:$0xff]  ;;  %v2286_v23 = vand.u32 4294901760, %v13038_v35 }
  0xde   : > { %10007 = vmatprep.subr.bf16.mxu1 %v12683_v34  ;;  %16017 = vst [vmem:[#allocation75_spill] sm:$0xff] %v13029_v33  ;;  %v13062_v40 = vpack.c.bf16 %v16022_v50, %v16021_v30  ;;  %v13079_v25 = vsub.f32 %v13014_v8, %v16024_v11  ;;  %v2289_v30 = vand.u32 4294901760, %v13050_v41  ;;  %v2340_v50 = vand.u32 4294901760, %v13055_v51 }
  0xdf   : > { %9985 = vmatpush3.bf16.msra.mxu0 %v12978_v15  ;;  %16007 = vst [vmem:[#allocation125_spill] sm:$0xff] %v12994_v42  ;;  %16013 = vst [vmem:[#allocation127_spill] sm:$0xff] %v13021_v7  ;;  %v2343_v15 = vand.u32 4294901760, %v13067_v20 }
  0xe0   : > { %10019 = vmatprep.subr.bf16.mxu0 %v12985_v49  ;;  %16020 = vst [vmem:[#allocation128_spill] sm:$0xff] %v13045_v62  ;;  %16023 = vst [vmem:[#allocation129_spill] sm:$0xff] %v13062_v40  ;;  %v16029_v49 = vand.u32 4294901760, %v12652_v2  ;;  %v13213_v38 = vpack.c.bf16 %v2289_v30, %v2286_v23 }
  0xe1   : > { %10009 = vmatpush3.bf16.msra.mxu1 %v12690_v0  ;;  %v13220_v58 = vpack.c.bf16 %v2343_v15, %v2340_v50 }
  0xe2   : > { %1900 = vmatmul.mubr.f32.vlgmr.msra.gmra.mrb[8].mxu0 %v12783_v48  ;;  %10011 = vmatprep.subr.bf16.mxu1 %v12698_v10  ;;  %16058 = vst [vmem:[#allocation141_spill] sm:$0xff] %v13213_v38 }
  0xe3   : > { %10021 = vmatpush3.bf16.msra.mxu0 %v12994_v42  ;;  %2174 = vmatprep.mubr.f32.mxu0 %v16014_v5  ;;  %v15550_v42 = vand.u32 4294901760, %v13009_v14  ;;  %16059 = vst [vmem:[#allocation142_spill] sm:$0xff] %v13220_v58 }
  0xe4   : > { %10023 = vmatprep.subr.bf16.mxu0 %v13001_v55  ;;  %v16028_v55 = vand.u32 4294901760, %v12643_v63  ;;  %v16036_v63 = vand.u32 4294901760, %v12685_v60  ;;  %v16042_v60 = vand.u32 4294901760, %v12764_v29  ;;  %v13146_v29 = vsub.f32 %v13038_v35, %v2286_v23 }
  0xe5   : > { %10013 = vmatpush3.bf16.msra.mxu1 %v12833_v47  ;;  %v13074_v31 = vsub.f32 %v13009_v14, %v15550_v42  ;;  %v13165_v35 = vsub.f32 %v13050_v41, %v2289_v30  ;;  %v13185_v41 = vld [vmem:[%s15365_s3 + $0x2b8] sm:$0xff] }
  0xe6   : > { %10015 = vmatprep.subr.bf16.mxu1 %v12837_v1  ;;  %v13095_v11 = vpack.c.bf16 %v16029_v49, %v16028_v55  ;;  %v16038_v49 = vand.u32 4294901760, %v12734_v43  ;;  %v16039_v55 = vand.u32 4294901760, %v12737_v39  ;;  %v513_v39 = vld [vmem:[%s15365_s3 + $0x2a0] sm:$0xff]  ;;  %v2355_v27 = vand.u32 4294901760, %v13185_v41 }
  0xe7   : > { %10025 = vmatpush3.bf16.msra.mxu0 %v13021_v7  ;;  %v16026_v7 = vand.u32 4294901760, %v12580_v19  ;;  %v16062_v30 = vand.u32 4294901760, %v13146_v29 }
  0xe8   : > { %10027 = vmatprep.subr.bf16.mxu0 %v13029_v33  ;;  %v16025_v33 = vand.u32 4294901760, %v12578_v46  ;;  %16030 = vst [vmem:[#allocation131_spill] sm:$0xff] %v13095_v11  ;;  %v16033_v46 = vand.u32 4294901760, %v12674_v22  ;;  %v13117_v48 = vpack.c.bf16 %v16039_v55, %v16038_v49  ;;  %v496_v22 = vld [vmem:[%s15365_s3 + $0x218] sm:$0xff]  ;;  %v16047_v49 = vand.u32 4294901760, %v12798_v54 }
  0xe9   : > { %10017 = vmatpush3.bf16.msra.mxu1 %v12862_v18  ;;  %v16048_v55 = vand.u32 4294901760, %v12801_v21 }
  0xea   : > { %10051 = vmatprep.subr.bf16.mxu1 %v15984_v16  ;;  %v13089_v42 = vpack.c.bf16 %v16026_v7, %v16025_v33  ;;  %v16035_v7 = vand.u32 4294901760, %v12676_v13  ;;  %16040 = vst [vmem:[#allocation134_spill] sm:$0xff] %v13117_v48  ;;  %v16041_v13 = vand.u32 4294901760, %v12761_v36  ;;  %v514_v33 = vld [vmem:[%s15365_s3 + $0x2a8] sm:$0xff]  ;;  %v497_v36 = vld [vmem:[%s15365_s3 + $0x220] sm:$0xff] }
  0xeb   : > { %10029 = vmatpush3.bf16.msra.mxu0 %v13045_v62  ;;  %v16032_v62 = vand.u32 4294901760, %v12671_v37  ;;  %v495_v37 = vld [vmem:[%s15365_s3 + $0x210] sm:$0xff] }
  0xec   : > { %16027 = vst [vmem:[#allocation130_spill] sm:$0xff] %v13089_v42  ;;  %2008 = vmatmul.mubr.f32.vlgmr.msra.gmra.mrb[8].mxu1 %v16031_v61  ;;  %10031 = vmatprep.subr.bf16.mxu0 %v13062_v40  ;;  %v13111_v2 = vpack.c.bf16 %v16036_v63, %v16035_v7  ;;  %v418_v61 = vld [vmem:[%s11999_s24 + $0x28] sm:$0xff]  ;;  %v13131_v43 = vpack.c.bf16 %v16042_v60, %v16041_v13  ;;  %v16045_v7 = vand.u32 4294901760, %v12792_v28  ;;  %v16050_v28 = vand.u32 4294901760, %v12818_v3 }
  0xed   : > { %v13105_v19 = vpack.c.bf16 %v16033_v46, %v16032_v62  ;;  %10053 = vmatpush3.bf16.msra.mxu1 %v15987_v57  ;;  %2278 = vmatprep.mubr.f32.mxu1 %v16014_v5  ;;  %v15562_v62 = vand.u32 4294901760, %v13074_v31  ;;  %v16044_v5 = vand.u32 4294901760, %v12789_v56  ;;  %v13159_v13 = vpack.c.bf16 %v16048_v55, %v16047_v49  ;;  %v498_v60 = vld [vmem:[%s15365_s3 + $0x228] sm:$0xff] }
  0xee   : > { %16037 = vst [vmem:[#allocation133_spill] sm:$0xff] %v13111_v2  ;;  %16043 = vst [vmem:[#allocation135_spill] sm:$0xff] %v13131_v43  ;;  %10055 = vmatprep.subr.bf16.mxu1 %v15989_v4  ;;  %v13168_v46 = vsub.f32 %v13055_v51, %v2340_v50  ;;  %v16051_v56 = vand.u32 4294901760, %v12821_v32  ;;  %v2292_v21 = vand.u32 4294901760, %v495_v37  ;;  %v13188_v51 = vsub.f32 %v13067_v20, %v2343_v15 }
  0xef   : > { %16034 = vst [vmem:[#allocation132_spill] sm:$0xff] %v13105_v19  ;;  %v13153_v63 = vpack.c.bf16 %v16045_v7, %v16044_v5  ;;  %16049 = vst [vmem:[#allocation137_spill] sm:$0xff] %v13159_v13  ;;  %10033 = vmatpush3.bf16.msra.mxu0 %v13089_v42  ;;  %v13180_v5 = vld [vmem:[%s15365_s3 + $0x2b0] sm:$0xff]  ;;  %v13190_v7 = vand.u32 4294901760, %v418_v61  ;;  %v2295_v3 = vand.u32 4294901760, %v496_v22  ;;  %v2346_v32 = vand.u32 4294901760, %v513_v39 }
  0xf0   : > { %v13175_v54 = vpack.c.bf16 %v16051_v56, %v16050_v28  ;;  %10035 = vmatprep.subr.bf16.mxu0 %v13095_v11  ;;  %v2349_v49 = vand.u32 4294901760, %v514_v33  ;;  %v2298_v55 = vand.u32 4294901760, %v497_v36  ;;  %v2513_v28 = vsub.f32 %v13074_v31, %v15562_v62 }
  0xf1   : > { %16046 = vst [vmem:[#allocation136_spill] sm:$0xff] %v13153_v63  ;;  %16053 = vst [vmem:[#allocation139_spill] sm:$0xff] %v13190_v7  ;;  %10057 = vmatpush3.bf16.msra.mxu1 %v15992_v12  ;;  %v16054_v56 = vand.u32 4294901760, %v13079_v25  ;;  %v2301_v20 = vand.u32 4294901760, %v498_v60  ;;  %v2352_v59 = vand.u32 4294901760, %v13180_v5  ;;  %v16055_v62 = vand.u32 4294901760, %v13009_v14 }
  0xf2   : > { %16052 = vst [vmem:[#allocation138_spill] sm:$0xff] %v13175_v54  ;;  %10059 = vmatprep.subr.bf16.mxu1 %v15993_v53  ;;  %v15569_v40 = vand.u32 4294901760, %v13188_v51  ;;  %v13217_v11 = vsub.f32 %v418_v61, %v13190_v7  ;;  %v13222_v17 = vpack.c.bf16 %v2295_v3, %v2292_v21  ;;  %v13226_v14 = vsub.f32 %v496_v22, %v2295_v3  ;;  %v500_v3 = vld [vmem:[%s15365_s3 + $0x238] sm:$0xff] }
  0xf3   : > { %v2520_v42 = vsub.f32 %v13079_v25, %v16054_v56  ;;  %10037 = vmatpush3.bf16.msra.mxu0 %v13105_v19  ;;  %v13211_v56 = vpack.c.bf16 %v16056_v9, %v16055_v62  ;;  %v13224_v19 = vsub.f32 %v495_v37, %v2292_v21  ;;  %v13229_v9 = vpack.c.bf16 %v2349_v49, %v2346_v32 }
  0xf4   : > { %10039 = vmatprep.subr.bf16.mxu0 %v13111_v2  ;;  %16060 = vst [vmem:[#allocation143_spill] sm:$0xff] %v13222_v17  ;;  %v2514_v8 = vand.u32 4294901760, %v2513_v28  ;;  %v2401_v61 = vsub.f32 %v13146_v29, %v16062_v30  ;;  %v13235_v15 = vpack.c.bf16 %v2301_v20, %v2298_v55  ;;  %v16064_v50 = vand.u32 4294901760, %v13165_v35  ;;  %v13258_v30 = vld [vmem:[%s15365_s3 + $0x2c0] sm:$0xff] }
  0xf5   : > { %16057 = vst [vmem:[#allocation140_spill] sm:$0xff] %v13211_v56  ;;  %10061 = vmatpush3.bf16.msra.mxu1 %v12499_v6  ;;  %16061 = vst [vmem:[#allocation144_spill] sm:$0xff] %v13229_v9  ;;  %v2521_v23 = vand.u32 4294901760, %v2520_v42  ;;  %v13240_v22 = vpack.c.bf16 %v2355_v27, %v2352_v59  ;;  %v16066_v62 = vand.u32 4294901760, %v13168_v46  ;;  %v499_v42 = vld [vmem:[%s15365_s3 + $0x230] sm:$0xff]  ;;  %v2534_v28 = vsub.f32 %v13188_v51, %v15569_v40 }
  0xf6   : > { %10063 = vmatprep.subr.bf16.mxu1 %v15996_v44  ;;  %16063 = vst [vmem:[#allocation145_spill] sm:$0xff] %v13235_v15  ;;  %v2408_v37 = vsub.f32 %v13165_v35, %v16064_v50  ;;  %v13263_v50 = vld [vmem:[%s15365_s3 + $0x2c8] sm:$0xff]  ;;  %v13267_v2 = vsub.f32 %v514_v33, %v2349_v49  ;;  %v15579_v44 = vand.u32 4294901760, %v13226_v14  ;;  %v13273_v6 = vsub.f32 %v497_v36, %v2298_v55  ;;  %v13286_v36 = vld [vmem:[%s15365_s3 + $0x240] sm:$0xff] }
  0xf7   : > { %16065 = vst [vmem:[#allocation146_spill] sm:$0xff] %v13240_v22  ;;  %v2527_v21 = vsub.f32 %v13168_v46, %v16066_v62  ;;  %10041 = vmatpush3.bf16.msra.mxu0 %v13117_v48  ;;  %v13265_v62 = vsub.f32 %v513_v39, %v2346_v32  ;;  %v13275_v53 = vsub.f32 %v498_v60, %v2301_v20  ;;  %v2402_v39 = vand.u32 4294901760, %v2401_v61  ;;  %v13291_v60 = vld [vmem:[%s15365_s3 + $0x248] sm:$0xff] }
  0xf8   : > { %10043 = vmatprep.subr.bf16.mxu0 %v13131_v43  ;;  %v13278_v12 = vpack.c.bf16 %v2521_v23, %v2514_v8  ;;  %v2304_v32 = vand.u32 4294901760, %v499_v42  ;;  %v2307_v33 = vand.u32 4294901760, %v500_v3  ;;  %v2409_v49 = vand.u32 4294901760, %v2408_v37 }
  0xf9   : > { %16067 = vst [vmem:[#allocation147_spill] sm:$0xff] %v13275_v53  ;;  %10065 = vmatpush3.bf16.msra.mxu1 %v15999_v52  ;;  %v2528_v48 = vand.u32 4294901760, %v2527_v21  ;;  %v2358_v43 = vand.u32 4294901760, %v13258_v30  ;;  %v2361_v40 = vand.u32 4294901760, %v13263_v50  ;;  %v2535_v55 = vand.u32 4294901760, %v2534_v28 }
  0xfa   : > { %16068 = vst [vmem:[#allocation148_spill] sm:$0xff] %v13278_v12  ;;  %10067 = vmatprep.subr.bf16.mxu1 %v16000_v26  ;;  %v16069_v23 = vand.u32 4294901760, %v13217_v11  ;;  %v16070_v37 = vand.u32 4294901760, %v13224_v19  ;;  %v2422_v26 = vsub.f32 %v13226_v14, %v15579_v44  ;;  %v2310_v8 = vand.u32 4294901760, %v13286_v36 }
  0xfb   : > { %10045 = vmatpush3.bf16.msra.mxu0 %v13153_v63  ;;  %v13315_v63 = vsub.f32 %v13185_v41, %v2355_v27  ;;  %v13320_v44 = vpack.c.bf16 %v2307_v33, %v2304_v32  ;;  %v13322_v28 = vsub.f32 %v499_v42, %v2304_v32  ;;  %v13324_v20 = vsub.f32 %v500_v3, %v2307_v33 }
  0xfc   : > { %v2384_v61 = vsub.f32 %v13217_v11, %v16069_v23  ;;  %10047 = vmatprep.subr.bf16.mxu0 %v13159_v13  ;;  %v2415_v21 = vsub.f32 %v13224_v19, %v16070_v37  ;;  %v2313_v23 = vand.u32 4294901760, %v13291_v60  ;;  %v13312_v13 = vsub.f32 %v13180_v5, %v2352_v59 }
  0xfd   : > { %10069 = vmatpush3.bf16.msra.mxu1 %v12681_v24  ;;  %v13318_v37 = vpack.c.bf16 %v2409_v49, %v2402_v39  ;;  %16072 = vst [vmem:[#allocation150_spill] sm:$0xff] %v13320_v44  ;;  %v13327_v24 = vpack.c.bf16 %v2361_v40, %v2358_v43  ;;  %v16074_v59 = vand.u32 4294901760, %v13265_v62  ;;  %v16075_v27 = vand.u32 4294901760, %v13267_v2  ;;  %v519_v39 = vld [vmem:[%s15365_s3 + $0x2d0] sm:$0xff] }
  0xfe   : > { %10071 = vmatprep.subr.bf16.mxu1 %v12683_v34  ;;  %v2385_v42 = vand.u32 4294901760, %v2384_v61  ;;  %v13339_v3 = vpack.c.bf16 %v2535_v55, %v2528_v48  ;;  %v2416_v32 = vand.u32 4294901760, %v2415_v21  ;;  %v16077_v33 = vand.u32 4294901760, %v13273_v6  ;;  %v13358_v21 = vld [vmem:[%s15365_s3 + $0x250] sm:$0xff]  ;;  %v13372_v55 = vld [vmem:[%s15365_s3 + $0x2e0] sm:$0xff] }
  0xff   : > { %16071 = vst [vmem:[#allocation149_spill] sm:$0xff] %v13318_v37  ;;  %10049 = vmatpush3.bf16.msra.mxu0 %v13175_v54  ;;  %16073 = vst [vmem:[#allocation151_spill] sm:$0xff] %v13327_v24  ;;  %v2541_v5 = vsub.f32 %v13265_v62, %v16074_v59  ;;  %v2548_v41 = vsub.f32 %v13267_v2, %v16075_v27  ;;  %v16078_v59 = vand.u32 4294901760, %v13275_v53  ;;  %v520_v27 = vld [vmem:[%s15365_s3 + $0x2d8] sm:$0xff]  ;;  %v2423_v61 = vand.u32 4294901760, %v2422_v26 }
 0x100   : > { %10083 = vmatprep.subr.bf16.mxu0 %v13211_v56  ;;  %16076 = vst [vmem:[#allocation152_spill] sm:$0xff] %v13339_v3  ;;  %v2429_v49 = vsub.f32 %v13273_v6, %v16077_v33  ;;  %v13351_v34 = vpack.c.bf16 %v2313_v23, %v2310_v8  ;;  %v13363_v33 = vld [vmem:[%s15365_s3 + $0x258] sm:$0xff]  ;;  %v2364_v26 = vand.u32 4294901760, %v519_v39  ;;  %v13380_v52 = vsub.f32 %v13258_v30, %v2358_v43 }
 0x101   : > { %v2436_v54 = vsub.f32 %v13275_v53, %v16078_v59  ;;  %10073 = vmatpush3.bf16.msra.mxu1 %v12690_v0  ;;  %v13377_v0 = vld [vmem:[%s15365_s3 + $0x2e8] sm:$0xff]  ;;  %v2549_v4 = vand.u32 4294901760, %v2548_v41  ;;  %v2367_v59 = vand.u32 4294901760, %v520_v27  ;;  %v13384_v48 = vsub.f32 %v13263_v50, %v2361_v40 }
 0x102   : > { %16079 = vst [vmem:[#allocation153_spill] sm:$0xff] %v13351_v34  ;;  %2176 = vmatmul.mubr.f32.vlgmr.msra.gmra.mrb[10].mxu0 %v12739_v45  ;;  %10075 = vmatprep.subr.bf16.mxu1 %v12698_v10  ;;  %v2542_v10 = vand.u32 4294901760, %v2541_v5  ;;  %v2430_v57 = vand.u32 4294901760, %v2429_v49  ;;  %v2316_v56 = vand.u32 4294901760, %v13358_v21  ;;  %v2319_v53 = vand.u32 4294901760, %v13363_v33 }
 0x103   : > { %10085 = vmatpush3.bf16.msra.mxu0 %v13213_v38  ;;  %2386 = vmatprep.mubr.f32.mxu0 %v2385_v42  ;;  %v2437_v16 = vand.u32 4294901760, %v2436_v54  ;;  %v16080_v43 = vand.u32 4294901760, %v13312_v13  ;;  %v16081_v5 = vand.u32 4294901760, %v13315_v63  ;;  %v2370_v50 = vand.u32 4294901760, %v13372_v55 }
 0x104   : > { %10087 = vmatprep.subr.bf16.mxu0 %v13220_v58  ;;  %v2373_v41 = vand.u32 4294901760, %v13377_v0  ;;  %v13399_v54 = vpack.c.bf16 %v2423_v61, %v2416_v32  ;;  %v16083_v42 = vand.u32 4294901760, %v13322_v28  ;;  %v13413_v32 = vld [vmem:[%s15365_s3 + $0x260] sm:$0xff]  ;;  %v13416_v61 = vsub.f32 %v13286_v36, %v2310_v8 }
 0x105   : > { %10077 = vmatpush3.bf16.msra.mxu1 %v12833_v47  ;;  %v2555_v30 = vsub.f32 %v13312_v13, %v16080_v43  ;;  %v2562_v40 = vsub.f32 %v13315_v63, %v16081_v5  ;;  %v16084_v47 = vand.u32 4294901760, %v13324_v20  ;;  %v13426_v58 = vpack.c.bf16 %v2367_v59, %v2364_v26 }
 0x106   : > { %10079 = vmatprep.subr.bf16.mxu1 %v12837_v1  ;;  %16082 = vst [vmem:[#allocation154_spill] sm:$0xff] %v13399_v54  ;;  %v2443_v49 = vsub.f32 %v13322_v28, %v16083_v42  ;;  %v13419_v42 = vsub.f32 %v13291_v60, %v2313_v23  ;;  %v13421_v1 = vsub.f32 %v519_v39, %v2364_v26  ;;  %v417_v23 = vld [vmem:[%s11999_s24 + $0x20] sm:$0xff] }
 0x107   : > { %v2450_v43 = vsub.f32 %v13324_v20, %v16084_v47  ;;  %10089 = vmatpush3.bf16.msra.mxu0 %v13222_v17  ;;  %v13424_v47 = vpack.c.bf16 %v2549_v4, %v2542_v10  ;;  %16086 = vst [vmem:[#allocation156_spill] sm:$0xff] %v13426_v58  ;;  %v13428_v5 = vpack.c.bf16 %v2319_v53, %v2316_v56  ;;  %v2556_v36 = vand.u32 4294901760, %v2555_v30 }
 0x108   : > { %10091 = vmatprep.subr.bf16.mxu0 %v13229_v9  ;;  %v13430_v17 = vsub.f32 %v520_v27, %v2367_v59  ;;  %v13433_v38 = vpack.c.bf16 %v2437_v16, %v2430_v57  ;;  %v2563_v8 = vand.u32 4294901760, %v2562_v40  ;;  %v13435_v60 = vpack.c.bf16 %v2373_v41, %v2370_v50  ;;  %v13445_v27 = vld [vmem:[%s15365_s3 + $0x268] sm:$0xff]  ;;  %v13451_v57 = vld [vmem:[%s15365_s3 + $0x2f0] sm:$0xff]  ;;  %v13456_v59 = vld [vmem:[%s15365_s3 + $0x2f8] sm:$0xff] }
 0x109   : > { %16085 = vst [vmem:[#allocation155_spill] sm:$0xff] %v13424_v47  ;;  %16087 = vst [vmem:[#allocation157_spill] sm:$0xff] %v13428_v5  ;;  %10081 = vmatpush3.bf16.msra.mxu1 %v12862_v18  ;;  %v2444_v39 = vand.u32 4294901760, %v2443_v49  ;;  %v2451_v10 = vand.u32 4294901760, %v2450_v43  ;;  %v16090_v4 = vand.u32 4294901760, %v13380_v52  ;;  %v16091_v30 = vand.u32 4294901760, %v13384_v48 }
 0x10a   : > { %16088 = vst [vmem:[#allocation158_spill] sm:$0xff] %v13433_v38  ;;  %16089 = vst [vmem:[#allocation159_spill] sm:$0xff] %v13435_v60  ;;  %10115 = vmatprep.subr.bf16.mxu1 %v13278_v12  ;;  %v15614_v49 = vand.u32 4294901760, %v13416_v61  ;;  %v13469_v12 = vsub.f32 %v13358_v21, %v2316_v56  ;;  %v13472_v18 = vsub.f32 %v13363_v33, %v2319_v53  ;;  %v2379_v43 = vand.u32 4294901760, %v13456_v59  ;;  %v13489_v21 = vld [vmem:[%s15365_s3 + $0x270] sm:$0xff]  ;;  %v13494_v33 = vld [vmem:[%s15365_s3 + $0x278] sm:$0xff] }
 0x10b   : > { %v2569_v26 = vsub.f32 %v13380_v52, %v16090_v4  ;;  %10093 = vmatpush3.bf16.msra.mxu0 %v13235_v15  ;;  %v2576_v40 = vsub.f32 %v13384_v48, %v16091_v30  ;;  %v13474_v15 = vand.u32 4294901760, %v417_v23  ;;  %v13477_v30 = vpack.c.bf16 %v2563_v8, %v2556_v36 }
 0x10c   : > { %2280 = vmatmul.mubr.f32.vlgmr.msra.gmra.mrb[10].mxu1 %v12739_v45  ;;  %10095 = vmatprep.subr.bf16.mxu0 %v13240_v22  ;;  %v2325_v4 = vand.u32 4294901760, %v13445_v27  ;;  %v2376_v45 = vand.u32 4294901760, %v13451_v57  ;;  %v13484_v56 = vpack.c.bf16 %v2451_v10, %v2444_v39  ;;  %v13497_v36 = vsub.f32 %v13372_v55, %v2370_v50 }
 0x10d   : > { %10117 = vmatpush3.bf16.msra.mxu1 %v13318_v37  ;;  %16092 = vst [vmem:[#allocation160_spill] sm:$0xff] %v13477_v30  ;;  %2622 = vmatprep.mubr.f32.mxu1 %v13190_v7  ;;  %v2570_v53 = vand.u32 4294901760, %v2569_v26  ;;  %v13500_v8 = vsub.f32 %v13377_v0, %v2373_v41  ;;  %v2577_v39 = vand.u32 4294901760, %v2576_v40  ;;  %v2457_v10 = vsub.f32 %v13416_v61, %v15614_v49 }
 0x10e   : > { %10119 = vmatprep.subr.bf16.mxu1 %v13339_v3  ;;  %16093 = vst [vmem:[#allocation161_spill] sm:$0xff] %v13484_v56  ;;  %v16094_v26 = vand.u32 4294901760, %v13419_v42  ;;  %v16095_v3 = vand.u32 4294901760, %v13421_v1  ;;  %v16096_v0 = vand.u32 4294901760, %v13430_v17  ;;  %v13519_v40 = vsub.f32 %v417_v23, %v13474_v15 }
 0x10f   : > { %10097 = vmatpush3.bf16.msra.mxu0 %v13320_v44  ;;  %v2331_v49 = vand.u32 4294901760, %v13494_v33  ;;  %v13536_v50 = vsub.f32 %v13451_v57, %v2376_v45  ;;  %v16099_v41 = vand.u32 4294901760, %v13469_v12  ;;  %v16100_v57 = vand.u32 4294901760, %v13472_v18 }
 0x110   : > { %v2464_v16 = vsub.f32 %v13419_v42, %v16094_v26  ;;  %v2583_v37 = vsub.f32 %v13421_v1, %v16095_v3  ;;  %10099 = vmatprep.subr.bf16.mxu0 %v13327_v24  ;;  %v2590_v55 = vsub.f32 %v13430_v17, %v16096_v0  ;;  %v2328_v26 = vand.u32 4294901760, %v13489_v21 }
 0x111   : > { %10121 = vmatpush3.bf16.msra.mxu1 %v13399_v54  ;;  %v16097_v3 = vand.u32 4294901760, %v13413_v32  ;;  %v13530_v0 = vsub.f32 %v13445_v27, %v2325_v4  ;;  %v13539_v54 = vsub.f32 %v13456_v59, %v2379_v43  ;;  %v13542_v24 = vpack.c.bf16 %v2577_v39, %v2570_v53 }
 0x112   : > { %10123 = vmatprep.subr.bf16.mxu1 %v13424_v47  ;;  %v2465_v44 = vand.u32 4294901760, %v2464_v16  ;;  %v2584_v27 = vand.u32 4294901760, %v2583_v37  ;;  %v2591_v47 = vand.u32 4294901760, %v2590_v55  ;;  %v2471_v23 = vsub.f32 %v13469_v12, %v16099_v41 }
 0x113   : > { %v13527_v7 = vsub.f32 %v13413_v32, %v16097_v3  ;;  %10101 = vmatpush3.bf16.msra.mxu0 %v13351_v34  ;;  %16098 = vst [vmem:[#allocation162_spill] sm:$0xff] %v13542_v24  ;;  %v2458_v3 = vand.u32 4294901760, %v2457_v10  ;;  %v2478_v22 = vsub.f32 %v13472_v18, %v16100_v57  ;;  %v13556_v37 = vsub.f32 %v13489_v21, %v2328_v26 }
 0x114   : > { %10103 = vmatprep.subr.bf16.mxu0 %v13426_v58  ;;  %v13559_v39 = vsub.f32 %v13494_v33, %v2331_v49  ;;  %v16101_v10 = vand.u32 4294901760, %v13497_v36  ;;  %v16102_v41 = vand.u32 4294901760, %v13500_v8  ;;  %v16103_v21 = vand.u32 4294901760, %v13413_v32 }
 0x115   : > { %10125 = vmatpush3.bf16.msra.mxu1 %v13433_v38  ;;  %v13575_v59 = vpack.c.bf16 %v2465_v44, %v2458_v3  ;;  %v2472_v38 = vand.u32 4294901760, %v2471_v23  ;;  %v16108_v53 = vand.u32 4294901760, %v13519_v40  ;;  %v16109_v32 = vand.u32 4294901760, %v13527_v7 }
 0x116   : > { %10127 = vmatprep.subr.bf16.mxu1 %v13477_v30  ;;  %v2597_v55 = vsub.f32 %v13497_v36, %v16101_v10  ;;  %v2604_v57 = vsub.f32 %v13500_v8, %v16102_v41  ;;  %v13573_v33 = vpack.c.bf16 %v2325_v4, %v16103_v21  ;;  %v13577_v30 = vpack.c.bf16 %v2379_v43, %v2376_v45 }
 0x117   : > { %10105 = vmatpush3.bf16.msra.mxu0 %v13428_v5  ;;  %16105 = vst [vmem:[#allocation164_spill] sm:$0xff] %v13575_v59  ;;  %v13580_v10 = vpack.c.bf16 %v2591_v47, %v2584_v27  ;;  %v2479_v41 = vand.u32 4294901760, %v2478_v22  ;;  %v2390_v16 = vsub.f32 %v13519_v40, %v16108_v53  ;;  %v2485_v4 = vsub.f32 %v13527_v7, %v16109_v32 }
 0x118   : > { %16104 = vst [vmem:[#allocation163_spill] sm:$0xff] %v13573_v33  ;;  %16106 = vst [vmem:[#allocation165_spill] sm:$0xff] %v13577_v30  ;;  %10107 = vmatprep.subr.bf16.mxu0 %v13435_v60  ;;  %v16110_v44 = vand.u32 4294901760, %v13530_v0  ;;  %v15629_v45 = vand.u32 4294901760, %v13556_v37  ;;  %v15628_v47 = vand.u32 4294901760, %v13559_v39  ;;  %v2598_v22 = vand.u32 4294901760, %v2597_v55 }
 0x119   : > { %16107 = vst [vmem:[#allocation166_spill] sm:$0xff] %v13580_v10  ;;  %10129 = vmatpush3.bf16.msra.mxu1 %v13484_v56  ;;  %v2605_v23 = vand.u32 4294901760, %v2604_v57  ;;  %v16111_v3 = vand.u32 4294901760, %v13536_v50  ;;  %v16112_v53 = vand.u32 4294901760, %v13539_v54  ;;  %v13602_v32 = vpack.c.bf16 %v2331_v49, %v2328_v26 }
 0x11a   : > { %v2492_v43 = vsub.f32 %v13530_v0, %v16110_v44  ;;  %10131 = vmatprep.subr.bf16.mxu1 %v13542_v24  ;;  %v13605_v44 = vpack.c.bf16 %v2479_v41, %v2472_v38  ;;  %v13609_v55 = vpack.c.bf16 %v13079_v25, %v13074_v31  ;;  %v2486_v57 = vand.u32 4294901760, %v2485_v4 }
 0x11b   : > { %v2611_v27 = vsub.f32 %v13536_v50, %v16111_v3  ;;  %v2618_v21 = vsub.f32 %v13539_v54, %v16112_v53  ;;  %10109 = vmatpush3.bf16.msra.mxu0 %v13573_v33  ;;  %16113 = vst [vmem:[#allocation167_spill] sm:$0xff] %v13602_v32  ;;  %v2499_v53 = vsub.f32 %v13556_v37, %v15629_v45  ;;  %v2391_v38 = vand.u32 4294901760, %v2390_v16  ;;  %v16132_v45 = vld [vmem:[#allocation142_spill] sm:$0xff] }
 0x11c   : > { %10111 = vmatprep.subr.bf16.mxu0 %v13577_v30  ;;  %16114 = vst [vmem:[#allocation168_spill] sm:$0xff] %v13605_v44  ;;  %16115 = vst [vmem:[#allocation169_spill] sm:$0xff] %v13609_v55  ;;  %v2493_v3 = vand.u32 4294901760, %v2492_v43  ;;  %v2506_v49 = vsub.f32 %v13559_v39, %v15628_v47  ;;  %v13619_v26 = vpack.c.bf16 %v2605_v23, %v2598_v22 }
 0x11d   : > { %10133 = vmatpush3.bf16.msra.mxu1 %v13575_v59  ;;  %v2612_v41 = vand.u32 4294901760, %v2611_v27  ;;  %v2619_v24 = vand.u32 4294901760, %v2618_v21  ;;  %v13624_v4 = vpack.c.bf16 %v13165_v35, %v13146_v29  ;;  %v13629_v43 = vpack.c.bf16 %v13188_v51, %v13168_v46 }
 0x11e   : > { %10135 = vmatprep.subr.bf16.mxu1 %v13580_v10  ;;  %16116 = vst [vmem:[#allocation170_spill] sm:$0xff] %v13619_v26  ;;  %v13632_v47 = vpack.c.bf16 %v2493_v3, %v2486_v57  ;;  %v2500_v16 = vand.u32 4294901760, %v2499_v53  ;;  %v2507_v22 = vand.u32 4294901760, %v2506_v49  ;;  %v13640_v27 = vpack.c.bf16 %v13226_v14, %v13224_v19  ;;  %v16127_v49 = vld [vmem:[#allocation140_spill] sm:$0xff]  ;;  %v16139_v10 = vld [vmem:[#allocation146_spill] sm:$0xff] }
 0x11f   : > { %10113 = vmatpush3.bf16.msra.mxu0 %v13602_v32  ;;  %16117 = vst [vmem:[#allocation171_spill] sm:$0xff] %v13624_v4  ;;  %16118 = vst [vmem:[#allocation172_spill] sm:$0xff] %v13629_v43  ;;  %v13635_v23 = vpack.c.bf16 %v2619_v24, %v2612_v41  ;;  %v13646_v21 = vpack.c.bf16 %v13267_v2, %v13265_v62  ;;  %v16124_v24 = vld [vmem:[#allocation147_spill] sm:$0xff]  ;;  %v13660_v53 = vpack.c.bf16 %v13315_v63, %v13312_v13 }
 0x120   : > { %10147 = vmatprep.subr.bf16.mxu0 %v13609_v55  ;;  %16119 = vst [vmem:[#allocation173_spill] sm:$0xff] %v13632_v47  ;;  %16121 = vst [vmem:[#allocation175_spill] sm:$0xff] %v13640_v27  ;;  %v13649_v57 = vpack.c.bf16 %v2507_v22, %v2500_v16  ;;  %v13655_v3 = vpack.c.bf16 %v16124_v24, %v13273_v6  ;;  %v13673_v41 = vpack.c.bf16 %v13384_v48, %v13380_v52  ;;  %v16130_v16 = vld [vmem:[#allocation141_spill] sm:$0xff] }
 0x121   : > { %10137 = vmatpush3.bf16.msra.mxu1 %v13605_v44  ;;  %16120 = vst [vmem:[#allocation174_spill] sm:$0xff] %v13635_v23  ;;  %16122 = vst [vmem:[#allocation176_spill] sm:$0xff] %v13646_v21  ;;  %v16131_v22 = vand.u32 4294901760, %v13217_v11  ;;  %v13706_v56 = vpack.c.bf16 %v13530_v0, %v13527_v7 }
 0x122   : > { %2392 = vmatmul.mubr.f32.vlgmr.msra.gmra.mrb[12].mxu0 %v2391_v38  ;;  %10139 = vmatprep.subr.bf16.mxu1 %v13619_v26  ;;  %16123 = vst [vmem:[#allocation177_spill] sm:$0xff] %v13649_v57  ;;  %16125 = vst [vmem:[#allocation147_spill] sm:$0xff] %v13655_v3  ;;  %v13667_v38 = vpack.c.bf16 %v13324_v20, %v13322_v28  ;;  %v16138_v26 = vld [vmem:[#allocation145_spill] sm:$0xff] }
 0x123   : > { %10149 = vmatpush3.bf16.msra.mxu0 %v13624_v4  ;;  %2759 = vmatprep.mubr.f32.mxu0 %v13217_v11  ;;  %16126 = vst [vmem:[#allocation178_spill] sm:$0xff] %v13660_v53  ;;  %16129 = vst [vmem:[#allocation180_spill] sm:$0xff] %v13673_v41  ;;  %v13694_v11 = vpack.c.bf16 %v13472_v18, %v13469_v12 }
 0x124   : > { %10151 = vmatprep.subr.bf16.mxu0 %v13629_v43  ;;  %16128 = vst [vmem:[#allocation179_spill] sm:$0xff] %v13667_v38  ;;  %16140 = vst [vmem:[#allocation185_spill] sm:$0xff] %v13706_v56 }
 0x125   : > { %10141 = vmatpush3.bf16.msra.mxu1 %v13632_v47  ;;  %v16135_v47 = vld [vmem:[#allocation143_spill] sm:$0xff]  ;;  %16136 = vst [vmem:[#allocation183_spill] sm:$0xff] %v13694_v11 }
 0x126   : > { %10143 = vmatprep.subr.bf16.mxu1 %v13635_v23  ;;  %v13687_v23 = vpack.c.bf16 %v13430_v17, %v13421_v1 }
 0x127   : > { %10153 = vmatpush3.bf16.msra.mxu0 %v13640_v27 }
 0x128   : > { %10155 = vmatprep.subr.bf16.mxu0 %v13646_v21  ;;  %16134 = vst [vmem:[#allocation182_spill] sm:$0xff] %v13687_v23 }
 0x129   : > { %10145 = vmatpush3.bf16.msra.mxu1 %v13649_v57  ;;  %v13682_v57 = vpack.c.bf16 %v13419_v42, %v13416_v61 }
 0x12a   : > { %10179 = vmatprep.subr.bf16.mxu1 %v16127_v49 }
 0x12b   : > { %10157 = vmatpush3.bf16.msra.mxu0 %v13655_v3  ;;  %16133 = vst [vmem:[#allocation181_spill] sm:$0xff] %v13682_v57  ;;  %v16149_v3 = vand.u32 4294901760, %v13165_v35 }
 0x12c   : > { %2624 = vmatmul.mubr.f32.vlgmr.msra.gmra.mrb[12].mxu1 %v13474_v15  ;;  %10159 = vmatprep.subr.bf16.mxu0 %v13660_v53 }
 0x12d   : > { %10181 = vmatpush3.bf16.msra.mxu1 %v16130_v16  ;;  %2866 = vmatprep.mubr.f32.mxu1 %v16131_v22  ;;  %v13699_v22 = vpack.c.bf16 %v13500_v8, %v13497_v36 }
 0x12e   : > { %10183 = vmatprep.subr.bf16.mxu1 %v16132_v45 }
 0x12f   : > { %10161 = vmatpush3.bf16.msra.mxu0 %v13667_v38  ;;  %16137 = vst [vmem:[#allocation184_spill] sm:$0xff] %v13699_v22  ;;  %v16143_v38 = vld [vmem:[#allocation151_spill] sm:$0xff] }
 0x130   : > { %10163 = vmatprep.subr.bf16.mxu0 %v13673_v41  ;;  %v16142_v41 = vld [vmem:[#allocation150_spill] sm:$0xff] }
 0x131   : > { %10185 = vmatpush3.bf16.msra.mxu1 %v16135_v47 }
 0x132   : > { %10187 = vmatprep.subr.bf16.mxu1 %v13229_v9 }
 0x133   : > { %10165 = vmatpush3.bf16.msra.mxu0 %v13682_v57 }
 0x134   : > { %10167 = vmatprep.subr.bf16.mxu0 %v13687_v23  ;;  %v8036_v44 = vpop.f32.mrb[0].mxu0  ;;  %v13711_v23 = vpack.c.bf16 %v13539_v54, %v13536_v50 }
 0x135   : > { %10189 = vmatpush3.bf16.msra.mxu1 %v16138_v26  ;;  %v8037_v59 = vpop.f32.mrb[1].mxu0 }
 0x136   : > { %10191 = vmatprep.subr.bf16.mxu1 %v16139_v10  ;;  %v8038_v57 = vadd.f32 %v8037_v59, %v8036_v44  ;;  %16141 = vst [vmem:[#allocation186_spill] sm:$0xff] %v13711_v23  ;;  %v16145_v59 = vand.u32 4294901760, %v13074_v31  ;;  %v16146_v44 = vand.u32 4294901760, %v13079_v25  ;;  %v13739_v31 = vld [vmem:[%s15365_s3 + $0x380] sm:$0xff]  ;;  %v13744_v25 = vld [vmem:[%s15365_s3 + $0x388] sm:$0xff] }
 0x137   : > { %10169 = vmatpush3.bf16.msra.mxu0 %v13694_v11  ;;  %v13718_v11 = vpack.c.bf16 %v13559_v39, %v13556_v37  ;;  %v16204_v27 = vand.u32 4294901760, %v13744_v25 }
 0x138   : > { %10171 = vmatprep.subr.bf16.mxu0 %v13699_v22  ;;  %v13725_v22 = vpack.c.bf16 %v16146_v44, %v16145_v59  ;;  %v16151_v44 = vand.u32 4294901760, %v13168_v46  ;;  %v16158_v46 = vand.u32 4294901760, %v13265_v62  ;;  %v16164_v62 = vand.u32 4294901760, %v16124_v24 }
 0x139   : > { %10193 = vmatpush3.bf16.msra.mxu1 %v16142_v41  ;;  %16144 = vst [vmem:[#allocation187_spill] sm:$0xff] %v13718_v11 }
 0x13a   : > { %10195 = vmatprep.subr.bf16.mxu1 %v16143_v38  ;;  %16147 = vst [vmem:[#allocation188_spill] sm:$0xff] %v13725_v22 }
 0x13b   : > { %10173 = vmatpush3.bf16.msra.mxu0 %v13706_v56  ;;  %v16148_v56 = vand.u32 4294901760, %v13146_v29  ;;  %v16152_v29 = vand.u32 4294901760, %v13188_v51  ;;  %v16159_v51 = vand.u32 4294901760, %v13267_v2  ;;  %v16163_v2 = vand.u32 4294901760, %v13273_v6  ;;  %v13824_v6 = vld [vmem:[%s15365_s3 + $0x398] sm:$0xff] }
 0x13c   : > { %10175 = vmatprep.subr.bf16.mxu0 %v13711_v23 }
 0x13d   : > { %10197 = vmatpush3.bf16.msra.mxu1 %v13351_v34  ;;  %v13734_v21 = vpack.c.bf16 %v16149_v3, %v16148_v56  ;;  %v13751_v35 = vpack.c.bf16 %v16152_v29, %v16151_v44  ;;  %v13756_v56 = vld [vmem:[%s15365_s3 + $0x300] sm:$0xff] }
 0x13e   : > { %10199 = vmatprep.subr.bf16.mxu1 %v13426_v58  ;;  %v3148_v23 = vand.u32 4294901760, %v13756_v56 }
 0x13f   : > { %v8071_v53 = vpop.f32.mrb[0].mxu1  ;;  %10177 = vmatpush3.bf16.msra.mxu0 %v13718_v11  ;;  %16150 = vst [vmem:[#allocation189_spill] sm:$0xff] %v13734_v21  ;;  %16153 = vst [vmem:[#allocation190_spill] sm:$0xff] %v13751_v35  ;;  %v13762_v11 = vld [vmem:[%s15365_s3 + $0x308] sm:$0xff] }
 0x140   : > { %v8072_v59 = vpop.f32.mrb[1].mxu1  ;;  %10211 = vmatprep.subr.bf16.mxu0 %v13725_v22  ;;  %v16157_v22 = vld [vmem:[#allocation139_spill] sm:$0xff] }
 0x141   : > { %v8073_v3 = vadd.f32 %v8072_v59, %v8071_v53  ;;  %10201 = vmatpush3.bf16.msra.mxu1 %v13428_v5  ;;  %v16154_v53 = vand.u32 4294901760, %v13224_v19  ;;  %v16155_v59 = vand.u32 4294901760, %v13226_v14  ;;  %v16161_v19 = vand.u32 4294901760, %v13739_v31 }
 0x142   : > { %2762 = vmatmul.mubr.f32.vlgmr.msra.gmra.mrb[14].mxu0 %v13519_v40  ;;  %10203 = vmatprep.subr.bf16.mxu1 %v13435_v60 }
 0x143   : > { %v13768_v44 = vadd.f32 %v8073_v3, %v8038_v57  ;;  %10213 = vmatpush3.bf16.msra.mxu0 %v13734_v21  ;;  %v13775_v29 = vpack.c.bf16 %v16155_v59, %v16154_v53  ;;  %3036 = vmatprep.mubr.f32.mxu0 %v16157_v22  ;;  %v13784_v57 = vpack.c.bf16 %v16159_v51, %v16158_v46  ;;  %v3151_v3 = vand.u32 4294901760, %v13762_v11  ;;  %v13809_v51 = vld [vmem:[%s15365_s3 + $0x390] sm:$0xff] }
 0x144   : > { %10215 = vmatprep.subr.bf16.mxu0 %v13751_v35  ;;  %v13792_v14 = vsub.f32 %v13739_v31, %v16161_v19  ;;  %v16162_v53 = vand.u32 4294901760, %v13744_v25  ;;  %v13804_v46 = vpack.c.bf16 %v16164_v62, %v16163_v2  ;;  %v13812_v19 = vsub.f32 %v13756_v56, %v3148_v23  ;;  %v13833_v56 = vld [vmem:[%s15365_s3 + $0x310] sm:$0xff] }
 0x145   : > { %16156 = vst [vmem:[#allocation191_spill] sm:$0xff] %v13775_v29  ;;  %16160 = vst [vmem:[#allocation139_spill] sm:$0xff] %v13784_v57  ;;  %10205 = vmatpush3.bf16.msra.mxu1 %v13573_v33  ;;  %v13827_v24 = vsub.f32 %v13762_v11, %v3151_v3  ;;  %v16169_v2 = vand.u32 4294901760, %v13322_v28  ;;  %v16170_v62 = vand.u32 4294901760, %v13324_v20  ;;  %v16172_v21 = vand.u32 4294901760, %v13519_v40  ;;  %v420_v40 = vld [vmem:[%s11999_s24 + $0x38] sm:$0xff] }
 0x146   : > { %10207 = vmatprep.subr.bf16.mxu1 %v13577_v30  ;;  %v13797_v59 = vsub.f32 %v13744_v25, %v16162_v53  ;;  %16165 = vst [vmem:[#allocation192_spill] sm:$0xff] %v13804_v46  ;;  %v16166_v53 = vand.u32 4294901760, %v13312_v13  ;;  %v13840_v13 = vld [vmem:[%s15365_s3 + $0x318] sm:$0xff]  ;;  %v16173_v11 = vand.u32 4294901760, %v13380_v52  ;;  %v16176_v28 = vand.u32 4294901760, %v13416_v61 }
 0x147   : > { %10217 = vmatpush3.bf16.msra.mxu0 %v13775_v29  ;;  %v16167_v29 = vand.u32 4294901760, %v13315_v63  ;;  %v16177_v20 = vand.u32 4294901760, %v13419_v42  ;;  %v16180_v52 = vand.u32 4294901760, %v13430_v17  ;;  %v16183_v61 = vand.u32 4294901760, %v13472_v18 }
 0x148   : > { %10219 = vmatprep.subr.bf16.mxu0 %v13784_v57  ;;  %v3205_v57 = vand.u32 4294901760, %v13824_v6  ;;  %v3157_v63 = vand.u32 4294901760, %v13840_v13  ;;  %v16188_v18 = vand.u32 4294901760, %v13527_v7  ;;  %v16189_v17 = vand.u32 4294901760, %v13530_v0 }
 0x149   : > { %v13819_v35 = vpack.c.bf16 %v16167_v29, %v16166_v53  ;;  %10209 = vmatpush3.bf16.msra.mxu1 %v13602_v32  ;;  %v13849_v53 = vpack.c.bf16 %v16170_v62, %v16169_v2  ;;  %v16174_v29 = vand.u32 4294901760, %v13384_v48  ;;  %v13866_v2 = vpack.c.bf16 %v16177_v20, %v16176_v28 }
 0x14a   : > { %10243 = vmatprep.subr.bf16.mxu1 %v16127_v49  ;;  %v3154_v62 = vand.u32 4294901760, %v13833_v56  ;;  %v16186_v28 = vand.u32 4294901760, %v13500_v8  ;;  %v16191_v8 = vand.u32 4294901760, %v13792_v14  ;;  %v16194_v7 = vand.u32 4294901760, %v13536_v50 }
 0x14b   : > { %16168 = vst [vmem:[#allocation193_spill] sm:$0xff] %v13819_v35  ;;  %10221 = vmatpush3.bf16.msra.mxu0 %v13804_v46  ;;  %16171 = vst [vmem:[#allocation194_spill] sm:$0xff] %v13849_v53  ;;  %v13860_v46 = vpack.c.bf16 %v16174_v29, %v16173_v11  ;;  %v16182_v11 = vand.u32 4294901760, %v13469_v12  ;;  %v16185_v29 = vand.u32 4294901760, %v13497_v36  ;;  %v546_v12 = vld [vmem:[%s15365_s3 + $0x3a8] sm:$0xff]  ;;  %v13903_v36 = vpack.c.bf16 %v16189_v17, %v16188_v18 }
 0x14c   : > { %2870 = vmatmul.mubr.f32.vlgmr.msra.gmra.mrb[14].mxu1 %v16172_v21  ;;  %10223 = vmatprep.subr.bf16.mxu0 %v13819_v35  ;;  %16178 = vst [vmem:[#allocation196_spill] sm:$0xff] %v13866_v2  ;;  %v16179_v21 = vand.u32 4294901760, %v13421_v1  ;;  %v545_v1 = vld [vmem:[%s15365_s3 + $0x3a0] sm:$0xff]  ;;  %v16195_v0 = vand.u32 4294901760, %v13539_v54  ;;  %v16197_v18 = vand.u32 4294901760, %v13812_v19  ;;  %v530_v54 = vld [vmem:[%s15365_s3 + $0x328] sm:$0xff]  ;;  %v13957_v4 = vpack.c.bf16 %v3151_v3, %v3148_v23 }
 0x14d   : > { %16175 = vst [vmem:[#allocation195_spill] sm:$0xff] %v13860_v46  ;;  %10245 = vmatpush3.bf16.msra.mxu1 %v16130_v16  ;;  %v13882_v42 = vpack.c.bf16 %v16183_v61, %v16182_v11  ;;  %v13888_v20 = vpack.c.bf16 %v16186_v28, %v16185_v29  ;;  %3140 = vmatprep.mubr.f32.mxu1 %v16157_v22  ;;  %16190 = vst [vmem:[#allocation200_spill] sm:$0xff] %v13903_v36  ;;  %v16193_v11 = vand.u32 4294901760, %v13809_v51  ;;  %v529_v28 = vld [vmem:[%s15365_s3 + $0x320] sm:$0xff]  ;;  %v548_v23 = vld [vmem:[%s15365_s3 + $0x3b8] sm:$0xff] }
 0x14e   : > { %v13876_v48 = vpack.c.bf16 %v16180_v52, %v16179_v21  ;;  %10247 = vmatprep.subr.bf16.mxu1 %v16132_v45  ;;  %v3375_v22 = vsub.f32 %v13792_v14, %v16191_v8  ;;  %v16192_v21 = vand.u32 4294901760, %v13797_v59  ;;  %v13921_v29 = vpack.c.bf16 %v16195_v0, %v16194_v7  ;;  %16206 = vst [vmem:[#allocation205_spill] sm:$0xff] %v13957_v4 }
 0x14f   : > { %16184 = vst [vmem:[#allocation198_spill] sm:$0xff] %v13882_v42  ;;  %16187 = vst [vmem:[#allocation199_spill] sm:$0xff] %v13888_v20  ;;  %v13914_v61 = vsub.f32 %v13809_v51, %v16193_v11  ;;  %10225 = vmatpush3.bf16.msra.mxu0 %v13849_v53  ;;  %v3263_v17 = vsub.f32 %v13812_v19, %v16197_v18  ;;  %v13930_v8 = vsub.f32 %v13824_v6, %v3205_v57 }
 0x150   : > { %16181 = vst [vmem:[#allocation197_spill] sm:$0xff] %v13876_v48  ;;  %v3382_v52 = vsub.f32 %v13797_v59, %v16192_v21  ;;  %16196 = vst [vmem:[#allocation201_spill] sm:$0xff] %v13921_v29  ;;  %v13932_v21 = vand.u32 4294901760, %v420_v40  ;;  %10227 = vmatprep.subr.bf16.mxu0 %v13860_v46  ;;  %v3208_v50 = vand.u32 4294901760, %v545_v1  ;;  %v3211_v11 = vand.u32 4294901760, %v546_v12 }
 0x151   : > { %v16199_v7 = vand.u32 4294901760, %v13827_v24  ;;  %v13942_v53 = vsub.f32 %v13833_v56, %v3154_v62  ;;  %10249 = vmatpush3.bf16.msra.mxu1 %v16135_v47  ;;  %v16200_v6 = vand.u32 4294901760, %v13556_v37  ;;  %v16201_v18 = vand.u32 4294901760, %v13559_v39 }
 0x152   : > { %16198 = vst [vmem:[#allocation202_spill] sm:$0xff] %v13932_v21  ;;  %v16203_v35 = vand.u32 4294901760, %v13739_v31  ;;  %10251 = vmatprep.subr.bf16.mxu1 %v13229_v9  ;;  %v3376_v56 = vand.u32 4294901760, %v3375_v22  ;;  %v3383_v55 = vand.u32 4294901760, %v3382_v52  ;;  %v3160_v37 = vand.u32 4294901760, %v529_v28 }
 0x153   : > { %v3270_v0 = vsub.f32 %v13827_v24, %v16199_v7  ;;  %v13949_v46 = vpack.c.bf16 %v16201_v18, %v16200_v6  ;;  %v13960_v7 = vsub.f32 %v13840_v13, %v3157_v63  ;;  %10229 = vmatpush3.bf16.msra.mxu0 %v13866_v2  ;;  %v3163_v6 = vand.u32 4294901760, %v530_v54 }
 0x154   : > { %v13955_v43 = vpack.c.bf16 %v16204_v27, %v16203_v35  ;;  %v3264_v31 = vand.u32 4294901760, %v3263_v17  ;;  %v547_v27 = vld [vmem:[%s15365_s3 + $0x3b0] sm:$0xff]  ;;  %v13973_v35 = vsub.f32 %v420_v40, %v13932_v21  ;;  %10231 = vmatprep.subr.bf16.mxu0 %v13876_v48  ;;  %v13977_v22 = vsub.f32 %v545_v1, %v3208_v50 }
 0x155   : > { %16202 = vst [vmem:[#allocation203_spill] sm:$0xff] %v13949_v46  ;;  %v3271_v3 = vand.u32 4294901760, %v3270_v0  ;;  %v13979_v52 = vsub.f32 %v546_v12, %v3211_v11  ;;  %10253 = vmatpush3.bf16.msra.mxu1 %v16138_v26  ;;  %v8106_v17 = vpop.f32.mrb[2].mxu0  ;;  %v16207_v18 = vand.u32 4294901760, %v13809_v51  ;;  %v13986_v25 = vpack.c.bf16 %v3157_v63, %v3154_v62 }
 0x156   : > { %16205 = vst [vmem:[#allocation204_spill] sm:$0xff] %v13955_v43  ;;  %v13988_v40 = vpack.c.bf16 %v3211_v11, %v3208_v50  ;;  %v15671_v48 = vand.u32 4294901760, %v13960_v7  ;;  %v8107_v0 = vpop.f32.mrb[3].mxu0  ;;  %10255 = vmatprep.subr.bf16.mxu1 %v16139_v10  ;;  %v13992_v1 = vpack.c.bf16 %v3383_v55, %v3376_v56  ;;  %v3214_v12 = vand.u32 4294901760, %v547_v27  ;;  %v531_v55 = vld [vmem:[%s15365_s3 + $0x330] sm:$0xff]  ;;  %v532_v50 = vld [vmem:[%s15365_s3 + $0x338] sm:$0xff] }
 0x157   : > { %v13984_v39 = vpack.c.bf16 %v3205_v57, %v16207_v18  ;;  %v3217_v13 = vand.u32 4294901760, %v548_v23  ;;  %v16211_v2 = vand.u32 4294901760, %v13914_v61  ;;  %v8108_v51 = vadd.f32 %v8107_v0, %v8106_v17  ;;  %10233 = vmatpush3.bf16.msra.mxu0 %v13882_v42  ;;  %v549_v18 = vld [vmem:[%s15365_s3 + $0x3c0] sm:$0xff]  ;;  %v14022_v0 = vld [vmem:[%s15365_s3 + $0x3c8] sm:$0xff] }
 0x158   : > { %16209 = vst [vmem:[#allocation207_spill] sm:$0xff] %v13988_v40  ;;  %16210 = vst [vmem:[#allocation208_spill] sm:$0xff] %v13992_v1  ;;  %v13998_v57 = vpack.c.bf16 %v3163_v6, %v3160_v37  ;;  %v16213_v63 = vand.u32 4294901760, %v13930_v8  ;;  %10235 = vmatprep.subr.bf16.mxu0 %v13888_v20  ;;  %v16215_v56 = vand.u32 4294901760, %v13942_v53  ;;  %v14033_v20 = vsub.f32 %v530_v54, %v3163_v6  ;;  %v14048_v54 = vld [vmem:[%s15365_s3 + $0x348] sm:$0xff] }
 0x159   : > { %16208 = vst [vmem:[#allocation206_spill] sm:$0xff] %v13984_v39  ;;  %v3389_v26 = vsub.f32 %v13914_v61, %v16211_v2  ;;  %v14011_v2 = vpack.c.bf16 %v3271_v3, %v3264_v31  ;;  %v1040_v31 = vadd.f32 %v8108_v51, %v13768_v44  ;;  %10257 = vmatpush3.bf16.msra.mxu1 %v16142_v41  ;;  %v3169_v9 = vand.u32 4294901760, %v532_v50 }
 0x15a   : > { %16212 = vst [vmem:[#allocation209_spill] sm:$0xff] %v13998_v57  ;;  %v3396_v62 = vsub.f32 %v13930_v8, %v16213_v63  ;;  %v3277_v17 = vsub.f32 %v13942_v53, %v16215_v56  ;;  %v3284_v3 = vsub.f32 %v13960_v7, %v15671_v48  ;;  %v14031_v56 = vsub.f32 %v529_v28, %v3160_v37  ;;  %v14043_v28 = vld [vmem:[%s15365_s3 + $0x340] sm:$0xff] }
 0x15b   : > { %16214 = vst [vmem:[#allocation210_spill] sm:$0xff] %v14011_v2  ;;  %10259 = vmatprep.subr.bf16.mxu1 %v16143_v38  ;;  %v14036_v42 = vpack.c.bf16 %v3217_v13, %v3214_v12  ;;  %v3390_v10 = vand.u32 4294901760, %v3389_v26  ;;  %v3166_v63 = vand.u32 4294901760, %v531_v55  ;;  %10237 = vmatpush3.bf16.msra.mxu0 %v13903_v36  ;;  %v3220_v51 = vand.u32 4294901760, %v549_v18 }
 0x15c   : > { %v3397_v44 = vand.u32 4294901760, %v3396_v62  ;;  %v16217_v26 = vand.u32 4294901760, %v13973_v35  ;;  %10239 = vmatprep.subr.bf16.mxu0 %v13921_v29  ;;  %v16218_v6 = vand.u32 4294901760, %v13977_v22  ;;  %v16219_v48 = vand.u32 4294901760, %v13979_v52 }
 0x15d   : > { %16216 = vst [vmem:[#allocation211_spill] sm:$0xff] %v14036_v42  ;;  %v14060_v36 = vsub.f32 %v547_v27, %v3214_v12  ;;  %v14062_v38 = vsub.f32 %v548_v23, %v3217_v13  ;;  %10261 = vmatpush3.bf16.msra.mxu1 %v13351_v34  ;;  %v3278_v41 = vand.u32 4294901760, %v3277_v17  ;;  %v3285_v47 = vand.u32 4294901760, %v3284_v3  ;;  %v551_v3 = vld [vmem:[%s15365_s3 + $0x3d0] sm:$0xff] }
 0x15e   : > { %v3246_v37 = vsub.f32 %v13973_v35, %v16217_v26  ;;  %v3403_v62 = vsub.f32 %v13977_v22, %v16218_v6  ;;  %v3410_v11 = vsub.f32 %v13979_v52, %v16219_v48  ;;  %10263 = vmatprep.subr.bf16.mxu1 %v13426_v58  ;;  %v3172_v6 = vand.u32 4294901760, %v14043_v28 }
 0x15f   : > { %16220 = vst [vmem:[#allocation212_spill] sm:$0xff] %v14062_v38  ;;  %v3175_v45 = vand.u32 4294901760, %v14048_v54  ;;  %v14070_v16 = vsub.f32 %v531_v55, %v3166_v63  ;;  %v14072_v48 = vsub.f32 %v532_v50, %v3169_v9  ;;  %v8141_v27 = vpop.f32.mrb[2].mxu1  ;;  %10241 = vmatpush3.bf16.msra.mxu0 %v13949_v46  ;;  %v14075_v23 = vpack.c.bf16 %v3397_v44, %v3390_v10  ;;  %v552_v55 = vld [vmem:[%s15365_s3 + $0x3d8] sm:$0xff] }
 0x160   : > { %v14077_v13 = vpack.c.bf16 %v3169_v9, %v3166_v63  ;;  %v16225_v12 = vand.u32 4294901760, %v14022_v0  ;;  %v3247_v50 = vand.u32 4294901760, %v3246_v37  ;;  %v8142_v29 = vpop.f32.mrb[3].mxu1  ;;  %10275 = vmatprep.subr.bf16.mxu0 %v13955_v43  ;;  %v3404_v10 = vand.u32 4294901760, %v3403_v62  ;;  %v14107_v62 = vld [vmem:[%s15365_s3 + $0x358] sm:$0xff] }
 0x161   : > { %16221 = vst [vmem:[#allocation213_spill] sm:$0xff] %v14070_v16  ;;  %16222 = vst [vmem:[#allocation214_spill] sm:$0xff] %v14072_v48  ;;  %v3411_v44 = vand.u32 4294901760, %v3410_v11  ;;  %v8143_v26 = vadd.f32 %v8142_v29, %v8141_v27  ;;  %10265 = vmatpush3.bf16.msra.mxu1 %v13428_v5  ;;  %v16226_v46 = vand.u32 4294901760, %v14031_v56  ;;  %v16227_v58 = vand.u32 4294901760, %v14033_v20 }
 0x162   : > { %16223 = vst [vmem:[#allocation215_spill] sm:$0xff] %v14075_v23  ;;  %16224 = vst [vmem:[#allocation216_spill] sm:$0xff] %v14077_v13  ;;  %v14081_v17 = vpack.c.bf16 %v16225_v12, %v3220_v51  ;;  %v14095_v12 = vld [vmem:[%s15365_s3 + $0x350] sm:$0xff]  ;;  %v14109_v63 = vsub.f32 %v549_v18, %v3220_v51  ;;  %3038 = vmatmul.mubr.f32.vlgmr.msra.gmra.mrb[16].mxu0 %v13474_v15  ;;  %10267 = vmatprep.subr.bf16.mxu1 %v13435_v60  ;;  %v3226_v5 = vand.u32 4294901760, %v551_v3  ;;  %v14126_v51 = vld [vmem:[%s15365_s3 + $0x3e0] sm:$0xff] }
 0x163   : > { %v3291_v37 = vsub.f32 %v14031_v56, %v16226_v46  ;;  %v3298_v11 = vsub.f32 %v14033_v20, %v16227_v58  ;;  %v14113_v29 = vpack.c.bf16 %v3285_v47, %v3278_v41  ;;  %v14115_v27 = vpack.c.bf16 %v3175_v45, %v3172_v6  ;;  %10277 = vmatpush3.bf16.msra.mxu0 %v13957_v4  ;;  %v14131_v47 = vld [vmem:[%s15365_s3 + $0x3e8] sm:$0xff] }
 0x164   : > { %v14119_v58 = vadd.f32 %v8143_v26, %v1040_v31  ;;  %v3229_v34 = vand.u32 4294901760, %v552_v55  ;;  %v3178_v18 = vand.u32 4294901760, %v14095_v12  ;;  %3248 = vmatprep.mubr.f32.mxu0 %v3247_v50  ;;  %10279 = vmatprep.subr.bf16.mxu0 %v13984_v39  ;;  %v14134_v41 = vpack.c.bf16 %v3411_v44, %v3404_v10  ;;  %v537_v50 = vld [vmem:[%s15365_s3 + $0x360] sm:$0xff] }
 0x165   : > { %16228 = vst [vmem:[#allocation217_spill] sm:$0xff] %v14113_v29  ;;  %16229 = vst [vmem:[#allocation218_spill] sm:$0xff] %v14115_v27  ;;  %v16231_v31 = vand.u32 4294901760, %v14060_v36  ;;  %v16232_v9 = vand.u32 4294901760, %v14062_v38  ;;  %v3181_v60 = vand.u32 4294901760, %v14107_v62  ;;  %10269 = vmatpush3.bf16.msra.mxu1 %v13573_v33  ;;  %v3292_v49 = vand.u32 4294901760, %v3291_v37 }
 0x166   : > { %16230 = vst [vmem:[#allocation219_spill] sm:$0xff] %v14134_v41  ;;  %v3299_v4 = vand.u32 4294901760, %v3298_v11  ;;  %v16233_v39 = vand.u32 4294901760, %v14022_v0  ;;  %10271 = vmatprep.subr.bf16.mxu1 %v13577_v30  ;;  %v16234_v44 = vand.u32 4294901760, %v14070_v16  ;;  %v3232_v37 = vand.u32 4294901760, %v14126_v51 }
 0x167   : > { %v3417_v26 = vsub.f32 %v14060_v36, %v16231_v31  ;;  %v3424_v46 = vsub.f32 %v14062_v38, %v16232_v9  ;;  %v16235_v9 = vand.u32 4294901760, %v14072_v48  ;;  %v3235_v11 = vand.u32 4294901760, %v14131_v47  ;;  %10281 = vmatpush3.bf16.msra.mxu0 %v13986_v25 }
 0x168   : > { %v14148_v10 = vsub.f32 %v14022_v0, %v16233_v39  ;;  %v3305_v31 = vsub.f32 %v14070_v16, %v16234_v44  ;;  %v538_v39 = vld [vmem:[%s15365_s3 + $0x368] sm:$0xff]  ;;  %v14167_v0 = vsub.f32 %v14043_v28, %v3172_v6  ;;  %v14170_v44 = vsub.f32 %v14048_v54, %v3175_v45  ;;  %10283 = vmatprep.subr.bf16.mxu0 %v13988_v40 }
 0x169   : > { %v3312_v43 = vsub.f32 %v14072_v48, %v16235_v9  ;;  %v14172_v9 = vsub.f32 %v551_v3, %v3226_v5  ;;  %v14174_v30 = vsub.f32 %v552_v55, %v3229_v34  ;;  %v14177_v33 = vpack.c.bf16 %v3229_v34, %v3226_v5  ;;  %10273 = vmatpush3.bf16.msra.mxu1 %v13602_v32  ;;  %v419_v55 = vld [vmem:[%s11999_s24 + $0x30] sm:$0xff] }
 0x16a   : > { %v3418_v48 = vand.u32 4294901760, %v3417_v26  ;;  %v3425_v16 = vand.u32 4294901760, %v3424_v46  ;;  %v14179_v38 = vpack.c.bf16 %v3181_v60, %v3178_v18  ;;  %v16237_v28 = vand.u32 4294901760, %v14109_v63  ;;  %10307 = vmatprep.subr.bf16.mxu1 %v13992_v1  ;;  %v14197_v32 = vld [vmem:[%s15365_s3 + $0x3f0] sm:$0xff] }
 0x16b   : > { %16236 = vst [vmem:[#allocation220_spill] sm:$0xff] %v14177_v33  ;;  %v3184_v54 = vand.u32 4294901760, %v537_v50  ;;  %v3187_v3 = vand.u32 4294901760, %v538_v39  ;;  %v14190_v34 = vpack.c.bf16 %v3299_v4, %v3292_v49  ;;  %v3306_v5 = vand.u32 4294901760, %v3305_v31  ;;  %10285 = vmatpush3.bf16.msra.mxu0 %v13998_v57  ;;  %v14205_v4 = vld [vmem:[%s15365_s3 + $0x3f8] sm:$0xff] }
 0x16c   : > { %v14185_v6 = vsub.f32 %v14109_v63, %v16237_v28  ;;  %v3313_v46 = vand.u32 4294901760, %v3312_v43  ;;  %v14192_v26 = vpack.c.bf16 %v3235_v11, %v3232_v37  ;;  %3142 = vmatmul.mubr.f32.vlgmr.msra.gmra.mrb[16].mxu1 %v13474_v15  ;;  %10287 = vmatprep.subr.bf16.mxu0 %v14036_v42  ;;  %v14211_v31 = vpack.c.bf16 %v3425_v16, %v3418_v48 }
 0x16d   : > { %16238 = vst [vmem:[#allocation221_spill] sm:$0xff] %v14190_v34  ;;  %v14214_v1 = vsub.f32 %v14095_v12, %v3178_v18  ;;  %v14217_v45 = vsub.f32 %v14107_v62, %v3181_v60  ;;  %v14219_v28 = vand.u32 4294901760, %v419_v55  ;;  %10309 = vmatpush3.bf16.msra.mxu1 %v14011_v2  ;;  %v16241_v49 = vand.u32 4294901760, %v14148_v10  ;;  %3484 = vmatprep.mubr.f32.mxu1 %v13932_v21  ;;  %v14237_v12 = vld [vmem:[%s15365_s3 + $0x370] sm:$0xff]  ;;  %v14242_v62 = vld [vmem:[%s15365_s3 + $0x378] sm:$0xff] }
 0x16e   : > { %16239 = vst [vmem:[#allocation222_spill] sm:$0xff] %v14192_v26  ;;  %16240 = vst [vmem:[#allocation223_spill] sm:$0xff] %v14211_v31  ;;  %v3432_v43 = vand.u32 4294901760, %v14185_v6  ;;  %v14226_v57 = vpack.c.bf16 %v3187_v3, %v3184_v54  ;;  %v3238_v16 = vand.u32 4294901760, %v14197_v32  ;;  %10311 = vmatprep.subr.bf16.mxu1 %v14075_v23  ;;  %v14231_v60 = vpack.c.bf16 %v3313_v46, %v3306_v5 }
 0x16f   : > { %v3438_v15 = vsub.f32 %v14148_v10, %v16241_v49  ;;  %v3241_v48 = vand.u32 4294901760, %v14205_v4  ;;  %v14245_v18 = vsub.f32 %v14126_v51, %v3232_v37  ;;  %v14248_v6 = vsub.f32 %v14131_v47, %v3235_v11  ;;  %10289 = vmatpush3.bf16.msra.mxu0 %v14077_v13 }
 0x170   : > { %16242 = vst [vmem:[#allocation224_spill] sm:$0xff] %v14226_v57  ;;  %16243 = vst [vmem:[#allocation225_spill] sm:$0xff] %v14231_v60  ;;  %v16244_v5 = vand.u32 4294901760, %v14167_v0  ;;  %v16245_v49 = vand.u32 4294901760, %v14170_v44  ;;  %v16246_v2 = vand.u32 4294901760, %v14172_v9  ;;  %v16247_v51 = vand.u32 4294901760, %v14174_v30  ;;  %10291 = vmatprep.subr.bf16.mxu0 %v14081_v17 }
 0x171   : > { %v14269_v13 = vsub.f32 %v537_v50, %v3184_v54  ;;  %10313 = vmatpush3.bf16.msra.mxu1 %v14113_v29  ;;  %v3193_v42 = vand.u32 4294901760, %v14242_v62  ;;  %v14274_v40 = vsub.f32 %v538_v39, %v3187_v3  ;;  %v14283_v50 = vsub.f32 %v14205_v4, %v3241_v48 }
 0x172   : > { %v3319_v46 = vsub.f32 %v14167_v0, %v16244_v5  ;;  %v3326_v23 = vsub.f32 %v14170_v44, %v16245_v49  ;;  %v3445_v21 = vsub.f32 %v14172_v9, %v16246_v2  ;;  %v3452_v37 = vsub.f32 %v14174_v30, %v16247_v51  ;;  %10315 = vmatprep.subr.bf16.mxu1 %v14134_v41 }
 0x173   : > { %v14267_v5 = vsub.f32 %v419_v55, %v14219_v28  ;;  %v3439_v49 = vand.u32 4294901760, %v3438_v15  ;;  %v3190_v2 = vand.u32 4294901760, %v14237_v12  ;;  %v14280_v55 = vsub.f32 %v14197_v32, %v3238_v16  ;;  %10293 = vmatpush3.bf16.msra.mxu0 %v14115_v27 }
 0x174   : > { %v3320_v54 = vand.u32 4294901760, %v3319_v46  ;;  %v3327_v15 = vand.u32 4294901760, %v3326_v23  ;;  %v3446_v47 = vand.u32 4294901760, %v3445_v21  ;;  %v3453_v29 = vand.u32 4294901760, %v3452_v37  ;;  %10295 = vmatprep.subr.bf16.mxu0 %v14177_v33 }
 0x175   : > { %v16248_v39 = vand.u32 4294901760, %v14214_v1  ;;  %v16249_v11 = vand.u32 4294901760, %v14217_v45  ;;  %10317 = vmatpush3.bf16.msra.mxu1 %v14190_v34  ;;  %v8176_v46 = vpop.f32.mrb[4].mxu0  ;;  %v14296_v23 = vpack.c.bf16 %v3439_v49, %v3432_v43  ;;  %v14300_v37 = vsub.f32 %v14237_v12, %v3190_v2 }
 0x176   : > { %v8177_v41 = vpop.f32.mrb[5].mxu0  ;;  %10319 = vmatprep.subr.bf16.mxu1 %v14211_v31  ;;  %v16252_v51 = vand.u32 4294901760, %v14248_v6  ;;  %v15728_v21 = vand.u32 4294901760, %v14283_v50  ;;  %v14317_v34 = vpack.c.bf16 %v3241_v48, %v3238_v16  ;;  %v14319_v31 = vpack.c.bf16 %v3453_v29, %v3446_v47 }
 0x177   : > { %v3333_v3 = vsub.f32 %v14214_v1, %v16248_v39  ;;  %v3340_v32 = vsub.f32 %v14217_v45, %v16249_v11  ;;  %16250 = vst [vmem:[#allocation226_spill] sm:$0xff] %v14296_v23  ;;  %v14303_v39 = vsub.f32 %v14242_v62, %v3193_v42  ;;  %v16251_v11 = vand.u32 4294901760, %v14245_v18  ;;  %10297 = vmatpush3.bf16.msra.mxu0 %v14179_v38 }
 0x178   : > { %v3466_v43 = vsub.f32 %v14248_v6, %v16252_v51  ;;  %v8178_v12 = vadd.f32 %v8177_v41, %v8176_v46  ;;  %v14315_v62 = vpack.c.bf16 %v3327_v15, %v3320_v54  ;;  %16254 = vst [vmem:[#allocation228_spill] sm:$0xff] %v14317_v34  ;;  %16255 = vst [vmem:[#allocation229_spill] sm:$0xff] %v14319_v31  ;;  %10299 = vmatprep.subr.bf16.mxu0 %v14192_v26 }
 0x179   : > { %v3459_v4 = vsub.f32 %v14245_v18, %v16251_v11  ;;  %v3334_v11 = vand.u32 4294901760, %v3333_v3  ;;  %v3341_v33 = vand.u32 4294901760, %v3340_v32  ;;  %v16256_v27 = vand.u32 4294901760, %v14267_v5  ;;  %10321 = vmatpush3.bf16.msra.mxu1 %v14231_v60 }
 0x17a   : > { %16253 = vst [vmem:[#allocation227_spill] sm:$0xff] %v14315_v62  ;;  %v16257_v49 = vand.u32 4294901760, %v14269_v13  ;;  %v1316_v46 = vadd.f32 %v8178_v12, %v14119_v58  ;;  %v16258_v16 = vand.u32 4294901760, %v14274_v40  ;;  %v15730_v48 = vand.u32 4294901760, %v14300_v37  ;;  %10323 = vmatprep.subr.bf16.mxu1 %v14296_v23  ;;  %v16288_v23 = vld [vmem:[#allocation211_spill] sm:$0xff] }
 0x17b   : > { %v3252_v51 = vsub.f32 %v14267_v5, %v16256_v27  ;;  %v15729_v47 = vand.u32 4294901760, %v14303_v39  ;;  %v3460_v54 = vand.u32 4294901760, %v3459_v4  ;;  %v3467_v27 = vand.u32 4294901760, %v3466_v43  ;;  %10301 = vmatpush3.bf16.msra.mxu0 %v14226_v57 }
 0x17c   : > { %v3347_v41 = vsub.f32 %v14269_v13, %v16257_v49  ;;  %v3354_v29 = vsub.f32 %v14274_v40, %v16258_v16  ;;  %v16259_v15 = vand.u32 4294901760, %v14280_v55  ;;  %v3480_v58 = vsub.f32 %v14283_v50, %v15728_v21  ;;  %10303 = vmatprep.subr.bf16.mxu0 %v14317_v34 }
 0x17d   : > { %v14343_v32 = vpack.c.bf16 %v3193_v42, %v3190_v2  ;;  %v14346_v49 = vpack.c.bf16 %v3341_v33, %v3334_v11  ;;  %v14350_v4 = vpack.c.bf16 %v13797_v59, %v13792_v14  ;;  %10325 = vmatpush3.bf16.msra.mxu1 %v14315_v62  ;;  %v3361_v16 = vsub.f32 %v14300_v37, %v15730_v48 }
 0x17e   : > { %v3473_v3 = vsub.f32 %v14280_v55, %v16259_v15  ;;  %v3348_v43 = vand.u32 4294901760, %v3347_v41  ;;  %v3355_v12 = vand.u32 4294901760, %v3354_v29  ;;  %v3368_v42 = vsub.f32 %v14303_v39, %v15729_v47  ;;  %10327 = vmatprep.subr.bf16.mxu1 %v14319_v31 }
 0x17f   : > { %16260 = vst [vmem:[#allocation230_spill] sm:$0xff] %v14343_v32  ;;  %16261 = vst [vmem:[#allocation231_spill] sm:$0xff] %v14346_v49  ;;  %v3253_v33 = vand.u32 4294901760, %v3252_v51  ;;  %v14360_v2 = vpack.c.bf16 %v3467_v27, %v3460_v54  ;;  %v3481_v15 = vand.u32 4294901760, %v3480_v58  ;;  %v8211_v21 = vpop.f32.mrb[4].mxu1  ;;  %10305 = vmatpush3.bf16.msra.mxu0 %v14343_v32  ;;  %v14365_v41 = vpack.c.bf16 %v13827_v24, %v13812_v19 }
 0x180   : > { %16262 = vst [vmem:[#allocation232_spill] sm:$0xff] %v14350_v4  ;;  %v3474_v11 = vand.u32 4294901760, %v3473_v3  ;;  %v8212_v29 = vpop.f32.mrb[5].mxu1  ;;  %10339 = vmatprep.subr.bf16.mxu0 %v14350_v4  ;;  %v14370_v47 = vpack.c.bf16 %v13930_v8, %v13914_v61  ;;  %v14373_v51 = vpack.c.bf16 %v3355_v12, %v3348_v43  ;;  %v3362_v54 = vand.u32 4294901760, %v3361_v16  ;;  %v16274_v16 = vld [vmem:[#allocation204_spill] sm:$0xff]  ;;  %v16410_v4 = vld [vmem:[#allocation101_spill] sm:$0xff] }
 0x181   : > { %16263 = vst [vmem:[#allocation233_spill] sm:$0xff] %v14360_v2  ;;  %16264 = vst [vmem:[#allocation234_spill] sm:$0xff] %v14365_v41  ;;  %v8213_v48 = vadd.f32 %v8212_v29, %v8211_v21  ;;  %10329 = vmatpush3.bf16.msra.mxu1 %v14346_v49  ;;  %v3369_v27 = vand.u32 4294901760, %v3368_v42  ;;  %v14381_v31 = vpack.c.bf16 %v13960_v7, %v13942_v53  ;;  %v16275_v42 = vld [vmem:[#allocation213_spill] sm:$0xff] }
 0x182   : > { %16265 = vst [vmem:[#allocation235_spill] sm:$0xff] %v14370_v47  ;;  %16266 = vst [vmem:[#allocation236_spill] sm:$0xff] %v14373_v51  ;;  %3254 = vmatmul.mubr.f32.vlgmr.msra.gmra.mrb[18].mxu0 %v3253_v33  ;;  %10331 = vmatprep.subr.bf16.mxu1 %v14360_v2  ;;  %v14376_v3 = vpack.c.bf16 %v3481_v15, %v3474_v11  ;;  %v14387_v21 = vpack.c.bf16 %v13979_v52, %v13977_v22  ;;  %v16276_v33 = vld [vmem:[#allocation214_spill] sm:$0xff]  ;;  %v16279_v29 = vld [vmem:[#allocation205_spill] sm:$0xff] }
 0x183   : > { %v1420_v58 = vadd.f32 %v8213_v48, %v1316_v46  ;;  %10341 = vmatpush3.bf16.msra.mxu0 %v14365_v41  ;;  %16268 = vst [vmem:[#allocation238_spill] sm:$0xff] %v14381_v31  ;;  %3621 = vmatprep.mubr.f32.mxu0 %v13973_v35  ;;  %v14390_v43 = vpack.c.bf16 %v3369_v27, %v3362_v54  ;;  %v16272_v48 = vld [vmem:[#allocation212_spill] sm:$0xff]  ;;  %v16280_v54 = vand.u32 4294901760, %v13973_v35  ;;  %v16281_v27 = vld [vmem:[#allocation206_spill] sm:$0xff]  ;;  %v16287_v2 = vld [vmem:[#allocation209_spill] sm:$0xff] }
 0x184   : > { %16267 = vst [vmem:[#allocation237_spill] sm:$0xff] %v14376_v3  ;;  %10343 = vmatprep.subr.bf16.mxu0 %v14370_v47  ;;  %16269 = vst [vmem:[#allocation239_spill] sm:$0xff] %v14387_v21  ;;  %v14396_v46 = vpack.c.bf16 %v14033_v20, %v14031_v56  ;;  %v14401_v12 = vpack.c.bf16 %v16272_v48, %v14060_v36  ;;  %v14408_v11 = vpack.c.bf16 %v16276_v33, %v16275_v42  ;;  %v16409_v47 = vld [vmem:[#allocation99_spill] sm:$0xff] }
 0x185   : > { %10333 = vmatpush3.bf16.msra.mxu1 %v14373_v51  ;;  %16270 = vst [vmem:[#allocation240_spill] sm:$0xff] %v14390_v43  ;;  %v14414_v15 = vpack.c.bf16 %v14148_v10, %v14109_v63  ;;  %v16284_v51 = vld [vmem:[#allocation207_spill] sm:$0xff]  ;;  %v14435_v35 = vpack.c.bf16 %v14217_v45, %v14214_v1 }
 0x186   : > { %10335 = vmatprep.subr.bf16.mxu1 %v14376_v3  ;;  %16271 = vst [vmem:[#allocation241_spill] sm:$0xff] %v14396_v46  ;;  %16273 = vst [vmem:[#allocation212_spill] sm:$0xff] %v14401_v12  ;;  %v14428_v3 = vpack.c.bf16 %v14174_v30, %v14172_v9 }
 0x187   : > { %10345 = vmatpush3.bf16.msra.mxu0 %v14381_v31  ;;  %16277 = vst [vmem:[#allocation204_spill] sm:$0xff] %v14408_v11  ;;  %16278 = vst [vmem:[#allocation213_spill] sm:$0xff] %v14414_v15 }
 0x188   : > { %10347 = vmatprep.subr.bf16.mxu0 %v14387_v21  ;;  %16283 = vst [vmem:[#allocation205_spill] sm:$0xff] %v14428_v3  ;;  %16285 = vst [vmem:[#allocation206_spill] sm:$0xff] %v14435_v35 }
 0x189   : > { %10337 = vmatpush3.bf16.msra.mxu1 %v14390_v43  ;;  %v14423_v43 = vpack.c.bf16 %v14170_v44, %v14167_v0 }
 0x18a   : > { %10371 = vmatprep.subr.bf16.mxu1 %v16274_v16 }
 0x18b   : > { %10349 = vmatpush3.bf16.msra.mxu0 %v14396_v46  ;;  %16282 = vst [vmem:[#allocation214_spill] sm:$0xff] %v14423_v43  ;;  %v16299_v46 = vand.u32 4294901760, %v13827_v24  ;;  %v16304_v24 = vand.u32 4294901760, %v13942_v53  ;;  %v16311_v53 = vand.u32 4294901760, %v14031_v56  ;;  %v16317_v56 = vand.u32 4294901760, %v16275_v42 }
 0x18c   : > { %3486 = vmatmul.mubr.f32.vlgmr.msra.gmra.mrb[18].mxu1 %v14219_v28  ;;  %10351 = vmatprep.subr.bf16.mxu0 %v14401_v12  ;;  %v16296_v12 = vld [vmem:[#allocation218_spill] sm:$0xff]  ;;  %v16324_v42 = vand.u32 4294901760, %v14167_v0  ;;  %v16330_v0 = vand.u32 4294901760, %v14214_v1  ;;  %v16336_v1 = vand.u32 4294901760, %v14269_v13 }
 0x18d   : > { %10373 = vmatpush3.bf16.msra.mxu1 %v16279_v29  ;;  %3728 = vmatprep.mubr.f32.mxu1 %v16280_v54  ;;  %v14440_v54 = vpack.c.bf16 %v14248_v6, %v14245_v18 }
 0x18e   : > { %10375 = vmatprep.subr.bf16.mxu1 %v16281_v27 }
 0x18f   : > { %10353 = vmatpush3.bf16.msra.mxu0 %v14408_v11  ;;  %16286 = vst [vmem:[#allocation207_spill] sm:$0xff] %v14440_v54  ;;  %v16291_v11 = vld [vmem:[#allocation216_spill] sm:$0xff] }
 0x190   : > { %10355 = vmatprep.subr.bf16.mxu0 %v14414_v15 }
 0x191   : > { %10377 = vmatpush3.bf16.msra.mxu1 %v13986_v25 }
 0x192   : > { %10379 = vmatprep.subr.bf16.mxu1 %v16284_v51 }
 0x193   : > { %10357 = vmatpush3.bf16.msra.mxu0 %v14423_v43  ;;  %v14447_v43 = vpack.c.bf16 %v14274_v40, %v14269_v13  ;;  %v16342_v13 = vand.u32 4294901760, %v14300_v37 }
 0x194   : > { %10359 = vmatprep.subr.bf16.mxu0 %v14428_v3  ;;  %v14452_v3 = vpack.c.bf16 %v14283_v50, %v14280_v55 }
 0x195   : > { %10381 = vmatpush3.bf16.msra.mxu1 %v16287_v2  ;;  %v8246_v49 = vpop.f32.mrb[6].mxu0  ;;  %16289 = vst [vmem:[#allocation209_spill] sm:$0xff] %v14447_v43 }
 0x196   : > { %v8247_v62 = vpop.f32.mrb[7].mxu0  ;;  %10383 = vmatprep.subr.bf16.mxu1 %v16288_v23  ;;  %16290 = vst [vmem:[#allocation211_spill] sm:$0xff] %v14452_v3 }
 0x197   : > { %v8248_v60 = vadd.f32 %v8247_v62, %v8246_v49  ;;  %10361 = vmatpush3.bf16.msra.mxu0 %v14435_v35  ;;  %v14459_v62 = vpack.c.bf16 %v14303_v39, %v14300_v37  ;;  %v16293_v49 = vand.u32 4294901760, %v13792_v14  ;;  %v16301_v14 = vand.u32 4294901760, %v13914_v61  ;;  %v16307_v61 = vld [vmem:[#allocation202_spill] sm:$0xff] }
 0x198   : > { %10363 = vmatprep.subr.bf16.mxu0 %v14440_v54  ;;  %v16294_v54 = vand.u32 4294901760, %v13797_v59  ;;  %v16302_v59 = vand.u32 4294901760, %v13930_v8  ;;  %v16308_v8 = vand.u32 4294901760, %v13977_v22  ;;  %v16314_v22 = vand.u32 4294901760, %v14060_v36 }
 0x199   : > { %v1532_v15 = vadd.f32 %v8248_v60, %v1420_v58  ;;  %10385 = vmatpush3.bf16.msra.mxu1 %v16291_v11  ;;  %16292 = vst [vmem:[#allocation216_spill] sm:$0xff] %v14459_v62  ;;  %v16297_v60 = vld [vmem:[#allocation220_spill] sm:$0xff]  ;;  %v16321_v36 = vand.u32 4294901760, %v14109_v63  ;;  %v16327_v63 = vand.u32 4294901760, %v14172_v9  ;;  %v16333_v9 = vand.u32 4294901760, %v14245_v18 }
 0x19a   : > { %10387 = vmatprep.subr.bf16.mxu1 %v14081_v17  ;;  %v14466_v35 = vpack.c.bf16 %v16294_v54, %v16293_v49  ;;  %v14482_v54 = vpack.c.bf16 %v16302_v59, %v16301_v14  ;;  %v16339_v18 = vand.u32 4294901760, %v14280_v55 }
 0x19b   : > { %10365 = vmatpush3.bf16.msra.mxu0 %v14447_v43  ;;  %v16298_v43 = vand.u32 4294901760, %v13812_v19 }
 0x19c   : > { %10367 = vmatprep.subr.bf16.mxu0 %v14452_v3  ;;  %16295 = vst [vmem:[#allocation242_spill] sm:$0xff] %v14466_v35  ;;  %16303 = vst [vmem:[#allocation220_spill] sm:$0xff] %v14482_v54 }
 0x19d   : > { %10389 = vmatpush3.bf16.msra.mxu1 %v16296_v12  ;;  %v14475_v21 = vpack.c.bf16 %v16299_v46, %v16298_v43  ;;  %v16305_v43 = vand.u32 4294901760, %v13960_v7  ;;  %v16312_v7 = vand.u32 4294901760, %v14033_v20  ;;  %v16318_v20 = vand.u32 4294901760, %v16276_v33 }
 0x19e   : > { %10391 = vmatprep.subr.bf16.mxu1 %v16297_v60 }
 0x19f   : > { %v8281_v58 = vpop.f32.mrb[6].mxu1  ;;  %10369 = vmatpush3.bf16.msra.mxu0 %v14459_v62  ;;  %16300 = vst [vmem:[#allocation218_spill] sm:$0xff] %v14475_v21  ;;  %v14492_v46 = vpack.c.bf16 %v16305_v43, %v16304_v24  ;;  %v14525_v59 = vpack.c.bf16 %v16318_v20, %v16317_v56 }
 0x1a0   : > { %v8282_v3 = vpop.f32.mrb[7].mxu1  ;;  %10403 = vmatprep.subr.bf16.mxu0 %v14466_v35 }
 0x1a1   : > { %v8283_v49 = vadd.f32 %v8282_v3, %v8281_v58  ;;  %10393 = vmatpush3.bf16.msra.mxu1 %v14179_v38  ;;  %16306 = vst [vmem:[#allocation243_spill] sm:$0xff] %v14492_v46  ;;  %v16309_v3 = vand.u32 4294901760, %v13979_v52  ;;  %v16315_v52 = vand.u32 4294901760, %v16272_v48  ;;  %16319 = vst [vmem:[#allocation246_spill] sm:$0xff] %v14525_v59  ;;  %v16322_v48 = vand.u32 4294901760, %v14148_v10 }
 0x1a2   : > { %3624 = vmatmul.mubr.f32.vlgmr.msra.gmra.mrb[20].mxu0 %v14267_v5  ;;  %10395 = vmatprep.subr.bf16.mxu1 %v14192_v26  ;;  %v16328_v10 = vand.u32 4294901760, %v14174_v30  ;;  %v16334_v30 = vand.u32 4294901760, %v14248_v6  ;;  %v16340_v6 = vand.u32 4294901760, %v14283_v50 }
 0x1a3   : > { %v1764_v19 = vadd.f32 %v8283_v49, %v1532_v15  ;;  %10405 = vmatpush3.bf16.msra.mxu0 %v14475_v21  ;;  %3898 = vmatprep.mubr.f32.mxu0 %v16307_v61  ;;  %v14500_v58 = vpack.c.bf16 %v16309_v3, %v16308_v8  ;;  %v14509_v15 = vpack.c.bf16 %v16312_v7, %v16311_v53  ;;  %v16320_v49 = vand.u32 4294901760, %v14267_v5  ;;  %v16407_v21 = vld [vmem:[#allocation93_spill] sm:$0xff] }
 0x1a4   : > { %10407 = vmatprep.subr.bf16.mxu0 %v14482_v54  ;;  %v14516_v14 = vpack.c.bf16 %v16315_v52, %v16314_v22  ;;  %v14534_v24 = vpack.c.bf16 %v16322_v48, %v16321_v36  ;;  %v16325_v5 = vand.u32 4294901760, %v14170_v44  ;;  %v14551_v43 = vpack.c.bf16 %v16328_v10, %v16327_v63  ;;  %v16347_v36 = vld [vmem:[#allocation13_spill] sm:$0xff]  ;;  %v16348_v48 = vld [vmem:[#allocation14_spill] sm:$0xff]  ;;  %v16350_v63 = vld [vmem:[#allocation16_spill] sm:$0xff] }
 0x1a5   : > { %16310 = vst [vmem:[#allocation202_spill] sm:$0xff] %v14500_v58  ;;  %10397 = vmatpush3.bf16.msra.mxu1 %v14226_v57  ;;  %16313 = vst [vmem:[#allocation244_spill] sm:$0xff] %v14509_v15  ;;  %v16331_v44 = vand.u32 4294901760, %v14217_v45  ;;  %v14567_v8 = vpack.c.bf16 %v16334_v30, %v16333_v9  ;;  %v16337_v45 = vand.u32 4294901760, %v14274_v40  ;;  %v14583_v52 = vpack.c.bf16 %v16340_v6, %v16339_v18  ;;  %v16352_v30 = vld [vmem:[#allocation19_spill] sm:$0xff]  ;;  %v16357_v6 = vld [vmem:[#allocation29_spill] sm:$0xff] }
 0x1a6   : > { %10399 = vmatprep.subr.bf16.mxu1 %v14317_v34  ;;  %16316 = vst [vmem:[#allocation245_spill] sm:$0xff] %v14516_v14  ;;  %16323 = vst [vmem:[#allocation247_spill] sm:$0xff] %v14534_v24  ;;  %v14544_v33 = vpack.c.bf16 %v16325_v5, %v16324_v42  ;;  %v16343_v40 = vand.u32 4294901760, %v14303_v39  ;;  %v16345_v39 = vld [vmem:[#allocation11_spill] sm:$0xff] }
 0x1a7   : > { %10409 = vmatpush3.bf16.msra.mxu0 %v14492_v46  ;;  %16329 = vst [vmem:[#allocation249_spill] sm:$0xff] %v14551_v43  ;;  %16335 = vst [vmem:[#allocation251_spill] sm:$0xff] %v14567_v8  ;;  %v14576_v22 = vpack.c.bf16 %v16337_v45, %v16336_v1  ;;  %v16349_v42 = vld [vmem:[#allocation15_spill] sm:$0xff]  ;;  %v423_v46 = vld [vmem:[%s14627_s16 + $0x10] sm:$0xff] }
 0x1a8   : > { %10411 = vmatprep.subr.bf16.mxu0 %v14500_v58  ;;  %16326 = vst [vmem:[#allocation248_spill] sm:$0xff] %v14544_v33  ;;  %16341 = vst [vmem:[#allocation253_spill] sm:$0xff] %v14583_v52  ;;  %v14592_v20 = vpack.c.bf16 %v16343_v40, %v16342_v13  ;;  %v16356_v18 = vld [vmem:[#allocation27_spill] sm:$0xff]  ;;  %v16359_v40 = vld [vmem:[#allocation33_spill] sm:$0xff]  ;;  %v14710_v35 = vand.u32 4294901760, %v423_v46 }
 0x1a9   : > { %10401 = vmatpush3.bf16.msra.mxu1 %v14343_v32  ;;  %16338 = vst [vmem:[#allocation252_spill] sm:$0xff] %v14576_v22  ;;  %v16358_v13 = vld [vmem:[#allocation31_spill] sm:$0xff] }
 0x1aa   : > { %10435 = vmatprep.subr.bf16.mxu1 %v16274_v16  ;;  %16344 = vst [vmem:[#allocation254_spill] sm:$0xff] %v14592_v20 }
 0x1ab   : > { %10413 = vmatpush3.bf16.msra.mxu0 %v14509_v15 }
 0x1ac   : > { %3732 = vmatmul.mubr.f32.vlgmr.msra.gmra.mrb[20].mxu1 %v16320_v49  ;;  %10415 = vmatprep.subr.bf16.mxu0 %v14516_v14  ;;  %v16346_v49 = vld [vmem:[#allocation12_spill] sm:$0xff]  ;;  %v424_v14 = vld [vmem:[%s14627_s16 + $0x18] sm:$0xff] }
 0x1ad   : > { %10437 = vmatpush3.bf16.msra.mxu1 %v16279_v29  ;;  %4002 = vmatprep.mubr.f32.mxu1 %v16307_v61  ;;  %v14560_v61 = vpack.c.bf16 %v16331_v44, %v16330_v0  ;;  %v16351_v0 = vld [vmem:[#allocation17_spill] sm:$0xff]  ;;  %v14706_v58 = vand.u32 4294901760, %v424_v14 }
 0x1ae   : > { %10439 = vmatprep.subr.bf16.mxu1 %v16281_v27 }
 0x1af   : > { %10417 = vmatpush3.bf16.msra.mxu0 %v14525_v59  ;;  %16332 = vst [vmem:[#allocation250_spill] sm:$0xff] %v14560_v61 }
 0x1b0   : > { %10419 = vmatprep.subr.bf16.mxu0 %v14534_v24  ;;  %v16375_v24 = vld [vmem:[#allocation65_spill] sm:$0xff] }
 0x1b1   : > { %10441 = vmatpush3.bf16.msra.mxu1 %v13986_v25 }
 0x1b2   : > { %10443 = vmatprep.subr.bf16.mxu1 %v16284_v51 }
 0x1b3   : > { %10421 = vmatpush3.bf16.msra.mxu0 %v14544_v33  ;;  %v16374_v33 = vld [vmem:[#allocation64_spill] sm:$0xff] }
 0x1b4   : > { %10423 = vmatprep.subr.bf16.mxu0 %v14551_v43  ;;  %v16370_v43 = vld [vmem:[#allocation49_spill] sm:$0xff] }
 0x1b5   : > { %10445 = vmatpush3.bf16.msra.mxu1 %v16287_v2  ;;  %v8316_v3 = vpop.f32.mrb[8].mxu0 }
 0x1b6   : > { %v8317_v53 = vpop.f32.mrb[9].mxu0  ;;  %10447 = vmatprep.subr.bf16.mxu1 %v16288_v23 }
 0x1b7   : > { %v8318_v7 = vadd.f32 %v8317_v53, %v8316_v3  ;;  %10425 = vmatpush3.bf16.msra.mxu0 %v14560_v61  ;;  %v16353_v3 = vld [vmem:[#allocation22_spill] sm:$0xff]  ;;  %v16355_v53 = vld [vmem:[#allocation25_spill] sm:$0xff] }
 0x1b8   : > { %10427 = vmatprep.subr.bf16.mxu0 %v14567_v8  ;;  %v422_v8 = vld [vmem:[%s14627_s16 + $0x8] sm:$0xff]  ;;  %v16368_v61 = vld [vmem:[#allocation46_spill] sm:$0xff] }
 0x1b9   : > { %v1902_v56 = vadd.f32 %v8318_v7, %v1764_v19  ;;  %10449 = vmatpush3.bf16.msra.mxu1 %v16291_v11 }
 0x1ba   : > { %10451 = vmatprep.subr.bf16.mxu1 %v14081_v17 }
 0x1bb   : > { %10429 = vmatpush3.bf16.msra.mxu0 %v14576_v22 }
 0x1bc   : > { %10431 = vmatprep.subr.bf16.mxu0 %v14583_v52 }
 0x1bd   : > { %10453 = vmatpush3.bf16.msra.mxu1 %v16296_v12 }
 0x1be   : > { %10455 = vmatprep.subr.bf16.mxu1 %v16297_v60 }
 0x1bf   : > { %v8351_v55 = vpop.f32.mrb[8].mxu1  ;;  %10433 = vmatpush3.bf16.msra.mxu0 %v14592_v20 }
 0x1c0   : > { %v8352_v50 = vpop.f32.mrb[9].mxu1 }
 0x1c1   : > { %v8353_v19 = vadd.f32 %v8352_v50, %v8351_v55  ;;  %10457 = vmatpush3.bf16.msra.mxu1 %v14179_v38  ;;  %v16360_v55 = vld [vmem:[#allocation35_spill] sm:$0xff]  ;;  %v16361_v50 = vld [vmem:[#allocation38_spill] sm:$0xff] }
 0x1c2   : > { %3900 = vmatmul.mubr.f32.vlgmr.msra.gmra.mrb[22].mxu0 %v14219_v28  ;;  %10459 = vmatprep.subr.bf16.mxu1 %v14192_v26  ;;  %v16424_v26 = vld [vmem:[#allocation120_spill] sm:$0xff] }
 0x1c3   : > { %v2010_v37 = vadd.f32 %v8353_v19, %v1902_v56 }
 0x1c5   : > { %10461 = vmatpush3.bf16.msra.mxu1 %v14226_v57  ;;  %v16415_v57 = vld [vmem:[#allocation111_spill] sm:$0xff] }
 0x1c6   : > { %10463 = vmatprep.subr.bf16.mxu1 %v14317_v34  ;;  %v16414_v34 = vld [vmem:[#allocation108_spill] sm:$0xff] }
 0x1c9   : > { %10465 = vmatpush3.bf16.msra.mxu1 %v14343_v32  ;;  %v16413_v32 = vld [vmem:[#allocation107_spill] sm:$0xff] }
 0x1ca   : > { %10467 = vmatprep.subr.bf16.mxu1 %v16345_v39 }
 0x1cc   : > { %4004 = vmatmul.mubr.f32.vlgmr.msra.gmra.mrb[22].mxu1 %v14219_v28  ;;  %v16354_v28 = vld [vmem:[#allocation23_spill] sm:$0xff] }
 0x1cd   : > { %10469 = vmatpush3.bf16.msra.mxu1 %v16346_v49 }
 0x1ce   : > { %10471 = vmatprep.subr.bf16.mxu1 %v16347_v36 }
 0x1d1   : > { %10473 = vmatpush3.bf16.msra.mxu1 %v16348_v48 }
 0x1d2   : > { %10475 = vmatprep.subr.bf16.mxu1 %v16349_v42 }
 0x1d5   : > { %v8386_v5 = vpop.f32.mrb[10].mxu0  ;;  %10477 = vmatpush3.bf16.msra.mxu1 %v16350_v63 }
 0x1d6   : > { %v8387_v10 = vpop.f32.mrb[11].mxu0  ;;  %10479 = vmatprep.subr.bf16.mxu1 %v16351_v0 }
 0x1d7   : > { %v8388_v44 = vadd.f32 %v8387_v10, %v8386_v5 }
 0x1d9   : > { %v2178_v9 = vadd.f32 %v8388_v44, %v2010_v37  ;;  %10481 = vmatpush3.bf16.msra.mxu1 %v16352_v30 }
 0x1da   : > { %10483 = vmatprep.subr.bf16.mxu1 %v16353_v3 }
 0x1dd   : > { %10485 = vmatpush3.bf16.msra.mxu1 %v16354_v28 }
 0x1de   : > { %10487 = vmatprep.subr.bf16.mxu1 %v16355_v53 }
 0x1df   : > { %v8421_v7 = vpop.f32.mrb[10].mxu1 }
 0x1e0   : > { %v8422_v1 = vpop.f32.mrb[11].mxu1 }
 0x1e1   : > { %v8423_v45 = vadd.f32 %v8422_v1, %v8421_v7  ;;  %10489 = vmatpush3.bf16.msra.mxu1 %v16356_v18 }
 0x1e2   : > { %10491 = vmatprep.subr.bf16.mxu1 %v16357_v6 }
 0x1e3   : > { %v2282_v56 = vadd.f32 %v8423_v45, %v2178_v9 }
 0x1e5   : > { %10493 = vmatpush3.bf16.msra.mxu1 %v16358_v13 }
 0x1e6   : > { %10495 = vmatprep.subr.bf16.mxu1 %v16359_v40 }
 0x1e9   : > { %10497 = vmatpush3.bf16.msra.mxu1 %v16360_v55 }
 0x1ea   : > { %10531 = vmatprep.subr.bf16.mxu1 %v16361_v50 }
 0x1f5   : > { %v8456_v19 = vpop.f32.mrb[12].mxu0 }
 0x1f6   : > { %v8457_v37 = vpop.f32.mrb[13].mxu0 }
 0x1f7   : > { %v8458_v5 = vadd.f32 %v8457_v37, %v8456_v19  ;;  %v421_v37 = vld [vmem:[%s14627_s16] sm:$0xff] }
 0x1f9   : > { %v2394_v10 = vadd.f32 %v8458_v5, %v2282_v56  ;;  %v14630_v56 = vand.u32 4294901760, %v422_v8 }
 0x1ff   : > { %v8491_v44 = vpop.f32.mrb[12].mxu1 }
 0x200   : > { %v8492_v7 = vpop.f32.mrb[13].mxu1 }
 0x201   : > { %v8493_v1 = vadd.f32 %v8492_v7, %v8491_v44  ;;  %v15756_v7 = vmov 0.0  }
 0x202   : > { %9688 = vmatprep.subr.mxu0 %v15756_v7  ;;  %9690 = vmatprep.mubr.msk.f32.mxu0 %vm11446_vm0, %v15756_v7  ;;  %v16367_v7 = vld [vmem:[#allocation45_spill] sm:$0xff] }
 0x203   : > { %v2626_v20 = vadd.f32 %v8493_v1, %v2394_v10  ;;  %v14633_v10 = vand.u32 4294901760, %v421_v37  ;;  %v14646_v1 = vld [vmem:[%s15366_s4] sm:$0xff] }
 0x204   : > { %16363 = vst [vmem:[#allocation11_spill] sm:$0xff] %v14646_v1  ;;  %9689 = vmatpush3.msra.mxu0 %v14646_v1  ;;  %v16366_v1 = vld [vmem:[#allocation43_spill] sm:$0xff] }
 0x215   : > { %v8526_v52 = vpop.f32.mrb[14].mxu0 }
 0x216   : > { %v8527_v22 = vpop.f32.mrb[15].mxu0 }
 0x217   : > { %v8528_v9 = vadd.f32 %v8527_v22, %v8526_v52  ;;  %v14636_v22 = vsub.f32 %v422_v8, %v14630_v56 }
 0x219   : > { %v2764_v45 = vadd.f32 %v8528_v9, %v2626_v20  ;;  %v14639_v20 = vsub.f32 %v421_v37, %v14633_v10  ;;  %v15759_v44 = vand.u32 4294901760, %v14636_v22 }
 0x21b   : > { %v15761_v9 = vand.u32 4294901760, %v14639_v20  ;;  %v4220_v8 = vsub.f32 %v14636_v22, %v15759_v44  ;;  %v16369_v44 = vld [vmem:[#allocation48_spill] sm:$0xff] }
 0x21f   : > { %v8561_v50 = vpop.f32.mrb[14].mxu1 }
 0x220   : > { %v8562_v19 = vpop.f32.mrb[15].mxu1 }
 0x221   : > { %v8563_v5 = vadd.f32 %v8562_v19, %v8561_v50  ;;  %v4226_v50 = vsub.f32 %v14639_v20, %v15761_v9  ;;  %v4221_v19 = vand.u32 4294901760, %v4220_v8 }
 0x223   : > { %v2872_v52 = vadd.f32 %v8563_v5, %v2764_v45  ;;  %v16364_v45 = vld [vmem:[#allocation18_spill] sm:$0xff]  ;;  %v4227_v37 = vand.u32 4294901760, %v4226_v50  ;;  %4222 = vmatprep.mubr.f32.mxu1 %v4221_v19  ;;  %v16365_v5 = vld [vmem:[#allocation41_spill] sm:$0xff] }
 0x224   : > { %10499 = vmatprep.subr.bf16.mxu0 %v16364_v45  ;;  %v16371_v50 = vld [vmem:[#allocation61_spill] sm:$0xff] }
 0x225   : > { %4228 = vmatmul.mubr.f32.vlgmr.msra.gmra.mrb[24].mxu1 %v4227_v37  ;;  %v16372_v37 = vld [vmem:[#allocation62_spill] sm:$0xff] }
 0x226   : > { %10533 = vmatpush3.bf16.msra.mxu1 %v16365_v5  ;;  %4595 = vmatprep.mubr.f32.mxu1 %v14636_v22  ;;  %v16373_v5 = vld [vmem:[#allocation63_spill] sm:$0xff] }
 0x227   : > { %10535 = vmatprep.subr.bf16.mxu1 %v16366_v1 }
 0x22a   : > { %10537 = vmatpush3.bf16.msra.mxu1 %v16367_v7 }
 0x22b   : > { %10539 = vmatprep.subr.bf16.mxu1 %v16368_v61 }
 0x22e   : > { %10541 = vmatpush3.bf16.msra.mxu1 %v16369_v44  ;;  %v16376_v44 = vld [vmem:[#allocation66_spill] sm:$0xff] }
 0x22f   : > { %10543 = vmatprep.subr.bf16.mxu1 %v16370_v43  ;;  %v16377_v43 = vld [vmem:[#allocation67_spill] sm:$0xff] }
 0x232   : > { %10545 = vmatpush3.bf16.msra.mxu1 %v16371_v50  ;;  %v16384_v50 = vld [vmem:[#allocation55_spill] sm:$0xff] }
 0x233   : > { %10547 = vmatprep.subr.bf16.mxu1 %v16372_v37 }
 0x235   : > { %v8596_v45 = vpop.f32.mrb[16].mxu0 }
 0x236   : > { %v8597_v9 = vpop.f32.mrb[17].mxu0  ;;  %10549 = vmatpush3.bf16.msra.mxu1 %v16373_v5  ;;  %v16386_v5 = vld [vmem:[#allocation57_spill] sm:$0xff] }
 0x237   : > { %v8598_v8 = vadd.f32 %v8597_v9, %v8596_v45  ;;  %10551 = vmatprep.subr.bf16.mxu1 %v16374_v33  ;;  %v16378_v9 = vld [vmem:[#allocation68_spill] sm:$0xff]  ;;  %v16379_v45 = vld [vmem:[#allocation69_spill] sm:$0xff] }
 0x238   : > { %v16382_v33 = vld [vmem:[#allocation53_spill] sm:$0xff] }
 0x239   : > { %v3040_v19 = vadd.f32 %v8598_v8, %v2872_v52  ;;  %v16380_v52 = vld [vmem:[#allocation51_spill] sm:$0xff]  ;;  %v16381_v8 = vld [vmem:[#allocation52_spill] sm:$0xff] }
 0x23a   : > { %10553 = vmatpush3.bf16.msra.mxu1 %v16375_v24  ;;  %v16383_v24 = vld [vmem:[#allocation54_spill] sm:$0xff] }
 0x23b   : > { %10555 = vmatprep.subr.bf16.mxu1 %v16376_v44 }
 0x23e   : > { %10557 = vmatpush3.bf16.msra.mxu1 %v16377_v43  ;;  %v16388_v43 = vld [vmem:[#allocation59_spill] sm:$0xff] }
 0x23f   : > { %v8631_v1 = vpop.f32.mrb[16].mxu1  ;;  %10559 = vmatprep.subr.bf16.mxu1 %v16378_v9  ;;  %v16389_v9 = vld [vmem:[#allocation60_spill] sm:$0xff] }
 0x240   : > { %v8632_v7 = vpop.f32.mrb[17].mxu1 }
 0x241   : > { %v8633_v61 = vadd.f32 %v8632_v7, %v8631_v1 }
 0x242   : > { %10561 = vmatpush3.bf16.msra.mxu1 %v16379_v45  ;;  %v16390_v45 = vld [vmem:[#allocation37_spill] sm:$0xff] }
 0x243   : > { %v3144_v59 = vadd.f32 %v8633_v61, %v3040_v19  ;;  %10595 = vmatprep.subr.bf16.mxu1 %v16380_v52  ;;  %v16385_v19 = vld [vmem:[#allocation56_spill] sm:$0xff]  ;;  %v16387_v61 = vld [vmem:[#allocation58_spill] sm:$0xff] }
 0x245   : > { %4598 = vmatmul.mubr.f32.vlgmr.msra.gmra.mrb[26].mxu1 %v14639_v20 }
 0x246   : > { %10597 = vmatpush3.bf16.msra.mxu1 %v16381_v8  ;;  %4872 = vmatprep.mubr.f32.mxu1 %v14630_v56 }
 0x247   : > { %10599 = vmatprep.subr.bf16.mxu1 %v16382_v33  ;;  %v16391_v33 = vld [vmem:[#allocation70_spill] sm:$0xff] }
 0x24a   : > { %10601 = vmatpush3.bf16.msra.mxu1 %v16383_v24 }
 0x24b   : > { %10603 = vmatprep.subr.bf16.mxu1 %v16384_v50  ;;  %v16392_v50 = vld [vmem:[#allocation71_spill] sm:$0xff] }
 0x24e   : > { %10605 = vmatpush3.bf16.msra.mxu1 %v16385_v19 }
 0x24f   : > { %10607 = vmatprep.subr.bf16.mxu1 %v16386_v5  ;;  %v16393_v5 = vld [vmem:[#allocation72_spill] sm:$0xff] }
 0x252   : > { %10609 = vmatpush3.bf16.msra.mxu1 %v16387_v61  ;;  %v16398_v61 = vld [vmem:[#allocation78_spill] sm:$0xff] }
 0x253   : > { %10611 = vmatprep.subr.bf16.mxu1 %v16388_v43  ;;  %v16399_v43 = vld [vmem:[#allocation79_spill] sm:$0xff] }
 0x255   : > { %v8666_v37 = vpop.f32.mrb[18].mxu0 }
 0x256   : > { %v8667_v1 = vpop.f32.mrb[19].mxu0  ;;  %10613 = vmatpush3.bf16.msra.mxu1 %v16389_v9  ;;  %v16400_v9 = vld [vmem:[#allocation80_spill] sm:$0xff] }
 0x257   : > { %v8668_v7 = vadd.f32 %v8667_v1, %v8666_v37  ;;  %10615 = vmatprep.subr.bf16.mxu1 %v16390_v45  ;;  %v16394_v37 = vld [vmem:[#allocation73_spill] sm:$0xff]  ;;  %v16395_v1 = vld [vmem:[#allocation74_spill] sm:$0xff] }
 0x259   : > { %v3256_v44 = vadd.f32 %v8668_v7, %v3144_v59  ;;  %v16396_v59 = vld [vmem:[#allocation76_spill] sm:$0xff]  ;;  %v16397_v7 = vld [vmem:[#allocation77_spill] sm:$0xff] }
 0x25a   : > { %10617 = vmatpush3.bf16.msra.mxu1 %v16391_v33 }
 0x25b   : > { %10619 = vmatprep.subr.bf16.mxu1 %v16392_v50 }
 0x25e   : > { %10621 = vmatpush3.bf16.msra.mxu1 %v16393_v5  ;;  %v16404_v5 = vld [vmem:[#allocation88_spill] sm:$0xff] }
 0x25f   : > { %v8701_v52 = vpop.f32.mrb[18].mxu1  ;;  %10623 = vmatprep.subr.bf16.mxu1 %v16394_v37  ;;  %v16405_v37 = vld [vmem:[#allocation90_spill] sm:$0xff] }
 0x260   : > { %v8702_v8 = vpop.f32.mrb[19].mxu1 }
 0x261   : > { %v8703_v24 = vadd.f32 %v8702_v8, %v8701_v52  ;;  %v16402_v52 = vld [vmem:[#allocation82_spill] sm:$0xff] }
 0x262   : > { %10625 = vmatpush3.bf16.msra.mxu1 %v16395_v1  ;;  %v16406_v1 = vld [vmem:[#allocation91_spill] sm:$0xff] }
 0x263   : > { %v3488_v19 = vadd.f32 %v8703_v24, %v3256_v44  ;;  %10659 = vmatprep.subr.bf16.mxu1 %v16396_v59  ;;  %v16401_v44 = vld [vmem:[#allocation81_spill] sm:$0xff] }
 0x264   : > { %v16403_v24 = vld [vmem:[#allocation85_spill] sm:$0xff] }
 0x265   : > { %4874 = vmatmul.mubr.f32.vlgmr.msra.gmra.mrb[28].mxu1 %v14633_v10 }
 0x266   : > { %10661 = vmatpush3.bf16.msra.mxu1 %v16397_v7 }
 0x267   : > { %10663 = vmatprep.subr.bf16.mxu1 %v16398_v61 }
 0x26a   : > { %10665 = vmatpush3.bf16.msra.mxu1 %v16399_v43 }
 0x26b   : > { %10667 = vmatprep.subr.bf16.mxu1 %v16400_v9 }
 0x26e   : > { %10669 = vmatpush3.bf16.msra.mxu1 %v16401_v44 }
 0x26f   : > { %10671 = vmatprep.subr.bf16.mxu1 %v16402_v52 }
 0x272   : > { %10673 = vmatpush3.bf16.msra.mxu1 %v16403_v24 }
 0x273   : > { %10675 = vmatprep.subr.bf16.mxu1 %v16404_v5 }
 0x275   : > { %v8736_v45 = vpop.f32.mrb[20].mxu0 }
 0x276   : > { %v8737_v8 = vpop.f32.mrb[21].mxu0  ;;  %10677 = vmatpush3.bf16.msra.mxu1 %v16405_v37 }
 0x277   : > { %v8738_v33 = vadd.f32 %v8737_v8, %v8736_v45  ;;  %10679 = vmatprep.subr.bf16.mxu1 %v16406_v1  ;;  %v16408_v8 = vld [vmem:[#allocation96_spill] sm:$0xff] }
 0x279   : > { %v3626_v50 = vadd.f32 %v8738_v33, %v3488_v19  ;;  %v14714_v19 = vsub.f32 %v424_v14, %v14706_v58  ;;  %v14717_v33 = vsub.f32 %v423_v46, %v14710_v35  ;;  %v16411_v46 = vld [vmem:[#allocation103_spill] sm:$0xff] }
 0x27a   : > { %10681 = vmatpush3.bf16.msra.mxu1 %v16407_v21 }
 0x27b   : > { %10683 = vmatprep.subr.bf16.mxu1 %v16408_v8  ;;  %v15783_v31 = vand.u32 4294901760, %v14714_v19  ;;  %v15784_v41 = vand.u32 4294901760, %v14717_v33 }
 0x27e   : > { %10685 = vmatpush3.bf16.msra.mxu1 %v16409_v47 }
 0x27f   : > { %v8771_v15 = vpop.f32.mrb[20].mxu1  ;;  %10687 = vmatprep.subr.bf16.mxu1 %v16410_v4  ;;  %v16417_v4 = vld [vmem:[#allocation114_spill] sm:$0xff] }
 0x280   : > { %v8772_v54 = vpop.f32.mrb[21].mxu1 }
 0x281   : > { %v8773_v45 = vadd.f32 %v8772_v54, %v8771_v15  ;;  %v5082_v54 = vsub.f32 %v14714_v19, %v15783_v31  ;;  %v5088_v15 = vsub.f32 %v14717_v33, %v15784_v41  ;;  %v16416_v31 = vld [vmem:[#allocation112_spill] sm:$0xff]  ;;  %v16418_v41 = vld [vmem:[#allocation83_spill] sm:$0xff] }
 0x282   : > { %10689 = vmatpush3.bf16.msra.mxu1 %v16411_v46  ;;  %v16419_v46 = vld [vmem:[#allocation115_spill] sm:$0xff] }
 0x283   : > { %v3734_v62 = vadd.f32 %v8773_v45, %v3626_v50  ;;  %v5083_v14 = vand.u32 4294901760, %v5082_v54  ;;  %v5089_v50 = vand.u32 4294901760, %v5088_v15  ;;  %v16412_v45 = vld [vmem:[#allocation105_spill] sm:$0xff] }
 0x284   : > { %10723 = vmatprep.subr.bf16.mxu1 %v16412_v45  ;;  %v16420_v45 = vld [vmem:[#allocation116_spill] sm:$0xff] }
 0x285   : > { %5084 = vmatprep.mubr.f32.mxu1 %v5083_v14 }
 0x286   : > { %5090 = vmatmul.mubr.f32.vlgmr.msra.gmra.mrb[30].mxu1 %v5089_v50 }
 0x287   : > { %10725 = vmatpush3.bf16.msra.mxu1 %v16413_v32  ;;  %5457 = vmatprep.mubr.f32.mxu1 %v14714_v19  ;;  %v16421_v32 = vld [vmem:[#allocation117_spill] sm:$0xff] }
 0x288   : > { %10727 = vmatprep.subr.bf16.mxu1 %v16414_v34 }
 0x28b   : > { %10729 = vmatpush3.bf16.msra.mxu1 %v16415_v57  ;;  %v16422_v57 = vld [vmem:[#allocation118_spill] sm:$0xff] }
 0x28c   : > { %10731 = vmatprep.subr.bf16.mxu1 %v16416_v31 }
 0x28f   : > { %10733 = vmatpush3.bf16.msra.mxu1 %v16417_v4  ;;  %v16423_v4 = vld [vmem:[#allocation119_spill] sm:$0xff] }
 0x290   : > { %10735 = vmatprep.subr.bf16.mxu1 %v16418_v41 }
 0x293   : > { %10737 = vmatpush3.bf16.msra.mxu1 %v16419_v46 }
 0x294   : > { %10739 = vmatprep.subr.bf16.mxu1 %v16420_v45 }
 0x295   : > { %v8806_v54 = vpop.f32.mrb[22].mxu0 }
 0x296   : > { %v8807_v15 = vpop.f32.mrb[23].mxu0 }
 0x297   : > { %v8808_v14 = vadd.f32 %v8807_v15, %v8806_v54  ;;  %10741 = vmatpush3.bf16.msra.mxu1 %v16421_v32  ;;  %v15787_v54 = vstv %s14740_s22  ;;  %v16427_v32 = vld [vmem:[#allocation123_spill] sm:$0xff] }
 0x298   : > { %10743 = vmatprep.subr.bf16.mxu1 %v16422_v57  ;;  %v16428_v57 = vld [vmem:[#allocation20_spill] sm:$0xff] }
 0x299   : > { %v3902_v50 = vadd.f32 %v8808_v14, %v3734_v62  ;;  %v16425_v62 = vld [vmem:[#allocation121_spill] sm:$0xff]  ;;  %v16426_v14 = vld [vmem:[#allocation122_spill] sm:$0xff] }
 0x29b   : > { %10745 = vmatpush3.bf16.msra.mxu1 %v16423_v4  ;;  %v16433_v4 = vld [vmem:[#allocation126_spill] sm:$0xff] }
 0x29c   : > { %10747 = vmatprep.subr.bf16.mxu1 %v16424_v26  ;;  %v16429_v26 = vld [vmem:[#allocation21_spill] sm:$0xff] }
 0x29f   : > { %v8841_v34 = vpop.f32.mrb[22].mxu1  ;;  %10749 = vmatpush3.bf16.msra.mxu1 %v16425_v62  ;;  %v16436_v62 = vld [vmem:[#allocation28_spill] sm:$0xff] }
 0x2a0   : > { %v8842_v31 = vpop.f32.mrb[23].mxu1  ;;  %10751 = vmatprep.subr.bf16.mxu1 %v16426_v14  ;;  %v16438_v14 = vld [vmem:[#allocation30_spill] sm:$0xff] }
 0x2a1   : > { %v8843_v41 = vadd.f32 %v8842_v31, %v8841_v34  ;;  %v16431_v34 = vld [vmem:[#allocation125_spill] sm:$0xff]  ;;  %v16432_v31 = vld [vmem:[#allocation24_spill] sm:$0xff] }
 0x2a3   : > { %v4006_v46 = vadd.f32 %v8843_v41, %v3902_v50  ;;  %10753 = vmatpush3.bf16.msra.mxu1 %v16427_v32  ;;  %v16430_v50 = vld [vmem:[#allocation124_spill] sm:$0xff]  ;;  %v16434_v41 = vld [vmem:[#allocation26_spill] sm:$0xff] }
 0x2a4   : > { %10787 = vmatprep.subr.bf16.mxu1 %v16430_v50  ;;  %v16440_v32 = vld [vmem:[#allocation32_spill] sm:$0xff]  ;;  %v16443_v50 = vld [vmem:[#allocation130_spill] sm:$0xff] }
 0x2a5   : > { %vm4009_vm1 = vcmp.ge.f32.partialorder %v4006_v46, 0.0  ;;  %v4011_v15 = vmul.f32 %v15787_v54, %v4006_v46  ;;  %v16471_v54 = vld [vmem:[#allocation157_spill] sm:$0xff] }
 0x2a6   : > { %5460 = vmatmul.mubr.f32.vlgmr.msra.gmra.mrb[32].mxu1 %v14717_v33 }
 0x2a7   : > { %v4012_v45 = vsel %vm4009_vm1, %v4006_v46, %v4011_v15  ;;  %10789 = vmatpush3.bf16.msra.mxu1 %v16431_v34  ;;  %5734 = vmatprep.mubr.f32.mxu1 %v14706_v58  ;;  %v16435_v46 = vld [vmem:[#allocation127_spill] sm:$0xff]  ;;  %v16444_v34 = vld [vmem:[#allocation36_spill] sm:$0xff] }
 0x2a8   : > { %9691 = vmatmul.mubr.msk.f32.vlgmr.msra.gmra.mrb[24].mxu0 %vm4013_vm2, %v4012_v45  ;;  %10791 = vmatprep.subr.bf16.mxu1 %v16433_v4  ;;  %v16437_v15 = vld [vmem:[#allocation75_spill] sm:$0xff]  ;;  %v16439_v45 = vld [vmem:[#allocation128_spill] sm:$0xff] }
 0x2a9   : > { %10501 = vmatpush3.bf16.msra.mxu0 %v16428_v57  ;;  %4458 = vmatprep.mubr.f32.mxu0 %v14630_v56  ;;  %v16441_v57 = vld [vmem:[#allocation129_spill] sm:$0xff]  ;;  %v16446_v4 = vld [vmem:[#allocation39_spill] sm:$0xff] }
 0x2aa   : > { %10503 = vmatprep.subr.bf16.mxu0 %v16429_v26  ;;  %v16442_v26 = vld [vmem:[#allocation34_spill] sm:$0xff] }
 0x2ab   : > { %10793 = vmatpush3.bf16.msra.mxu1 %v16435_v46  ;;  %v16448_v46 = vld [vmem:[#allocation40_spill] sm:$0xff] }
 0x2ac   : > { %10795 = vmatprep.subr.bf16.mxu1 %v16437_v15  ;;  %v16450_v15 = vld [vmem:[#allocation42_spill] sm:$0xff] }
 0x2ad   : > { %10505 = vmatpush3.bf16.msra.mxu0 %v16432_v31  ;;  %v16445_v31 = vld [vmem:[#allocation131_spill] sm:$0xff] }
 0x2ae   : > { %10507 = vmatprep.subr.bf16.mxu0 %v16434_v41  ;;  %v16447_v41 = vld [vmem:[#allocation132_spill] sm:$0xff] }
 0x2af   : > { %10797 = vmatpush3.bf16.msra.mxu1 %v16439_v45  ;;  %v16452_v45 = vld [vmem:[#allocation44_spill] sm:$0xff] }
 0x2b0   : > { %10799 = vmatprep.subr.bf16.mxu1 %v16441_v57  ;;  %v16454_v57 = vld [vmem:[#allocation47_spill] sm:$0xff] }
 0x2b1   : > { %10509 = vmatpush3.bf16.msra.mxu0 %v16436_v62  ;;  %v16449_v62 = vld [vmem:[#allocation133_spill] sm:$0xff] }
 0x2b2   : > { %10511 = vmatprep.subr.bf16.mxu0 %v16438_v14  ;;  %v16451_v14 = vld [vmem:[#allocation134_spill] sm:$0xff] }
 0x2b3   : > { %10801 = vmatpush3.bf16.msra.mxu1 %v16443_v50  ;;  %v16456_v50 = vld [vmem:[#allocation50_spill] sm:$0xff] }
 0x2b4   : > { %10803 = vmatprep.subr.bf16.mxu1 %v16445_v31  ;;  %v16458_v31 = vld [vmem:[#allocation138_spill] sm:$0xff] }
 0x2b5   : > { %10513 = vmatpush3.bf16.msra.mxu0 %v16440_v32  ;;  %v16453_v32 = vld [vmem:[#allocation135_spill] sm:$0xff] }
 0x2b6   : > { %10515 = vmatprep.subr.bf16.mxu0 %v16442_v26  ;;  %v16455_v26 = vld [vmem:[#allocation136_spill] sm:$0xff] }
 0x2b7   : > { %10805 = vmatpush3.bf16.msra.mxu1 %v16447_v41  ;;  %v16460_v41 = vld [vmem:[#allocation140_spill] sm:$0xff] }
 0x2b8   : > { %10807 = vmatprep.subr.bf16.mxu1 %v16449_v62  ;;  %v16462_v62 = vld [vmem:[#allocation142_spill] sm:$0xff] }
 0x2b9   : > { %10517 = vmatpush3.bf16.msra.mxu0 %v16444_v34  ;;  %v16457_v34 = vld [vmem:[#allocation137_spill] sm:$0xff] }
 0x2ba   : > { %10519 = vmatprep.subr.bf16.mxu0 %v16446_v4  ;;  %v16459_v4 = vand.u32 4294901760, %v14636_v22  ;;  %v16464_v22 = vld [vmem:[#allocation144_spill] sm:$0xff] }
 0x2bb   : > { %10809 = vmatpush3.bf16.msra.mxu1 %v16451_v14  ;;  %v16465_v14 = vld [vmem:[#allocation145_spill] sm:$0xff] }
 0x2bc   : > { %10811 = vmatprep.subr.bf16.mxu1 %v16453_v32  ;;  %v16467_v32 = vld [vmem:[#allocation150_spill] sm:$0xff] }
 0x2bd   : > { %10521 = vmatpush3.bf16.msra.mxu0 %v16448_v46  ;;  %v16461_v46 = vld [vmem:[#allocation141_spill] sm:$0xff] }
 0x2be   : > { %10523 = vmatprep.subr.bf16.mxu0 %v16450_v15  ;;  %v16463_v15 = vld [vmem:[#allocation143_spill] sm:$0xff] }
 0x2bf   : > { %10813 = vmatpush3.bf16.msra.mxu1 %v16455_v26  ;;  %v16469_v26 = vld [vmem:[#allocation153_spill] sm:$0xff] }
 0x2c0   : > { %10815 = vmatprep.subr.bf16.mxu1 %v16457_v34  ;;  %v426_v34 = vld [vmem:[%s14627_s16 + $0x28] sm:$0xff] }
 0x2c1   : > { %10525 = vmatpush3.bf16.msra.mxu0 %v16452_v45  ;;  %v16466_v45 = vld [vmem:[#allocation146_spill] sm:$0xff] }
 0x2c2   : > { %10527 = vmatprep.subr.bf16.mxu0 %v16454_v57  ;;  %v16468_v57 = vld [vmem:[#allocation151_spill] sm:$0xff] }
 0x2c3   : > { %10817 = vmatpush3.bf16.msra.mxu1 %v16458_v31  ;;  %v14816_v31 = vand.u32 4294901760, %v426_v34 }
 0x2c4   : > { %10851 = vmatprep.subr.bf16.mxu1 %v16460_v41 }
 0x2c5   : > { %10529 = vmatpush3.bf16.msra.mxu0 %v16456_v50  ;;  %v16470_v50 = vld [vmem:[#allocation156_spill] sm:$0xff] }
 0x2c6   : > { %10563 = vmatprep.subr.bf16.mxu0 %v16345_v39  ;;  %5736 = vmatmul.mubr.f32.vlgmr.msra.gmra.mrb[34].mxu1 %v14710_v35 }
 0x2c7   : > { %10853 = vmatpush3.bf16.msra.mxu1 %v16461_v46 }
 0x2c8   : > { %4460 = vmatmul.mubr.f32.vlgmr.msra.gmra.mrb[26].mxu0 %v14633_v10  ;;  %10855 = vmatprep.subr.bf16.mxu1 %v16462_v62 }
 0x2c9   : > { %10565 = vmatpush3.bf16.msra.mxu0 %v16346_v49  ;;  %4702 = vmatprep.mubr.f32.mxu0 %v16459_v4  ;;  %v425_v4 = vld [vmem:[%s14627_s16 + $0x20] sm:$0xff] }
 0x2ca   : > { %10567 = vmatprep.subr.bf16.mxu0 %v16347_v36 }
 0x2cb   : > { %10857 = vmatpush3.bf16.msra.mxu1 %v16463_v15  ;;  %v16475_v15 = vand.u32 4294901760, %v14639_v20  ;;  %v16479_v20 = vld [vmem:[#allocation172_spill] sm:$0xff] }
 0x2cc   : > { %10859 = vmatprep.subr.bf16.mxu1 %v16464_v22  ;;  %v16474_v22 = vld [vmem:[#allocation165_spill] sm:$0xff] }
 0x2cd   : > { %10569 = vmatpush3.bf16.msra.mxu0 %v16348_v48 }
 0x2ce   : > { %10571 = vmatprep.subr.bf16.mxu0 %v16349_v42 }
 0x2cf   : > { %10861 = vmatpush3.bf16.msra.mxu1 %v16465_v14  ;;  %v16473_v14 = vld [vmem:[#allocation163_spill] sm:$0xff] }
 0x2d0   : > { %10863 = vmatprep.subr.bf16.mxu1 %v16466_v45 }
 0x2d1   : > { %10573 = vmatpush3.bf16.msra.mxu0 %v16350_v63 }
 0x2d2   : > { %10575 = vmatprep.subr.bf16.mxu0 %v16351_v0 }
 0x2d3   : > { %10865 = vmatpush3.bf16.msra.mxu1 %v16467_v32  ;;  %v14820_v32 = vand.u32 4294901760, %v425_v4 }
 0x2d4   : > { %10867 = vmatprep.subr.bf16.mxu1 %v16468_v57  ;;  %v16472_v57 = vld [vmem:[#allocation159_spill] sm:$0xff] }
 0x2d5   : > { %10577 = vmatpush3.bf16.msra.mxu0 %v16352_v30 }
 0x2d6   : > { %10579 = vmatprep.subr.bf16.mxu0 %v16353_v3 }
 0x2d7   : > { %10869 = vmatpush3.bf16.msra.mxu1 %v16469_v26  ;;  %v14825_v26 = vsub.f32 %v426_v34, %v14816_v31 }
 0x2d8   : > { %10871 = vmatprep.subr.bf16.mxu1 %v16470_v50  ;;  %v14829_v50 = vsub.f32 %v425_v4, %v14820_v32 }
 0x2d9   : > { %10581 = vmatpush3.bf16.msra.mxu0 %v16354_v28  ;;  %v15788_v45 = vand.u32 4294901760, %v14825_v26 }
 0x2da   : > { %10583 = vmatprep.subr.bf16.mxu0 %v16355_v53 }
 0x2db   : > { %10873 = vmatpush3.bf16.msra.mxu1 %v16471_v54  ;;  %v5949_v54 = vand.u32 4294901760, %v14829_v50  ;;  %v5944_v34 = vsub.f32 %v14825_v26, %v15788_v45  ;;  %v16478_v45 = vld [vmem:[#allocation171_spill] sm:$0xff] }
 0x2dc   : > { %10875 = vmatprep.subr.bf16.mxu1 %v16472_v57 }
 0x2dd   : > { %10585 = vmatpush3.bf16.msra.mxu0 %v16356_v18  ;;  %v5950_v4 = vsub.f32 %v14829_v50, %v5949_v54  ;;  %v5945_v57 = vand.u32 4294901760, %v5944_v34  ;;  %v16501_v34 = vld [vmem:[#allocation191_spill] sm:$0xff] }
 0x2de   : > { %10587 = vmatprep.subr.bf16.mxu0 %v16357_v6 }
 0x2df   : > { %10877 = vmatpush3.bf16.msra.mxu1 %v16473_v14  ;;  %v16476_v14 = vld [vmem:[#allocation167_spill] sm:$0xff]  ;;  %v5951_v62 = vand.u32 4294901760, %v5950_v4  ;;  %5946 = vmatprep.mubr.f32.mxu1 %v5945_v57  ;;  %v16499_v57 = vld [vmem:[#allocation190_spill] sm:$0xff] }
 0x2e0   : > { %10879 = vmatprep.subr.bf16.mxu1 %v16474_v22  ;;  %v16502_v4 = vld [vmem:[#allocation94_spill] sm:$0xff] }
 0x2e1   : > { %10589 = vmatpush3.bf16.msra.mxu0 %v16358_v13 }
 0x2e2   : > { %10591 = vmatprep.subr.bf16.mxu0 %v16359_v40 }
 0x2e3   : > { %10881 = vmatpush3.bf16.msra.mxu1 %v16476_v14 }
 0x2e5   : > { %10593 = vmatpush3.bf16.msra.mxu0 %v16360_v55 }
 0x2e6   : > { %10627 = vmatprep.subr.bf16.mxu0 %v16345_v39  ;;  %5952 = vmatmul.mubr.f32.vlgmr.msra.gmra.mrb[36].mxu1 %v5951_v62  ;;  %v16477_v39 = vld [vmem:[#allocation169_spill] sm:$0xff]  ;;  %v16492_v62 = vld [vmem:[#allocation84_spill] sm:$0xff] }
 0x2e7   : > { %10915 = vmatprep.subr.bf16.mxu1 %v16477_v39  ;;  %6319 = vmatprep.mubr.f32.mxu1 %v14825_v26  ;;  %v16503_v39 = vld [vmem:[#allocation139_spill] sm:$0xff] }
 0x2e8   : > { %4706 = vmatmul.mubr.f32.vlgmr.msra.gmra.mrb[28].mxu0 %v16475_v15  ;;  %10917 = vmatpush3.bf16.msra.mxu1 %v16478_v45  ;;  %v16480_v15 = vld [vmem:[#allocation175_spill] sm:$0xff]  ;;  %v16496_v45 = vld [vmem:[#allocation188_spill] sm:$0xff] }
 0x2e9   : > { %10629 = vmatpush3.bf16.msra.mxu0 %v16346_v49  ;;  %4976 = vmatprep.mubr.f32.mxu0 %v14630_v56  ;;  %v16481_v49 = vld [vmem:[#allocation176_spill] sm:$0xff]  ;;  %v16483_v56 = vld [vmem:[#allocation178_spill] sm:$0xff] }
 0x2ea   : > { %10631 = vmatprep.subr.bf16.mxu0 %v16347_v36  ;;  %10919 = vmatprep.subr.bf16.mxu1 %v16479_v20  ;;  %v16482_v36 = vld [vmem:[#allocation147_spill] sm:$0xff] }
 0x2eb   : > { %v16504_v20 = vld [vmem:[#allocation95_spill] sm:$0xff] }
 0x2ec   : > { %10921 = vmatpush3.bf16.msra.mxu1 %v16480_v15  ;;  %v16505_v15 = vld [vmem:[#allocation192_spill] sm:$0xff] }
 0x2ed   : > { %10633 = vmatpush3.bf16.msra.mxu0 %v16348_v48  ;;  %10923 = vmatprep.subr.bf16.mxu1 %v16481_v49  ;;  %v16484_v48 = vld [vmem:[#allocation179_spill] sm:$0xff]  ;;  %v16506_v49 = vld [vmem:[#allocation97_spill] sm:$0xff] }
 0x2ee   : > { %10635 = vmatprep.subr.bf16.mxu0 %v16349_v42  ;;  %v16485_v42 = vld [vmem:[#allocation180_spill] sm:$0xff] }
 0x2f0   : > { %10925 = vmatpush3.bf16.msra.mxu1 %v16482_v36  ;;  %v16507_v36 = vld [vmem:[#allocation193_spill] sm:$0xff] }
 0x2f1   : > { %10637 = vmatpush3.bf16.msra.mxu0 %v16350_v63  ;;  %10927 = vmatprep.subr.bf16.mxu1 %v16483_v56  ;;  %v16486_v63 = vld [vmem:[#allocation181_spill] sm:$0xff]  ;;  %v16508_v56 = vld [vmem:[#allocation98_spill] sm:$0xff] }
 0x2f2   : > { %10639 = vmatprep.subr.bf16.mxu0 %v16351_v0  ;;  %v16487_v0 = vld [vmem:[#allocation182_spill] sm:$0xff] }
 0x2f4   : > { %10929 = vmatpush3.bf16.msra.mxu1 %v16484_v48 }
 0x2f5   : > { %10641 = vmatpush3.bf16.msra.mxu0 %v16352_v30  ;;  %10931 = vmatprep.subr.bf16.mxu1 %v16485_v42  ;;  %v16488_v30 = vld [vmem:[#allocation183_spill] sm:$0xff]  ;;  %v16509_v42 = vld [vmem:[#allocation194_spill] sm:$0xff] }
 0x2f6   : > { %10643 = vmatprep.subr.bf16.mxu0 %v16353_v3  ;;  %v16489_v3 = vld [vmem:[#allocation184_spill] sm:$0xff] }
 0x2f8   : > { %10933 = vmatpush3.bf16.msra.mxu1 %v16486_v63  ;;  %v8878_v48 = vpop.f32.mrb[24].mxu1  ;;  %v16510_v63 = vld [vmem:[#allocation100_spill] sm:$0xff] }
 0x2f9   : > { %10645 = vmatpush3.bf16.msra.mxu0 %v16354_v28  ;;  %10935 = vmatprep.subr.bf16.mxu1 %v16487_v0  ;;  %v16490_v28 = vld [vmem:[#allocation185_spill] sm:$0xff]  ;;  %v8879_v0 = vpop.f32.mrb[25].mxu1 }
 0x2fa   : > { %10647 = vmatprep.subr.bf16.mxu0 %v16355_v53  ;;  %v16491_v53 = vld [vmem:[#allocation186_spill] sm:$0xff] }
 0x2fc   : > { %10937 = vmatpush3.bf16.msra.mxu1 %v16488_v30  ;;  %v16511_v30 = vld [vmem:[#allocation195_spill] sm:$0xff] }
 0x2fd   : > { %10649 = vmatpush3.bf16.msra.mxu0 %v16356_v18  ;;  %10939 = vmatprep.subr.bf16.mxu1 %v16489_v3  ;;  %v16493_v18 = vld [vmem:[#allocation187_spill] sm:$0xff]  ;;  %v16512_v3 = vld [vmem:[#allocation102_spill] sm:$0xff] }
 0x2fe   : > { %10651 = vmatprep.subr.bf16.mxu0 %v16357_v6  ;;  %v16494_v6 = vld [vmem:[#allocation86_spill] sm:$0xff] }
 0x300   : > { %10941 = vmatpush3.bf16.msra.mxu1 %v16490_v28  ;;  %v14903_v28 = vadd.f32 %v8879_v0, %v8878_v48 }
 0x301   : > { %10653 = vmatpush3.bf16.msra.mxu0 %v16358_v13  ;;  %10943 = vmatprep.subr.bf16.mxu1 %v16491_v53  ;;  %v16495_v13 = vld [vmem:[#allocation87_spill] sm:$0xff]  ;;  %v16513_v53 = vld [vmem:[#allocation196_spill] sm:$0xff] }
 0x302   : > { %10655 = vmatprep.subr.bf16.mxu0 %v16359_v40  ;;  %v16497_v40 = vld [vmem:[#allocation189_spill] sm:$0xff] }
 0x304   : > { %10945 = vmatpush3.bf16.msra.mxu1 %v16493_v18  ;;  %v16515_v18 = vld [vmem:[#allocation197_spill] sm:$0xff] }
 0x305   : > { %10657 = vmatpush3.bf16.msra.mxu0 %v16360_v55  ;;  %10979 = vmatprep.subr.bf16.mxu1 %v16496_v45  ;;  %v16498_v55 = vld [vmem:[#allocation89_spill] sm:$0xff] }
 0x306   : > { %10691 = vmatprep.subr.bf16.mxu0 %v16492_v62  ;;  %v16514_v62 = vld [vmem:[#allocation104_spill] sm:$0xff] }
 0x307   : > { %6322 = vmatmul.mubr.f32.vlgmr.msra.gmra.mrb[38].mxu1 %v14829_v50 }
 0x308   : > { %4978 = vmatmul.mubr.f32.vlgmr.msra.gmra.mrb[30].mxu0 %v14633_v10  ;;  %10981 = vmatpush3.bf16.msra.mxu1 %v16497_v40  ;;  %v16500_v10 = vld [vmem:[#allocation92_spill] sm:$0xff] }
 0x309   : > { %10693 = vmatpush3.bf16.msra.mxu0 %v16494_v6  ;;  %5320 = vmatprep.mubr.f32.mxu0 %v14706_v58  ;;  %v16516_v6 = vld [vmem:[#allocation106_spill] sm:$0xff] }
 0x30a   : > { %10695 = vmatprep.subr.bf16.mxu0 %v16495_v13  ;;  %6596 = vmatprep.mubr.f32.mxu1 %v14816_v31 }
 0x30b   : > { %10983 = vmatprep.subr.bf16.mxu1 %v16499_v57  ;;  %v16518_v57 = vld [vmem:[#allocation109_spill] sm:$0xff] }
 0x30c   : > { %10985 = vmatpush3.bf16.msra.mxu1 %v16501_v34  ;;  %v16520_v34 = vld [vmem:[#allocation110_spill] sm:$0xff] }
 0x30d   : > { %10697 = vmatpush3.bf16.msra.mxu0 %v16498_v55  ;;  %10987 = vmatprep.subr.bf16.mxu1 %v16503_v39  ;;  %v16517_v55 = vld [vmem:[#allocation198_spill] sm:$0xff]  ;;  %v16522_v39 = vld [vmem:[#allocation113_spill] sm:$0xff] }
 0x30e   : > { %10699 = vmatprep.subr.bf16.mxu0 %v16500_v10  ;;  %v16519_v10 = vld [vmem:[#allocation199_spill] sm:$0xff] }
 0x310   : > { %10989 = vmatpush3.bf16.msra.mxu1 %v16505_v15  ;;  %v16524_v15 = vld [vmem:[#allocation203_spill] sm:$0xff] }
 0x311   : > { %10701 = vmatpush3.bf16.msra.mxu0 %v16502_v4  ;;  %10991 = vmatprep.subr.bf16.mxu1 %v16507_v36  ;;  %v16521_v4 = vld [vmem:[#allocation200_spill] sm:$0xff]  ;;  %v14948_v36 = vld [vmem:[%s14627_s16 + $0x38] sm:$0xff] }
 0x312   : > { %10703 = vmatprep.subr.bf16.mxu0 %v16504_v20  ;;  %v16523_v20 = vld [vmem:[#allocation201_spill] sm:$0xff]  ;;  %v14951_v48 = vand.u32 4294901760, %v14948_v36 }
 0x314   : > { %10993 = vmatpush3.bf16.msra.mxu1 %v16509_v42  ;;  %v14954_v42 = vld [vmem:[%s14627_s16 + $0x30] sm:$0xff] }
 0x315   : > { %10705 = vmatpush3.bf16.msra.mxu0 %v16506_v49  ;;  %10995 = vmatprep.subr.bf16.mxu1 %v16511_v30  ;;  %v16525_v49 = vand.u32 4294901760, %v14714_v19  ;;  %v14960_v0 = vand.u32 4294901760, %v14954_v42  ;;  %v16526_v30 = vld [vmem:[#allocation222_spill] sm:$0xff] }
 0x316   : > { %10707 = vmatprep.subr.bf16.mxu0 %v16508_v56 }
 0x318   : > { %10997 = vmatpush3.bf16.msra.mxu1 %v16513_v53  ;;  %v8948_v13 = vpop.f32.mrb[26].mxu1  ;;  %v16527_v53 = vld [vmem:[#allocation101_spill] sm:$0xff] }
 0x319   : > { %10709 = vmatpush3.bf16.msra.mxu0 %v16510_v63  ;;  %10999 = vmatprep.subr.bf16.mxu1 %v16515_v18  ;;  %v8949_v45 = vpop.f32.mrb[27].mxu1 }
 0x31a   : > { %10711 = vmatprep.subr.bf16.mxu0 %v16512_v3  ;;  %v14909_v40 = vadd.f32 %v8949_v45, %v8948_v13  ;;  %v14966_v3 = vsub.f32 %v14948_v36, %v14951_v48  ;;  %v16529_v45 = vld [vmem:[#allocation103_spill] sm:$0xff] }
 0x31c   : > { %11001 = vmatpush3.bf16.msra.mxu1 %v16517_v55  ;;  %v6805_v18 = vand.u32 4294901760, %v14966_v3  ;;  %v16530_v55 = vld [vmem:[#allocation228_spill] sm:$0xff] }
 0x31d   : > { %10713 = vmatpush3.bf16.msra.mxu0 %v16514_v62  ;;  %11003 = vmatprep.subr.bf16.mxu1 %v16519_v10  ;;  %v14971_v62 = vsub.f32 %v14954_v42, %v14960_v0 }
 0x31e   : > { %10715 = vmatprep.subr.bf16.mxu0 %v16516_v6  ;;  %v16528_v6 = vld [vmem:[#allocation224_spill] sm:$0xff] }
 0x31f   : > { %v6811_v13 = vand.u32 4294901760, %v14971_v62 }
 0x320   : > { %11005 = vmatpush3.bf16.msra.mxu1 %v16521_v4  ;;  %v16531_v4 = vand.u32 4294901760, %v14717_v33  ;;  %v16535_v33 = vld [vmem:[#allocation235_spill] sm:$0xff] }
 0x321   : > { %10717 = vmatpush3.bf16.msra.mxu0 %v16518_v57  ;;  %11007 = vmatprep.subr.bf16.mxu1 %v16523_v20  ;;  %v6806_v57 = vsub.f32 %v14966_v3, %v6805_v18  ;;  %v6812_v10 = vsub.f32 %v14971_v62, %v6811_v13 }
 0x322   : > { %10719 = vmatprep.subr.bf16.mxu0 %v16520_v34 }
 0x323   : > { %v6807_v34 = vand.u32 4294901760, %v6806_v57  ;;  %v6813_v20 = vand.u32 4294901760, %v6812_v10  ;;  %v16548_v57 = vld [vmem:[#allocation148_spill] sm:$0xff]  ;;  %v16550_v10 = vld [vmem:[#allocation149_spill] sm:$0xff] }
 0x324   : > { %11009 = vmatpush3.bf16.msra.mxu1 %v16524_v15  ;;  %v16534_v15 = vld [vmem:[#allocation234_spill] sm:$0xff] }
 0x325   : > { %10721 = vmatpush3.bf16.msra.mxu0 %v16522_v39  ;;  %11043 = vmatprep.subr.bf16.mxu1 %v16274_v16  ;;  %v16532_v39 = vld [vmem:[#allocation230_spill] sm:$0xff] }
 0x326   : > { %10755 = vmatprep.subr.bf16.mxu0 %v16396_v59 }
 0x327   : > { %6598 = vmatmul.mubr.f32.vlgmr.msra.gmra.mrb[40].mxu1 %v14820_v32 }
 0x328   : > { %5322 = vmatmul.mubr.f32.vlgmr.msra.gmra.mrb[32].mxu0 %v14710_v35  ;;  %11045 = vmatpush3.bf16.msra.mxu1 %v16279_v29 }
 0x329   : > { %10757 = vmatpush3.bf16.msra.mxu0 %v16397_v7  ;;  %5564 = vmatprep.mubr.f32.mxu0 %v16525_v49  ;;  %v16536_v49 = vld [vmem:[#allocation238_spill] sm:$0xff] }
 0x32a   : > { %10759 = vmatprep.subr.bf16.mxu0 %v16398_v61  ;;  %11047 = vmatprep.subr.bf16.mxu1 %v16281_v27 }
 0x32b   : > { %6808 = vmatprep.mubr.f32.mxu1 %v6807_v34  ;;  %v16552_v34 = vld [vmem:[#allocation242_spill] sm:$0xff] }
 0x32c   : > { %11049 = vmatpush3.bf16.msra.mxu1 %v13986_v25 }
 0x32d   : > { %10761 = vmatpush3.bf16.msra.mxu0 %v16399_v43  ;;  %11051 = vmatprep.subr.bf16.mxu1 %v16284_v51 }
 0x32e   : > { %10763 = vmatprep.subr.bf16.mxu0 %v16400_v9 }
 0x330   : > { %11053 = vmatpush3.bf16.msra.mxu1 %v16287_v2 }
 0x331   : > { %10765 = vmatpush3.bf16.msra.mxu0 %v16401_v44  ;;  %11055 = vmatprep.subr.bf16.mxu1 %v16288_v23 }
 0x332   : > { %10767 = vmatprep.subr.bf16.mxu0 %v16402_v52 }
 0x334   : > { %11057 = vmatpush3.bf16.msra.mxu1 %v16291_v11 }
 0x335   : > { %10769 = vmatpush3.bf16.msra.mxu0 %v16403_v24  ;;  %11059 = vmatprep.subr.bf16.mxu1 %v14081_v17 }
 0x336   : > { %10771 = vmatprep.subr.bf16.mxu0 %v16404_v5 }
 0x338   : > { %11061 = vmatpush3.bf16.msra.mxu1 %v16296_v12  ;;  %v9018_v19 = vpop.f32.mrb[28].mxu1 }
 0x339   : > { %10773 = vmatpush3.bf16.msra.mxu0 %v16405_v37  ;;  %11063 = vmatprep.subr.bf16.mxu1 %v16297_v60  ;;  %v9019_v56 = vpop.f32.mrb[29].mxu1 }
 0x33a   : > { %10775 = vmatprep.subr.bf16.mxu0 %v16406_v1  ;;  %v14956_v63 = vadd.f32 %v9019_v56, %v9018_v19 }
 0x33c   : > { %11065 = vmatpush3.bf16.msra.mxu1 %v14179_v38 }
 0x33d   : > { %10777 = vmatpush3.bf16.msra.mxu0 %v16407_v21  ;;  %11067 = vmatprep.subr.bf16.mxu1 %v16526_v30 }
 0x33e   : > { %10779 = vmatprep.subr.bf16.mxu0 %v16408_v8 }
 0x340   : > { %11069 = vmatpush3.bf16.msra.mxu1 %v16528_v6 }
 0x341   : > { %10781 = vmatpush3.bf16.msra.mxu0 %v16409_v47  ;;  %11071 = vmatprep.subr.bf16.mxu1 %v16530_v55 }
 0x342   : > { %10783 = vmatprep.subr.bf16.mxu0 %v16527_v53 }
 0x344   : > { %11073 = vmatpush3.bf16.msra.mxu1 %v16532_v39 }
 0x345   : > { %10785 = vmatpush3.bf16.msra.mxu0 %v16529_v45 }
 0x346   : > { %10819 = vmatprep.subr.bf16.mxu0 %v16396_v59  ;;  %v16533_v59 = vld [vmem:[#allocation232_spill] sm:$0xff] }
 0x347   : > { %6814 = vmatmul.mubr.f32.vlgmr.msra.gmra.mrb[42].mxu1 %v6813_v20  ;;  %11107 = vmatprep.subr.bf16.mxu1 %v16533_v59  ;;  %v16557_v20 = vld [vmem:[#allocation243_spill] sm:$0xff]  ;;  %v16558_v59 = vld [vmem:[#allocation158_spill] sm:$0xff] }
 0x348   : > { %5568 = vmatmul.mubr.f32.vlgmr.msra.gmra.mrb[34].mxu0 %v16531_v4  ;;  %11109 = vmatpush3.bf16.msra.mxu1 %v16534_v15  ;;  %v16555_v4 = vld [vmem:[#allocation220_spill] sm:$0xff]  ;;  %v16559_v15 = vld [vmem:[#allocation202_spill] sm:$0xff] }
 0x349   : > { %10821 = vmatpush3.bf16.msra.mxu0 %v16397_v7  ;;  %5838 = vmatprep.mubr.f32.mxu0 %v14706_v58  ;;  %v16537_v58 = vld [vmem:[#allocation239_spill] sm:$0xff]  ;;  %v16538_v7 = vld [vmem:[#allocation241_spill] sm:$0xff] }
 0x34a   : > { %10823 = vmatprep.subr.bf16.mxu0 %v16398_v61  ;;  %7181 = vmatprep.mubr.f32.mxu1 %v14966_v3  ;;  %v16539_v61 = vld [vmem:[#allocation212_spill] sm:$0xff] }
 0x34b   : > { %11111 = vmatprep.subr.bf16.mxu1 %v16535_v33  ;;  %v16560_v33 = vld [vmem:[#allocation160_spill] sm:$0xff] }
 0x34c   : > { %11113 = vmatpush3.bf16.msra.mxu1 %v16536_v49  ;;  %v16561_v49 = vld [vmem:[#allocation244_spill] sm:$0xff] }
 0x34d   : > { %10825 = vmatpush3.bf16.msra.mxu0 %v16399_v43  ;;  %11115 = vmatprep.subr.bf16.mxu1 %v16537_v58  ;;  %v16540_v43 = vld [vmem:[#allocation204_spill] sm:$0xff]  ;;  %v16562_v58 = vld [vmem:[#allocation161_spill] sm:$0xff] }
 0x34e   : > { %10827 = vmatprep.subr.bf16.mxu0 %v16400_v9  ;;  %v16541_v9 = vld [vmem:[#allocation213_spill] sm:$0xff] }
 0x350   : > { %11117 = vmatpush3.bf16.msra.mxu1 %v16538_v7  ;;  %v16563_v7 = vld [vmem:[#allocation245_spill] sm:$0xff] }
 0x351   : > { %10829 = vmatpush3.bf16.msra.mxu0 %v16401_v44  ;;  %11119 = vmatprep.subr.bf16.mxu1 %v16539_v61  ;;  %v16542_v44 = vld [vmem:[#allocation214_spill] sm:$0xff] }
 0x352   : > { %10831 = vmatprep.subr.bf16.mxu0 %v16402_v52  ;;  %v16543_v52 = vld [vmem:[#allocation205_spill] sm:$0xff]  ;;  %v16564_v61 = vld [vmem:[#allocation162_spill] sm:$0xff] }
 0x354   : > { %11121 = vmatpush3.bf16.msra.mxu1 %v16540_v43  ;;  %v16565_v43 = vld [vmem:[#allocation246_spill] sm:$0xff] }
 0x355   : > { %10833 = vmatpush3.bf16.msra.mxu0 %v16403_v24  ;;  %11123 = vmatprep.subr.bf16.mxu1 %v16541_v9  ;;  %v16566_v9 = vld [vmem:[#allocation164_spill] sm:$0xff] }
 0x356   : > { %10835 = vmatprep.subr.bf16.mxu0 %v16404_v5  ;;  %v16544_v5 = vld [vmem:[#allocation206_spill] sm:$0xff] }
 0x358   : > { %11125 = vmatpush3.bf16.msra.mxu1 %v16542_v44  ;;  %v4088_v44 = vstv %s15037_s23 }
 0x359   : > { %10837 = vmatpush3.bf16.msra.mxu0 %v16405_v37  ;;  %11127 = vmatprep.subr.bf16.mxu1 %v16543_v52  ;;  %v9088_v24 = vpop.f32.mrb[30].mxu1  ;;  %v16545_v37 = vld [vmem:[#allocation207_spill] sm:$0xff] }
 0x35a   : > { %10839 = vmatprep.subr.bf16.mxu0 %v16406_v1  ;;  %v9089_v19 = vpop.f32.mrb[31].mxu1  ;;  %v16546_v1 = vld [vmem:[#allocation209_spill] sm:$0xff]  ;;  %v16567_v52 = vld [vmem:[#allocation247_spill] sm:$0xff] }
 0x35b   : > { %v15013_v56 = vadd.f32 %v9089_v19, %v9088_v24  ;;  %v16568_v24 = vld [vmem:[#allocation166_spill] sm:$0xff] }
 0x35c   : > { %11129 = vmatpush3.bf16.msra.mxu1 %v16544_v5 }
 0x35d   : > { %10841 = vmatpush3.bf16.msra.mxu0 %v16407_v21  ;;  %11131 = vmatprep.subr.bf16.mxu1 %v16545_v37  ;;  %v16547_v21 = vld [vmem:[#allocation211_spill] sm:$0xff] }
 0x35e   : > { %10843 = vmatprep.subr.bf16.mxu0 %v16408_v8  ;;  %v16549_v8 = vld [vmem:[#allocation216_spill] sm:$0xff] }
 0x360   : > { %11133 = vmatpush3.bf16.msra.mxu1 %v16546_v1  ;;  %v16569_v1 = vld [vmem:[#allocation248_spill] sm:$0xff] }
 0x361   : > { %10845 = vmatpush3.bf16.msra.mxu0 %v16409_v47  ;;  %11135 = vmatprep.subr.bf16.mxu1 %v16547_v21  ;;  %v16551_v47 = vld [vmem:[#allocation152_spill] sm:$0xff] }
 0x362   : > { %10847 = vmatprep.subr.bf16.mxu0 %v16527_v53  ;;  %v16553_v53 = vld [vmem:[#allocation218_spill] sm:$0xff]  ;;  %v16570_v21 = vld [vmem:[#allocation168_spill] sm:$0xff] }
 0x364   : > { %11137 = vmatpush3.bf16.msra.mxu1 %v16549_v8  ;;  %v16572_v8 = vld [vmem:[#allocation170_spill] sm:$0xff] }
 0x365   : > { %10849 = vmatpush3.bf16.msra.mxu0 %v16529_v45  ;;  %11171 = vmatprep.subr.bf16.mxu1 %v16552_v34  ;;  %v16554_v45 = vld [vmem:[#allocation154_spill] sm:$0xff] }
 0x366   : > { %10883 = vmatprep.subr.bf16.mxu0 %v16548_v57  ;;  %v16571_v57 = vld [vmem:[#allocation249_spill] sm:$0xff] }
 0x367   : > { %7184 = vmatmul.mubr.f32.vlgmr.msra.gmra.mrb[44].mxu1 %v14971_v62 }
 0x368   : > { %5840 = vmatmul.mubr.f32.vlgmr.msra.gmra.mrb[36].mxu0 %v14710_v35  ;;  %11173 = vmatpush3.bf16.msra.mxu1 %v16553_v53  ;;  %v16556_v35 = vld [vmem:[#allocation155_spill] sm:$0xff] }
 0x369   : > { %10885 = vmatpush3.bf16.msra.mxu0 %v16550_v10  ;;  %6182 = vmatprep.mubr.f32.mxu0 %v14816_v31 }
 0x36a   : > { %10887 = vmatprep.subr.bf16.mxu0 %v16551_v47  ;;  %7458 = vmatprep.mubr.f32.mxu1 %v14951_v48 }
 0x36b   : > { %11175 = vmatprep.subr.bf16.mxu1 %v16555_v4  ;;  %v16573_v4 = vld [vmem:[#allocation250_spill] sm:$0xff] }
 0x36c   : > { %11177 = vmatpush3.bf16.msra.mxu1 %v16557_v20  ;;  %v16575_v20 = vld [vmem:[#allocation251_spill] sm:$0xff] }
 0x36d   : > { %10889 = vmatpush3.bf16.msra.mxu0 %v16554_v45  ;;  %11179 = vmatprep.subr.bf16.mxu1 %v16559_v15  ;;  %v16577_v15 = vld [vmem:[#allocation252_spill] sm:$0xff] }
 0x36e   : > { %10891 = vmatprep.subr.bf16.mxu0 %v16556_v35  ;;  %v16574_v35 = vld [vmem:[#allocation173_spill] sm:$0xff] }
 0x370   : > { %11181 = vmatpush3.bf16.msra.mxu1 %v16561_v49  ;;  %v16579_v49 = vld [vmem:[#allocation253_spill] sm:$0xff] }
 0x371   : > { %10893 = vmatpush3.bf16.msra.mxu0 %v16558_v59  ;;  %11183 = vmatprep.subr.bf16.mxu1 %v16563_v7  ;;  %v16576_v59 = vld [vmem:[#allocation174_spill] sm:$0xff]  ;;  %v16581_v7 = vand.u32 4294901760, %v14825_v26 }
 0x372   : > { %10895 = vmatprep.subr.bf16.mxu0 %v16560_v33  ;;  %v16578_v33 = vld [vmem:[#allocation177_spill] sm:$0xff]  ;;  %v16589_v26 = vld [vmem:[#allocation150_spill] sm:$0xff] }
 0x374   : > { %11185 = vmatpush3.bf16.msra.mxu1 %v16565_v43  ;;  %v16583_v43 = vmov 0.0  }
 0x375   : > { %10897 = vmatpush3.bf16.msra.mxu0 %v16562_v58  ;;  %11187 = vmatprep.subr.bf16.mxu1 %v16567_v52  ;;  %v16580_v58 = vld [vmem:[#allocation254_spill] sm:$0xff]  ;;  %v16585_v52 = vld [vmem:[#allocation143_spill] sm:$0xff] }
 0x376   : > { %10899 = vmatprep.subr.bf16.mxu0 %v16564_v61  ;;  %v16582_v61 = vld [vmem:[#allocation142_spill] sm:$0xff] }
 0x378   : > { %11189 = vmatpush3.bf16.msra.mxu1 %v16569_v1  ;;  %v16591_v1 = vld [vmem:[#allocation153_spill] sm:$0xff] }
 0x379   : > { %10901 = vmatpush3.bf16.msra.mxu0 %v16566_v9  ;;  %11191 = vmatprep.subr.bf16.mxu1 %v16571_v57  ;;  %v9158_v47 = vpop.f32.mrb[32].mxu1  ;;  %v16584_v9 = vld [vmem:[#allocation11_spill] sm:$0xff] }
 0x37a   : > { %10903 = vmatprep.subr.bf16.mxu0 %v16568_v24  ;;  %v9159_v53 = vpop.f32.mrb[33].mxu1  ;;  %v16586_v24 = vld [vmem:[#allocation144_spill] sm:$0xff] }
 0x37b   : > { %v4083_v19 = vpop.f32.mrb[24].mxu0  ;;  %v15060_v45 = vadd.f32 %v9159_v53, %v9158_v47  ;;  %v16594_v53 = vld [vmem:[#allocation159_spill] sm:$0xff] }
 0x37c   : > { %v4089_v5 = vmul.f32 %v4088_v44, %v4083_v19  ;;  %v9692_v37 = vpop.f32.mrb[25].mxu0  ;;  %vm4087_vm3 = vcmp.ge.f32.partialorder %v4083_v19, 0.0  ;;  %11193 = vmatpush3.bf16.msra.mxu1 %v16573_v4 }
 0x37d   : > { %10905 = vmatpush3.bf16.msra.mxu0 %v16570_v21  ;;  %11195 = vmatprep.subr.bf16.mxu1 %v16575_v20  ;;  %v16590_v37 = vld [vmem:[#allocation151_spill] sm:$0xff]  ;;  %v16592_v21 = vld [vmem:[#allocation156_spill] sm:$0xff] }
 0x37e   : > { %10907 = vmatprep.subr.bf16.mxu0 %v16572_v8  ;;  %v15056_v10 = vsel %vm4087_vm3, %v4083_v19, %v4089_v5  ;;  %v16587_v19 = vld [vmem:[#allocation145_spill] sm:$0xff]  ;;  %v16588_v5 = vld [vmem:[#allocation146_spill] sm:$0xff] }
 0x37f   : > { %v4092_v34 = vsel %vm4091_vm4, %v15056_v10, -inf }
 0x380   : > { %4093 = vmax.xlane.f32.xlu0 %v4092_v34  ;;  %11197 = vmatpush3.bf16.msra.mxu1 %v16577_v15  ;;  %v16593_v34 = vld [vmem:[#allocation157_spill] sm:$0xff] }
 0x381   : > { %10909 = vmatpush3.bf16.msra.mxu0 %v16574_v35  ;;  %11199 = vmatprep.subr.bf16.mxu1 %v16579_v49 }
 0x382   : > { %10911 = vmatprep.subr.bf16.mxu0 %v16576_v59 }
 0x384   : > { %11201 = vmatpush3.bf16.msra.mxu1 %v16580_v58  ;;  %v16596_v58 = vld [vmem:[#allocation208_spill] sm:$0xff] }
 0x385   : > { %10913 = vmatpush3.bf16.msra.mxu0 %v16578_v33  ;;  %9693 = vmatprep.subr.mxu1 %v16583_v43  ;;  %v16595_v33 = vld [vmem:[#allocation163_spill] sm:$0xff] }
 0x386   : > { %10947 = vmatprep.subr.bf16.mxu0 %v16460_v41 }
 0x387   : > { %7460 = vmatmul.mubr.f32.vlgmr.msra.gmra.mrb[46].mxu1 %v14960_v0 }
 0x388   : > { %6184 = vmatmul.mubr.f32.vlgmr.msra.gmra.mrb[38].mxu0 %v14820_v32  ;;  %9694 = vmatpush3.msra.mxu1 %v16584_v9  ;;  %v16600_v9 = vld [vmem:[#allocation219_spill] sm:$0xff] }
 0x389   : > { %10949 = vmatpush3.bf16.msra.mxu0 %v16461_v46  ;;  %6426 = vmatprep.mubr.f32.mxu0 %v16581_v7  ;;  %v16597_v7 = vld [vmem:[#allocation210_spill] sm:$0xff] }
 0x38a   : > { %10951 = vmatprep.subr.bf16.mxu0 %v16582_v61  ;;  %9695 = vmatprep.mubr.msk.f32.mxu1 %vm11446_vm0, %v16583_v43  ;;  %v16599_v43 = vld [vmem:[#allocation217_spill] sm:$0xff] }
 0x38d   : > { %10953 = vmatpush3.bf16.msra.mxu0 %v16585_v52 }
 0x38e   : > { %10955 = vmatprep.subr.bf16.mxu0 %v16586_v24 }
 0x391   : > { %10957 = vmatpush3.bf16.msra.mxu0 %v16587_v19 }
 0x392   : > { %10959 = vmatprep.subr.bf16.mxu0 %v16588_v5 }
 0x395   : > { %10961 = vmatpush3.bf16.msra.mxu0 %v16589_v26 }
 0x396   : > { %10963 = vmatprep.subr.bf16.mxu0 %v16590_v37 }
 0x399   : > { %10965 = vmatpush3.bf16.msra.mxu0 %v16591_v1  ;;  %v9228_v4 = vpop.f32.mrb[34].mxu1 }
 0x39a   : > { %10967 = vmatprep.subr.bf16.mxu0 %v16592_v21  ;;  %v9229_v20 = vpop.f32.mrb[35].mxu1 }
 0x39b   : > { %v8913_v57 = vpop.f32.mrb[26].mxu0  ;;  %v15092_v59 = vadd.f32 %v9229_v20, %v9228_v4  ;;  %v16610_v4 = vld [vmem:[#allocation237_spill] sm:$0xff] }
 0x39c   : > { %v8914_v8 = vpop.f32.mrb[27].mxu0 }
 0x39d   : > { %v8915_v47 = vadd.f32 %v8914_v8, %v8913_v57  ;;  %10969 = vmatpush3.bf16.msra.mxu0 %v16593_v34 }
 0x39e   : > { %10971 = vmatprep.subr.bf16.mxu0 %v16594_v53 }
 0x39f   : > { %v4462_v35 = vadd.f32 %v8915_v47, %v14903_v28 }
 0x3a1   : > { %v4600_v15 = vadd.f32 %v14909_v40, %v4462_v35  ;;  %10973 = vmatpush3.bf16.msra.mxu0 %v16595_v33  ;;  %v16611_v35 = vld [vmem:[#allocation240_spill] sm:$0xff] }
 0x3a2   : > { %10975 = vmatprep.subr.bf16.mxu0 %v16474_v22 }
 0x3a5   : > { %10977 = vmatpush3.bf16.msra.mxu0 %v16476_v14 }
 0x3a6   : > { %11011 = vmatprep.subr.bf16.mxu0 %v16460_v41 }
 0x3a8   : > { %6430 = vmatmul.mubr.f32.vlgmr.msra.gmra.mrb[40].mxu0 %v5949_v54 }
 0x3a9   : > { %11013 = vmatpush3.bf16.msra.mxu0 %v16461_v46  ;;  %6700 = vmatprep.mubr.f32.mxu0 %v14816_v31 }
 0x3aa   : > { %11015 = vmatprep.subr.bf16.mxu0 %v16582_v61  ;;  %v16598_v61 = vld [vmem:[#allocation215_spill] sm:$0xff] }
 0x3ad   : > { %11017 = vmatpush3.bf16.msra.mxu0 %v16585_v52  ;;  %v16602_v52 = vld [vmem:[#allocation223_spill] sm:$0xff] }
 0x3ae   : > { %11019 = vmatprep.subr.bf16.mxu0 %v16586_v24  ;;  %v16605_v24 = vld [vmem:[#allocation227_spill] sm:$0xff] }
 0x3b1   : > { %11021 = vmatpush3.bf16.msra.mxu0 %v16587_v19 }
 0x3b2   : > { %11023 = vmatprep.subr.bf16.mxu0 %v16588_v5 }
 0x3b5   : > { %11025 = vmatpush3.bf16.msra.mxu0 %v16589_v26 }
 0x3b6   : > { %11027 = vmatprep.subr.bf16.mxu0 %v16590_v37  ;;  %v16607_v37 = vld [vmem:[#allocation231_spill] sm:$0xff] }
 0x3b9   : > { %11029 = vmatpush3.bf16.msra.mxu0 %v16591_v1  ;;  %v9298_v50 = vpop.f32.mrb[36].mxu1  ;;  %v16608_v1 = vld [vmem:[#allocation233_spill] sm:$0xff] }
 0x3ba   : > { %11031 = vmatprep.subr.bf16.mxu0 %v16592_v21  ;;  %v9299_v28 = vpop.f32.mrb[37].mxu1 }
 0x3bb   : > { %v8983_v54 = vpop.f32.mrb[28].mxu0  ;;  %v15114_v40 = vadd.f32 %v9299_v28, %v9298_v50 }
 0x3bc   : > { %v8984_v41 = vpop.f32.mrb[29].mxu0 }
 0x3bd   : > { %v8985_v46 = vadd.f32 %v8984_v41, %v8983_v54  ;;  %11033 = vmatpush3.bf16.msra.mxu0 %v16593_v34 }
 0x3be   : > { %11035 = vmatprep.subr.bf16.mxu0 %v16594_v53  ;;  %v16609_v53 = vld [vmem:[#allocation236_spill] sm:$0xff] }
 0x3bf   : > { %v4708_v31 = vadd.f32 %v8985_v46, %v4600_v15 }
 0x3c1   : > { %v4876_v49 = vadd.f32 %v14956_v63, %v4708_v31  ;;  %11037 = vmatpush3.bf16.msra.mxu0 %v16595_v33  ;;  %v16601_v63 = vld [vmem:[#allocation221_spill] sm:$0xff] }
 0x3c2   : > { %11039 = vmatprep.subr.bf16.mxu0 %v16474_v22  ;;  %v16603_v22 = vld [vmem:[#allocation225_spill] sm:$0xff] }
 0x3c5   : > { %11041 = vmatpush3.bf16.msra.mxu0 %v16476_v14  ;;  %v16604_v14 = vld [vmem:[#allocation226_spill] sm:$0xff] }
 0x3c6   : > { %11075 = vmatprep.subr.bf16.mxu0 %v16596_v58 }
 0x3c8   : > { %6702 = vmatmul.mubr.f32.vlgmr.msra.gmra.mrb[42].mxu0 %v14820_v32  ;;  %v16606_v32 = vld [vmem:[#allocation229_spill] sm:$0xff] }
 0x3c9   : > { %11077 = vmatpush3.bf16.msra.mxu0 %v16597_v7  ;;  %7044 = vmatprep.mubr.f32.mxu0 %v14951_v48 }
 0x3ca   : > { %11079 = vmatprep.subr.bf16.mxu0 %v16598_v61 }
 0x3cd   : > { %11081 = vmatpush3.bf16.msra.mxu0 %v16599_v43 }
 0x3ce   : > { %11083 = vmatprep.subr.bf16.mxu0 %v16600_v9 }
 0x3d1   : > { %11085 = vmatpush3.bf16.msra.mxu0 %v16601_v63 }
 0x3d2   : > { %11087 = vmatprep.subr.bf16.mxu0 %v16602_v52 }
 0x3d5   : > { %11089 = vmatpush3.bf16.msra.mxu0 %v16603_v22 }
 0x3d6   : > { %11091 = vmatprep.subr.bf16.mxu0 %v16604_v14 }
 0x3d9   : > { %11093 = vmatpush3.bf16.msra.mxu0 %v16605_v24 }
 0x3da   : > { %11095 = vmatprep.subr.bf16.mxu0 %v16606_v32  ;;  %v9368_v21 = vpop.f32.mrb[38].mxu1 }
 0x3db   : > { %v9053_v19 = vpop.f32.mrb[30].mxu0  ;;  %v9369_v8 = vpop.f32.mrb[39].mxu1 }
 0x3dc   : > { %v9054_v5 = vpop.f32.mrb[31].mxu0  ;;  %v15135_v47 = vadd.f32 %v9369_v8, %v9368_v21 }
 0x3dd   : > { %v9055_v26 = vadd.f32 %v9054_v5, %v9053_v19  ;;  %11097 = vmatpush3.bf16.msra.mxu0 %v16607_v37 }
 0x3de   : > { %11099 = vmatprep.subr.bf16.mxu0 %v16608_v1 }
 0x3df   : > { %v4980_v57 = vadd.f32 %v9055_v26, %v4876_v49 }
 0x3e1   : > { %v5092_v34 = vadd.f32 %v15013_v56, %v4980_v57  ;;  %11101 = vmatpush3.bf16.msra.mxu0 %v16609_v53 }
 0x3e2   : > { %11103 = vmatprep.subr.bf16.mxu0 %v16610_v4 }
 0x3e5   : > { %11105 = vmatpush3.bf16.msra.mxu0 %v16611_v35 }
 0x3e6   : > { %11139 = vmatprep.subr.bf16.mxu0 %v16274_v16 }
 0x3e8   : > { %7046 = vmatmul.mubr.f32.vlgmr.msra.gmra.mrb[44].mxu0 %v14960_v0 }
 0x3e9   : > { %11141 = vmatpush3.bf16.msra.mxu0 %v16279_v29  ;;  %7288 = vmatprep.mubr.f32.mxu0 %v6805_v18 }
 0x3ea   : > { %11143 = vmatprep.subr.bf16.mxu0 %v16281_v27 }
 0x3ed   : > { %11145 = vmatpush3.bf16.msra.mxu0 %v13986_v25 }
 0x3ee   : > { %11147 = vmatprep.subr.bf16.mxu0 %v16284_v51 }
 0x3f1   : > { %11149 = vmatpush3.bf16.msra.mxu0 %v16287_v2 }
 0x3f2   : > { %11151 = vmatprep.subr.bf16.mxu0 %v16288_v23 }
 0x3f5   : > { %11153 = vmatpush3.bf16.msra.mxu0 %v16291_v11 }
 0x3f6   : > { %11155 = vmatprep.subr.bf16.mxu0 %v14081_v17 }
 0x3f9   : > { %11157 = vmatpush3.bf16.msra.mxu0 %v16296_v12 }
 0x3fa   : > { %11159 = vmatprep.subr.bf16.mxu0 %v16297_v60  ;;  %v9438_v20 = vpop.f32.mrb[40].mxu1 }
 0x3fb   : > { %v9123_v3 = vpop.f32.mrb[32].mxu0  ;;  %v9439_v33 = vpop.f32.mrb[41].mxu1 }
 0x3fc   : > { %v9124_v18 = vpop.f32.mrb[33].mxu0  ;;  %v9440_v54 = vadd.f32 %v9439_v33, %v9438_v20  ;;  %v560_v20 = vld [vmem:[%s404_s29] sm:$0xff] }
 0x3fd   : > { %v9125_v56 = vadd.f32 %v9124_v18, %v9123_v3  ;;  %11161 = vmatpush3.bf16.msra.mxu0 %v14179_v38  ;;  %v16612_v3 = vstv %s14740_s22  ;;  %s15214_s22 = sand.u32 1, %s11434_s10  }
 0x3fe   : > { %11163 = vmatprep.subr.bf16.mxu0 %v16526_v30  ;;  %s7980_s23 = sshll.u32 %s15214_s22, 7 }
 0x3ff   : > { %v5324_v15 = vadd.f32 %v9125_v56, %v5092_v34  ;;  %s15227_s26 = scalar_lea.vmem [#allocation5], %s7980_s23 }
 0x400   : > { %s7779_s28 = sshll.u32 %s15227_s26, 4  ;;  %s15272_s28 = int_to_ptr.vmem [resolvable:$true] %s7779_s28 }
 0x401   : > { %v5462_v41 = vadd.f32 %v15060_v45, %v5324_v15  ;;  %11165 = vmatpush3.bf16.msra.mxu0 %v16528_v6 }
 0x402   : > { %11167 = vmatprep.subr.bf16.mxu0 %v16530_v55 }
 0x405   : > { %11169 = vmatpush3.bf16.msra.mxu0 %v16532_v39 }
 0x406   : > { %11203 = vmatprep.subr.bf16.mxu0 %v16274_v16 }
 0x408   : > { %7292 = vmatmul.mubr.f32.vlgmr.msra.gmra.mrb[46].mxu0 %v6811_v13 }
 0x409   : > { %11205 = vmatpush3.bf16.msra.mxu0 %v16279_v29  ;;  %7562 = vmatprep.mubr.f32.mxu0 %v14951_v48 }
 0x40a   : > { %11207 = vmatprep.subr.bf16.mxu0 %v16281_v27 }
 0x40d   : > { %11209 = vmatpush3.bf16.msra.mxu0 %v13986_v25  ;;  %v4094_v45 = vpop.xlane.xlu0 %4093 }
 0x40e   : > { %v4095_v46 = vsub.f32 %v15056_v10, %v4094_v45  ;;  %11211 = vmatprep.subr.bf16.mxu0 %v16284_v51 }
 0x410   : > { %v4096_v50 = vmul.f32 1.442695, %v4095_v46 }
 0x411   : > { %11213 = vmatpush3.bf16.msra.mxu0 %v16287_v2 }
 0x412   : > { %11295 = vpow2.f32 %v4096_v50  ;;  %11215 = vmatprep.subr.bf16.mxu0 %v16288_v23 }
 0x413   : > { %11297 = vlog2.f32 %v560_v20 }
 0x415   : > { %11217 = vmatpush3.bf16.msra.mxu0 %v16291_v11 }
 0x416   : > { %11219 = vmatprep.subr.bf16.mxu0 %v14081_v17 }
 0x419   : > { %11221 = vmatpush3.bf16.msra.mxu0 %v16296_v12 }
 0x41a   : > { %11223 = vmatprep.subr.bf16.mxu0 %v16297_v60  ;;  %v9508_v23 = vpop.f32.mrb[42].mxu1 }
 0x41b   : > { %v9193_v25 = vpop.f32.mrb[34].mxu0  ;;  %v9509_v17 = vpop.f32.mrb[43].mxu1 }
 0x41c   : > { %v15176_v16 = vpop.eup %11295  ;;  %v9194_v29 = vpop.f32.mrb[35].mxu0  ;;  %v9510_v11 = vadd.f32 %v9509_v17, %v9508_v23 }
 0x41d   : > { %v9195_v27 = vadd.f32 %v9194_v29, %v9193_v25  ;;  %11225 = vmatpush3.bf16.msra.mxu0 %v14179_v38  ;;  %v4098_v2 = vsel %vm4091_vm4, %v15176_v16, 0.0  ;;  %v11298_v46 = vpop.eup %11297 }
 0x41e   : > { %4099 = vadd.xlane.f32.xlu1 %v4098_v2  ;;  %11227 = vmatprep.subr.bf16.mxu0 %v16526_v30  ;;  %v4104_v50 = vmul.f32 0.6931472, %v11298_v46 }
 0x41f   : > { %v5570_v51 = vadd.f32 %v9195_v27, %v5462_v41 }
 0x420   : > { %v4105_v25 = vsub.f32 0.0, %v4104_v50 }
 0x421   : > { %v5738_v12 = vadd.f32 %v15092_v59, %v5570_v51  ;;  %11229 = vmatpush3.bf16.msra.mxu0 %v16528_v6 }
 0x422   : > { %11231 = vmatprep.subr.bf16.mxu0 %v16530_v55  ;;  %11299 = vlog2.f32 %v4105_v25 }
 0x425   : > { %11233 = vmatpush3.bf16.msra.mxu0 %v16532_v39 }
 0x428   : > { %7564 = vmatmul.mubr.f32.vlgmr.msra.gmra.mrb[48].mxu0 %v14960_v0 }
 0x42c   : > { %v11300_v29 = vpop.eup %11299 }
 0x42d   : > { %v4107_v27 = vmul.f32 0.6931472, %v11300_v29  ;;  %v11323_v29 = vld [vmem:[%s14627_s16] sm:$0xff] }
 0x42f   : > { %v4108_v2 = vsub.f32 0.0, %v4107_v27 }
 0x43a   : > { %v9578_v62 = vpop.f32.mrb[44].mxu1 }
 0x43b   : > { %v9263_v38 = vpop.f32.mrb[36].mxu0  ;;  %v9579_v30 = vpop.f32.mrb[45].mxu1 }
 0x43c   : > { %v9264_v60 = vpop.f32.mrb[37].mxu0  ;;  %v9580_v10 = vadd.f32 %v9579_v30, %v9578_v62 }
 0x43d   : > { %v9265_v48 = vadd.f32 %v9264_v60, %v9263_v38 }
 0x43f   : > { %v5842_v13 = vadd.f32 %v9265_v48, %v5738_v12 }
 0x441   : > { %v5954_v31 = vadd.f32 %v15114_v40, %v5842_v13 }
 0x45a   : > { %v9648_v58 = vpop.f32.mrb[46].mxu1 }
 0x45b   : > { %v9333_v28 = vpop.f32.mrb[38].mxu0  ;;  %v9649_v7 = vpop.f32.mrb[47].mxu1 }
 0x45c   : > { %v9334_v49 = vpop.f32.mrb[39].mxu0  ;;  %v9650_v55 = vadd.f32 %v9649_v7, %v9648_v58 }
 0x45d   : > { %v9335_v59 = vadd.f32 %v9334_v49, %v9333_v28 }
 0x45f   : > { %v6186_v6 = vadd.f32 %v9335_v59, %v5954_v31 }
 0x461   : > { %v6324_v39 = vadd.f32 %v15135_v47, %v6186_v6 }
 0x47b   : > { %v9403_v61 = vpop.f32.mrb[40].mxu0 }
 0x47c   : > { %v9404_v0 = vpop.f32.mrb[41].mxu0 }
 0x47d   : > { %v9405_v43 = vadd.f32 %v9404_v0, %v9403_v61 }
 0x47f   : > { %v6432_v9 = vadd.f32 %v9405_v43, %v6324_v39 }
 0x481   : > { %v6600_v63 = vadd.f32 %v9440_v54, %v6432_v9 }
 0x49b   : > { %v9473_v52 = vpop.f32.mrb[42].mxu0 }
 0x49c   : > { %v9474_v22 = vpop.f32.mrb[43].mxu0 }
 0x49d   : > { %v9475_v14 = vadd.f32 %v9474_v22, %v9473_v52 }
 0x49f   : > { %v6704_v24 = vadd.f32 %v9475_v14, %v6600_v63 }
 0x4a1   : > { %v6816_v32 = vadd.f32 %v9510_v11, %v6704_v24 }
 0x4ab   : > { %v4100_v23 = vpop.xlane.xlu1 %4099 }
 0x4ac   : > { %11301 = vrcp.f32 %v4100_v23 }
 0x4bb   : > { %v9543_v40 = vpop.f32.mrb[44].mxu0 }
 0x4bc   : > { %v9544_v19 = vpop.f32.mrb[45].mxu0 }
 0x4bd   : > { %v9545_v5 = vadd.f32 %v9544_v19, %v9543_v40  ;;  %v11316_v19 = vld [vmem:[%s11999_s24 + $0x8] sm:$0xff] }
 0x4bf   : > { %v7048_v26 = vadd.f32 %v9545_v5, %v6816_v32  ;;  %v11315_v32 = vld [vmem:[%s11999_s24] sm:$0xff] }
 0x4c1   : > { %v7186_v37 = vadd.f32 %v9580_v10, %v7048_v26  ;;  %v11317_v26 = vld [vmem:[%s11999_s24 + $0x10] sm:$0xff] }
 0x4db   : > { %v9613_v1 = vpop.f32.mrb[46].mxu0 }
 0x4dc   : > { %v9614_v21 = vpop.f32.mrb[47].mxu0 }
 0x4dd   : > { %v9615_v57 = vadd.f32 %v9614_v21, %v9613_v1  ;;  %v11318_v1 = vld [vmem:[%s11999_s24 + $0x18] sm:$0xff] }
 0x4df   : > { %v7294_v8 = vadd.f32 %v9615_v57, %v7186_v37  ;;  %v11319_v57 = vld [vmem:[%s11999_s24 + $0x20] sm:$0xff] }
 0x4e1   : > { %v7462_v47 = vadd.f32 %v9650_v55, %v7294_v8  ;;  %v11448_v55 = vmov 0  }
 0x4e2   : > { %11293 = vset.pattern.permute.xlu1 %v11448_v55  ;;  %11294 = vset.pattern.permute.xlu0 %v11448_v55 }
 0x4fb   : > { %v9683_v34 = vpop.f32.mrb[48].mxu0 }
 0x4fc   : > { %v9684_v53 = vpop.f32.mrb[49].mxu0 }
 0x4fd   : > { %v9685_v4 = vadd.f32 %v9684_v53, %v9683_v34  ;;  %v11321_v53 = vld [vmem:[%s11999_s24 + $0x30] sm:$0xff] }
 0x4ff   : > { %v7566_v35 = vadd.f32 %v9685_v4, %v7462_v47  ;;  %v11320_v47 = vld [vmem:[%s11999_s24 + $0x28] sm:$0xff] }
 0x501   : > { %vm7569_vm5 = vcmp.ge.f32.partialorder %v7566_v35, 0.0  ;;  %v7570_v18 = vmul.f32 %v7566_v35, %v16612_v3 }
 0x503   : > { %v7571_v56 = vsel %vm7569_vm5, %v7566_v35, %v7570_v18  ;;  %v11322_v35 = vld [vmem:[%s11999_s24 + $0x38] sm:$0xff]  ;;  %s15239_s24 = scalar_lea.vmem [#allocation6], %s7980_s23  ;;  %s11449_s23 = smov [#allocation5]  }
 0x504   : > { %9696 = vmatmul.mubr.msk.f32.vlgmr.msra.gmra.mrb[48].mxu1 %vm4013_vm2, %v7571_v56  ;;  %s11348_s13 = sshll.u32 %s11449_s23, 4  ;;  %s11349_s13 = int_to_ptr.vmem [resolvable:$false] %s11348_s13 }
 0x505   : > { %s11350_s0 = scalar_lea.vmem %s11349_s13, 4096  ;;  %p11351_p13 = scmp.lt.s32.totalorder %s15272_s28, %s11349_s13 }
 0x5d7   : > { %v7641_v15 = vpop.f32.mrb[48].mxu1 }
 0x5d8   : > { %vm7645_vm6 = vcmp.ge.f32.partialorder %v7641_v15, 0.0  ;;  %v7646_v33 = vmul.f32 %v7641_v15, %v4088_v44  ;;  %v9697_v54 = vpop.f32.mrb[49].mxu1  ;;  %v11302_v44 = vpop.eup %11301 }
 0x5d9   : > { %v4102_v12 = vmul.f32 %v11302_v44, %v15176_v16 }
 0x5da   : > { %v7647_v41 = vsel %vm7645_vm6, %v7641_v15, %v7646_v33 }
 0x5db   : > { %v7648_v45 = vsel %vm4091_vm4, %v7647_v41, -inf  ;;  %v4109_v48 = vadd.f32 %v4108_v2, %v4102_v12  ;;  %v11327_v12 = vld [vmem:[%s14627_s16 + $0x20] sm:$0xff] }
 0x5dc   : > { %7649 = vmax.xlane.f32.xlu0 %v7648_v45 }
 0x5dd   : > { %v4110_v62 = vsel %vm4091_vm4, %v4109_v48, -inf }
 0x5f2   : > { %7660 = vrot.lane.b32.xlu0 %v4108_v2, %s11447_s21  ;;  %s412_s21 = scalar_lea.vmem %s15371_s9, %s15193_s25  ;;  %v11324_v2 = vld [vmem:[%s14627_s16 + $0x8] sm:$0xff]  ;;  %s7793_s25 = sshll.u32 %s15239_s24, 4  ;;  %s15291_s25 = int_to_ptr.vmem [resolvable:$true] %s7793_s25 }
 0x669   : > { %v7650_v51 = vpop.xlane.xlu0 %7649 }
 0x66a   : > { %v7651_v17 = vsub.f32 %v7647_v41, %v7650_v51  ;;  %v11325_v51 = vld [vmem:[%s14627_s16 + $0x10] sm:$0xff] }
 0x66c   : > { %v7652_v11 = vmul.f32 1.442695, %v7651_v17 }
 0x66d   : > { %v7661_v49 = vpop.permute.xlu0 %7660 }
 0x66e   : > { %11303 = vpow2.f32 %v7652_v11  ;;  %v11326_v11 = vld [vmem:[%s14627_s16 + $0x18] sm:$0xff] }
 0x678   : > { %v11304_v38 = vpop.eup %11303 }
 0x679   : > { %v7654_v60 = vsel %vm4091_vm4, %v11304_v38, 0.0 }
 0x67a   : > { %7655 = vadd.xlane.f32.xlu1 %v7654_v60  ;;  %v11328_v60 = vld [vmem:[%s14627_s16 + $0x28] sm:$0xff] }
 0x67e   : > { %4111 = vmax.xlane.f32.xlu1 %v4110_v62 }
 0x707   : > { %v7656_v13 = vpop.xlane.xlu1 %7655 }
 0x708   : > { %11305 = vrcp.f32 %v7656_v13 }
 0x70b   : > { %v4112_v30 = vpop.xlane.xlu1 %4111 }
 0x70c   : > { %v4113_v10 = vsub.f32 %v4109_v48, %v4112_v30 }
 0x70e   : > { %v4114_v31 = vmul.f32 1.442695, %v4113_v10 }
 0x710   : > { %11307 = vpow2.f32 %v4114_v31 }
 0x712   : > { %v11306_v28 = vpop.eup %11305 }
 0x713   : > { %v7658_v59 = vmul.f32 %v11306_v28, %v11304_v38 }
 0x715   : > { %v7663_v58 = vadd.f32 %v7661_v49, %v7658_v59 }
 0x717   : > { %v7664_v16 = vsel %vm4091_vm4, %v7663_v58, -inf }
 0x718   : > { %7665 = vmax.xlane.f32.xlu1 %v7664_v16 }
 0x71a   : > { %v11308_v6 = vpop.eup %11307 }
 0x71b   : > { %v4116_v7 = vsel %vm4091_vm4, %v11308_v6, 0.0 }
 0x71c   : > { %4117 = vadd.xlane.f32.xlu1 %v4116_v7 }
 0x7a5   : > { %v7666_v39 = vpop.xlane.xlu1 %7665 }
 0x7a6   : > { %v7667_v61 = vsub.f32 %v7663_v58, %v7666_v39 }
 0x7a8   : > { %v7668_v0 = vmul.f32 1.442695, %v7667_v61 }
 0x7a9   : > { %v4118_v43 = vpop.xlane.xlu1 %4117 }
 0x7aa   : > { %11309 = vpow2.f32 %v7668_v0 }
 0x7ab   : > { %11311 = vrcp.f32 %v4118_v43 }
 0x7b4   : > { %v11310_v9 = vpop.eup %11309 }
 0x7b5   : > { %v11312_v63 = vpop.eup %11311  ;;  %v7670_v52 = vsel %vm4091_vm4, %v11310_v9, 0.0 }
 0x7b6   : > { %7671 = vadd.xlane.f32.xlu1 %v7670_v52  ;;  %v4120_v22 = vmul.f32 %v11312_v63, %v11308_v6 }
 0x7b8   : > { %7749 = vst.msk [vmem:[%s408_s17] sm:$0xff] %vm4091_vm4, %v4120_v22  ;;  %s11344_s17 = scalar_lea.vmem %s15272_s28, 2048 }
 0x7b9   : > { %p11345_p10 = scmp.ne.s32.totalorder %s15272_s28, %s11344_s17  ;;  %p11352_p0 = scmp.lt.s32.totalorder %s11350_s0, %s11344_s17 }
 0x7bb   : > { %p11346_p11 = pnand %p11345_p10, %p11539_p5  ;;  %p11353_p1 = por %p11352_p0, %p11351_p13 }
 0x7bd   : > { %p11347_p12 = pneg %p11346_p11 }
 0x7bf   : > { %p11354_p2 = pnand %p11353_p1, %p11347_p12 }
 0x7c7   : > { %7677 = vperm.xlu1 %11293, %v4120_v22  }
 0x843   : > { %v7672_v14 = vpop.xlane.xlu1 %7671 }
 0x844   : > { %11313 = vrcp.f32 %v7672_v14 }
 0x847   : > { %v7678_v24 = vpop.permute.xlu1 %7677 }
 0x848   : > { %v7680_v40 = vmul.f32 %v11315_v32, %v7678_v24  ;;  %v7681_v5 = vmul.f32 %v11316_v19, %v7678_v24  ;;  %v7682_v37 = vmul.f32 %v11317_v26, %v7678_v24  ;;  %v7683_v21 = vmul.f32 %v11318_v1, %v7678_v24 }
 0x849   : > { %v7684_v8 = vmul.f32 %v11319_v57, %v7678_v24  ;;  %v7685_v34 = vmul.f32 %v11320_v47, %v7678_v24  ;;  %v7686_v4 = vmul.f32 %v11321_v53, %v7678_v24  ;;  %v7687_v3 = vmul.f32 %v11322_v35, %v7678_v24 }
 0x84a   : > { %7701 = vst [vmem:[%s15227_s26] sm:$0xff] %v7680_v40  ;;  %7702 = vst [vmem:[%s15227_s26 + $0x8] sm:$0xff] %v7681_v5  ;;  %v7717_v18 = vsub.f32 %v11315_v32, %v7680_v40  ;;  %v7718_v56 = vsub.f32 %v11316_v19, %v7681_v5  ;;  %v7719_v20 = vsub.f32 %v11317_v26, %v7682_v37 }
 0x84b   : > { %7703 = vst [vmem:[%s15227_s26 + $0x10] sm:$0xff] %v7682_v37  ;;  %7704 = vst [vmem:[%s15227_s26 + $0x18] sm:$0xff] %v7683_v21  ;;  %v7720_v15 = vsub.f32 %v11318_v1, %v7683_v21  ;;  %v7721_v33 = vsub.f32 %v11319_v57, %v7684_v8  ;;  %v7722_v54 = vsub.f32 %v11320_v47, %v7685_v34 }
 0x84c   : > { %7705 = vst [vmem:[%s15227_s26 + $0x20] sm:$0xff] %v7684_v8  ;;  %7706 = vst [vmem:[%s15227_s26 + $0x28] sm:$0xff] %v7685_v34  ;;  %v7723_v41 = vsub.f32 %v11321_v53, %v7686_v4  ;;  %v7724_v45 = vsub.f32 %v11322_v35, %v7687_v3 }
 0x84d   : > { %7707 = vst [vmem:[%s15227_s26 + $0x30] sm:$0xff] %v7686_v4  ;;  %7708 = vst [vmem:[%s15227_s26 + $0x38] sm:$0xff] %v7687_v3 }
 0x84e   : > { %7725 = vst [vmem:[%s15239_s24] sm:$0xff] %v7717_v18  ;;  %7726 = vst [vmem:[%s15239_s24 + $0x8] sm:$0xff] %v7718_v56  ;;  %v11314_v46 = vpop.eup %11313 }
 0x84f   : > { %7727 = vst [vmem:[%s15239_s24 + $0x10] sm:$0xff] %v7719_v20  ;;  %7728 = vst [vmem:[%s15239_s24 + $0x18] sm:$0xff] %v7720_v15  ;;  %v7674_v50 = vmul.f32 %v11314_v46, %v11310_v9 }
 0x850   : > { %7729 = vst [vmem:[%s15239_s24 + $0x20] sm:$0xff] %v7721_v33  ;;  %7730 = vst [vmem:[%s15239_s24 + $0x28] sm:$0xff] %v7722_v54 }
 0x851   : > { %7731 = vst [vmem:[%s15239_s24 + $0x30] sm:$0xff] %v7723_v41  ;;  %7732 = vst [vmem:[%s15239_s24 + $0x38] sm:$0xff] %v7724_v45  ;;  %7690 = vperm.xlu0 %11294, %v7674_v50  }
 0x852   : > { %7750 = vst.msk [vmem:[%s412_s21] sm:$0xff] %vm4091_vm4, %v7674_v50  ;;  %s15289_s21 = scalar_lea.hbm %s15369_s7, %s8002_s14 }
 0x8d0   : > { %v7691_v25 = vpop.permute.xlu0 %7690 }
 0x8d1   : > { %v7693_v27 = vmul.f32 %v11323_v29, %v7691_v25  ;;  %v7694_v23 = vmul.f32 %v11324_v2, %v7691_v25  ;;  %v7695_v17 = vmul.f32 %v11325_v51, %v7691_v25  ;;  %v7696_v44 = vmul.f32 %v11326_v11, %v7691_v25 }
 0x8d2   : > { %v7697_v38 = vmul.f32 %v11327_v12, %v7691_v25  ;;  %v7698_v48 = vmul.f32 %v11328_v60, %v7691_v25  ;;  %v7699_v62 = vmul.f32 %v7691_v25, %v14954_v42  ;;  %v7700_v13 = vmul.f32 %v7691_v25, %v14948_v36 }
 0x8d3   : > { %7709 = vst [vmem:[%s15227_s26 + $0x40] sm:$0xff] %v7693_v27  ;;  %7710 = vst [vmem:[%s15227_s26 + $0x48] sm:$0xff] %v7694_v23  ;;  %v7733_v30 = vsub.f32 %v11323_v29, %v7693_v27  ;;  %v7734_v10 = vsub.f32 %v11324_v2, %v7694_v23  ;;  %v7735_v31 = vsub.f32 %v11325_v51, %v7695_v17 }
 0x8d4   : > { %7711 = vst [vmem:[%s15227_s26 + $0x50] sm:$0xff] %v7695_v17  ;;  %7712 = vst [vmem:[%s15227_s26 + $0x58] sm:$0xff] %v7696_v44  ;;  %v7736_v28 = vsub.f32 %v11326_v11, %v7696_v44  ;;  %v7737_v49 = vsub.f32 %v11327_v12, %v7697_v38  ;;  %v7738_v59 = vsub.f32 %v11328_v60, %v7698_v48 }
 0x8d5   : > { %7713 = vst [vmem:[%s15227_s26 + $0x60] sm:$0xff] %v7697_v38  ;;  %7714 = vst [vmem:[%s15227_s26 + $0x68] sm:$0xff] %v7698_v48  ;;  %v7739_v58 = vsub.f32 %v14954_v42, %v7699_v62  ;;  %v7740_v16 = vsub.f32 %v14948_v36, %v7700_v13 }
 0x8d6   : > { %7715 = vst [vmem:[%s15227_s26 + $0x70] sm:$0xff] %v7699_v62  ;;  %7716 = vst [vmem:[%s15227_s26 + $0x78] sm:$0xff] %v7700_v13  ;;  %s7752_s26 = scalar_lea.sflag [#allocation3], %s15214_s22 }
 0x8d7   : > { %7741 = vst [vmem:[%s15239_s24 + $0x40] sm:$0xff] %v7733_v30  ;;  %7742 = vst [vmem:[%s15239_s24 + $0x48] sm:$0xff] %v7734_v10 }
 0x8d8   : > { %7743 = vst [vmem:[%s15239_s24 + $0x50] sm:$0xff] %v7735_v31  ;;  %7744 = vst [vmem:[%s15239_s24 + $0x58] sm:$0xff] %v7736_v28 }
 0x8d9   : > { %11357 = shalt.err (!%p11354_p2)
}
 0x8da   : > { %s11358_s14 = scalar_lea.hbm %s15270_s27, 2048  ;;  %s11362_s23 = scalar_lea.hbm %s15368_s6, 8192 }
 0x8db   : > { %p11359_p3 = scmp.ne.s32.totalorder %s15270_s27, %s11358_s14  ;;  %p11363_p8 = scmp.lt.u32.totalorder %s15270_s27, %s15368_s6 }
 0x8dc   : > { %p11364_p9 = scmp.lt.u32.totalorder %s11362_s23, %s11358_s14  ;;  %p11366_p11 = scmp.lt.u32.totalorder %s11358_s14, %s15270_s27 }
 0x8dd   : > { %p11360_p4 = pnand %p11359_p3, %p11539_p5 }
 0x8de   : > { %p11365_p10 = por %p11364_p9, %p11363_p8 }
 0x8df   : > { %p11361_p7 = pneg %p11360_p4 }
 0x8e0   : > { %p11367_p12 = por %p11366_p11, %p11365_p10 }
 0x8e2   : > { %p11368_p13 = pnand %p11367_p12, %p11361_p7 }
 0x8e4   : > { %11371 = shalt.err (!%p11368_p13)
}
 0x8e5   : > { %11238 = dma.vmem_to_hbm [thread:$0]  (%p11539_p5), %s15272_s28, 2048, %s15270_s27, %s7752_s26   ;;  %7745 = vst [vmem:[%s15239_s24 + $0x60] sm:$0xff] %v7737_v49  ;;  %7746 = vst [vmem:[%s15239_s24 + $0x68] sm:$0xff] %v7738_v59 }
 0x8e6   : > { %7747 = vst [vmem:[%s15239_s24 + $0x70] sm:$0xff] %v7739_v58  ;;  %7748 = vst [vmem:[%s15239_s24 + $0x78] sm:$0xff] %v7740_v16  ;;  %s7757_s0 = scalar_lea.sflag [#allocation7], %s15214_s22  ;;  %s11372_s1 = scalar_lea.vmem %s15291_s25, 2048 }
 0x8e7   : > { %p11373_p0 = scmp.ne.s32.totalorder %s15291_s25, %s11372_s1  ;;  %s11450_s17 = smov [#allocation6]  }
 0x8e8   : > { %s11376_s14 = sshll.u32 %s11450_s17, 4  ;;  %s11377_s14 = int_to_ptr.vmem [resolvable:$false] %s11376_s14 }
 0x8e9   : > { %p11374_p1 = pnand %p11373_p0, %p11539_p5  ;;  %s11378_s16 = scalar_lea.vmem %s11377_s14, 4096 }
 0x8ea   : > { %p11379_p3 = scmp.lt.s32.totalorder %s15291_s25, %s11377_s14  ;;  %p11380_p4 = scmp.lt.s32.totalorder %s11378_s16, %s11372_s1 }
 0x8eb   : > { %p11375_p2 = pneg %p11374_p1 }
 0x8ec   : > { %p11381_p7 = por %p11380_p4, %p11379_p3 }
 0x8ee   : > { %p11382_p8 = pnand %p11381_p7, %p11375_p2 }
 0x8f0   : > { %11385 = shalt.err (!%p11382_p8)
}
 0x8f1   : > { %s11386_s22 = scalar_lea.hbm %s15289_s21, 2048  ;;  %s11390_s27 = scalar_lea.hbm %s15369_s7, 8192 }
 0x8f2   : > { %p11387_p9 = scmp.ne.s32.totalorder %s15289_s21, %s11386_s22  ;;  %p11391_p12 = scmp.lt.u32.totalorder %s15289_s21, %s15369_s7 }
 0x8f3   : > { %p11392_p13 = scmp.lt.u32.totalorder %s11390_s27, %s11386_s22  ;;  %p11394_p1 = scmp.lt.u32.totalorder %s11386_s22, %s15289_s21 }
 0x8f4   : > { %p11388_p10 = pnand %p11387_p9, %p11539_p5 }
 0x8f5   : > { %p11393_p0 = por %p11392_p13, %p11391_p12 }
 0x8f6   : > { %p11389_p11 = pneg %p11388_p10 }
 0x8f7   : > { %p11395_p2 = por %p11394_p1, %p11393_p0 }
 0x8f9   : > { %p11396_p3 = pnand %p11395_p2, %p11389_p11 }
 0x8fb   : > { %11399 = shalt.err (!%p11396_p3)
}
 0x8fc   : > { %11239 = dma.vmem_to_hbm [thread:$0]  (%p11539_p5), %s15291_s25, 2048, %s15289_s21, %s7757_s0  }
 0x8fd PF: > { %p11255_p4 = scmp.ge.s32.totalorder %s11442_s12, 2  ;;  %s7811_s23 = sand.u32 1, %s11430_s30  }
 0x8fe   : > { %s7812_s13 = scalar_lea.sflag [#allocation3], %s7811_s23 }
 0x8ff   : > { %p11247_p7 = pnand %p11255_p4, %p11543_p6 }
 0x901   : > { %11421 = dma.done.wait (!%p11247_p7), %s7812_s13, 2048  }
 0x902   : > { %11423 = vsyncadd (!%p11247_p7), %s7812_s13, 4294965248  ;;  %s7821_s1 = scalar_lea.sflag [#allocation7], %s7811_s23 }
 0x903   : > { %11425 = dma.done.wait (!%p11247_p7), %s7821_s1, 2048  }
 0x904   : > { %11427 = vsyncadd (!%p11247_p7), %s7821_s1, 4294965248  ;;  %p24_p5 = scmp.ge.s32.totalorder %s11526_s15, 6   ;;  %s16613_s30 = smov %s11434_s10 }
 0x905   : > { %s16614_s10 = smov %s11438_s11  ;;  %s16615_s11 = smov %s11537_s18 }
 0x906   : > { %s16616_s12 = smov %s11526_s15  ;;  %26 = sbr.rel (!%p24_p5) target bundleno = 9 (0x9), region = 131 }
 0x90d   :  { %7840 = vsyncpa [#allocation3], 1 }
 0x90e   :  { %7842 = vsyncpa [#allocation3 + $0x1], 1 }
 0x90f   :  { %7843 = vsyncpa [#allocation7], 1 }
 0x910   :  { %7845 = vsyncpa [#allocation7 + $0x1], 1 }
 0x911   :  { %7846 = vsyncpa [#allocation4], 1 }
 0x912   :  { %7848 = vsyncpa [#allocation4 + $0x1], 1 }

</bundles_post_ra>
